<compile_context>
chip_gen: v7x
topology: tpu7x:2x2x1
jax: 0.10.0
libtpu: 0.0.40
codegen_flags: <defaults>
</compile_context>

<pallas_src>
import functools
import math

import jax
import jax.numpy as jnp
from jax import lax
from jax.experimental import pallas as pl
from jax.experimental.pallas import tpu as pltpu


def _round_up(x: int, m: int) -> int:
    return (x + m - 1) // m * m


def _attention_kernel(h_ref, adj_ref, ws_ref, wo_ref, out_ref, *,
                      tile_n: int, key_chunk: int, n_chunks: int,
                      n_valid_chunks: int, n_valid: int):
    """One row tile of the attention layer.

    h_ref   : (Np, Dp)  bf16       node features (VMEM resident, 1 buffer)
    adj_ref : (T,  Np)  int8/bf16  row tile of the adjacency matrix
    ws_ref  : (Dp, Dp)  bf16       W_l @ W_r^T           (folded)
    wo_ref  : (Dp, Dp)  bf16       gamma * (W_h @ W_g)   (folded)
    out_ref : (T,  Dp)  f32
    """
    i = pl.program_id(0)
    row0 = pl.multiple_of(i * tile_n, tile_n)
    dp = h_ref.shape[1]

    h_tile = h_ref[pl.ds(row0, tile_n), :]                       # (T, Dp) bf16

    # Q = H_tile @ (W_l W_r^T): MXU, f32 accumulation, bf16 copy for reuse.
    q = jnp.dot(h_tile, ws_ref[...], preferred_element_type=jnp.float32)
    q_bf = q.astype(jnp.bfloat16)

    # AH = adj_tile @ H (single matmul; storage dtype is exact for 0/1 adj).
    adj_row = adj_ref[...]
    if adj_row.dtype != jnp.bfloat16:
        adj_row = adj_row.astype(jnp.float32)    # int -> f32 (always supported)
    ah = jnp.dot(adj_row.astype(jnp.bfloat16), h_ref[...],
                 preferred_element_type=jnp.float32)             # (T, Dp) f32

    # ---- key-chunked online softmax + un-normalized B accumulation ---------
    def make_body(masked):
        def body(c, carry):
            m, l, acc = carry
            col0 = pl.multiple_of(c * key_chunk, key_chunk)
            hk = h_ref[pl.ds(col0, key_chunk), :]                # (kc, Dp) bf16
            # S chunk = Q @ H_chunk^T (contract dim 1 x dim 1, no transpose).
            s = lax.dot_general(q_bf, hk, (((1,), (1,)), ((), ())),
                                preferred_element_type=jnp.float32)  # (T, kc)
            if masked:
                col = col0 + lax.broadcasted_iota(jnp.int32,
                                                  (tile_n, key_chunk), 1)
                s = jnp.where(col < n_valid, s, -1e30)
            m_new = jnp.maximum(m, jnp.max(s, axis=-1, keepdims=True))
            alpha = jnp.exp(m - m_new)
            e = jnp.exp(s - m_new)                               # (T, kc) f32
            l_new = alpha * l + jnp.sum(e, axis=-1, keepdims=True)
            # Deferred normalization: accumulate e @ H_chunk un-normalized.
            acc_new = alpha * acc + jnp.dot(e.astype(jnp.bfloat16), hk,
                                            preferred_element_type=jnp.float32)
            return m_new, l_new, acc_new
        return body

    carry = (jnp.full((tile_n, 1), -jnp.inf, jnp.float32),
             jnp.zeros((tile_n, 1), jnp.float32),
             jnp.zeros((tile_n, dp), jnp.float32))
    if n_valid_chunks > 0:                    # fully valid chunks: no masking
        carry = lax.fori_loop(0, n_valid_chunks, make_body(False), carry)
    if n_valid_chunks < n_chunks:             # only chunks containing padding
        carry = lax.fori_loop(n_valid_chunks, n_chunks, make_body(True), carry)
    _, l, acc = carry

    # B = acc / l  (normalize the (T, Dp) accumulator, not (T, N) weights).
    b = acc * pl.reciprocal(l, approx=True)
    o = jnp.dot(b.astype(jnp.bfloat16), wo_ref[...],
                preferred_element_type=jnp.float32)              # (T, Dp)

    out_ref[...] = ah + o


def attention_layer(H, adj, W_l, W_r, W_h, W_g, gamma, *,
                    tile_n: int = 256, key_chunk: int = 512,
                    adj_storage_dtype=jnp.bfloat16):
    """Pallas implementation of AttentionLayer.forward(H, adj)."""
    N, D = H.shape
    assert adj.shape == (N, N)

    # ---- Fold H-independent weight products (tiny D x D work) --------------
    #   S = (H W_l)(H W_r)^T = H (W_l W_r^T) H^T
    #   gamma * (B W_h) W_g  = B (gamma * W_h W_g)
    W_s = jnp.dot(W_l, W_r.T)
    W_o = gamma[0] * jnp.dot(W_h, W_g)

    # ---- Padding: lanes -> x128; rows -> multiple of lcm(row tile, chunk) --
    Dp = _round_up(D, 128)
    T = _round_up(min(tile_n, _round_up(N, 32)), 32)
    kc = min(_round_up(key_chunk, 128), _round_up(N, 128))
    Np = _round_up(N, math.lcm(T, kc))
    n_tiles = Np // T
    n_chunks = Np // kc
    n_valid_chunks = N // kc            # chunks with no padded key columns

    # Pad / cast directly in the storage dtypes (no padded f32 copies).
    Hb = jnp.zeros((Np, Dp), jnp.bfloat16).at[:N, :D].set(H.astype(jnp.bfloat16))
    adjb = jnp.zeros((Np, Np), adj_storage_dtype).at[:N, :N].set(
        adj.astype(adj_storage_dtype))
    Wsb = jnp.zeros((Dp, Dp), jnp.bfloat16).at[:D, :D].set(
        W_s.astype(jnp.bfloat16))
    Wob = jnp.zeros((Dp, Dp), jnp.bfloat16).at[:D, :D].set(
        W_o.astype(jnp.bfloat16))

    adj_bytes = jnp.dtype(adj_storage_dtype).itemsize

    # Advisory cost estimate for the XLA scheduler.
    flops = 2 * n_tiles * (T * Dp * Dp          # Q = H_tile @ W_s
                           + T * Np * Dp        # S = Q @ H^T
                           + T * Np * Dp        # e @ H
                           + T * Np * Dp        # adj_tile @ H
                           + T * Dp * Dp)       # O = B @ W_o
    transcendentals = Np * Np                   # softmax exp
    bytes_accessed = (2 * Np * Dp + adj_bytes * Np * Np
                      + 2 * 2 * Dp * Dp + 4 * Np * Dp)

    # Rough VMEM footprint (resident H + single-buffered weights +
    # double-buffered adj/out tiles + in-kernel temporaries).
    vmem_est = (2 * Np * Dp                     # H, 1 buffer
                + 2 * 2 * Dp * Dp               # W_s, W_o, 1 buffer each
                + 2 * T * Np * adj_bytes        # adj row tile, 2 buffers
                + 2 * 4 * T * Dp                # out tile, 2 buffers
                + 6 * T * Np                    # adj upcast temporaries
                + 12 * T * kc                   # s / e chunk temporaries
                + 6 * 4 * T * Dp)               # q, acc, ah, b, o
    vmem_cap = 128 << 20
    try:
        vmem_cap = int(pltpu.get_tpu_info().vmem_capacity_bytes)
    except Exception:
        pass                                    # keep conservative default
    vmem_limit = int(max(32 << 20,
                         min(vmem_est + (16 << 20), vmem_cap - (16 << 20))))

    kernel = functools.partial(_attention_kernel, tile_n=T, key_chunk=kc,
                               n_chunks=n_chunks,
                               n_valid_chunks=n_valid_chunks, n_valid=N)

    def run(single_buffer_resident: bool):
        def resident(shape):
            if single_buffer_resident:
                return pl.BlockSpec(shape, lambda i: (0, 0),
                                    pipeline_mode=pl.Buffered(1))
            return pl.BlockSpec(shape, lambda i: (0, 0))

        out_pad = pl.pallas_call(
            kernel,
            out_shape=jax.ShapeDtypeStruct((Np, Dp), jnp.float32),
            grid_spec=pltpu.PrefetchScalarGridSpec(
                num_scalar_prefetch=0,
                grid=(n_tiles,),
                in_specs=[
                    resident((Np, Dp)),                         # H (resident)
                    pl.BlockSpec((T, Np), lambda i: (i, 0)),    # adj row tile
                    resident((Dp, Dp)),                         # W_s
                    resident((Dp, Dp)),                         # W_o
                ],
                out_specs=pl.BlockSpec((T, Dp), lambda i: (i, 0)),
            ),
            compiler_params=pltpu.CompilerParams(
                dimension_semantics=("parallel",),
                vmem_limit_bytes=vmem_limit,
            ),
            cost_estimate=pl.CostEstimate(flops=flops,
                                          transcendentals=transcendentals,
                                          bytes_accessed=bytes_accessed),
        )(Hb, adjb, Wsb, Wob)
        return jax.block_until_ready(out_pad)

    try:
        out_pad = run(hasattr(pl, "Buffered"))
    except Exception:
        # Fallback if this jax build rejects Buffered(1) on the outer pipeline:
        # default double buffering (correct, slightly more VMEM).
        out_pad = run(False)

    return out_pad[:N, :D]


def xavier_uniform(key, fan_in, fan_out):
    bound = (6.0 / (fan_in + fan_out)) ** 0.5
    return jax.random.uniform(key, (fan_in, fan_out), jnp.float32,
                              minval=-bound, maxval=bound)


def reference(H, adj, W_l, W_r, W_h, W_g, gamma):
    """Pure-f32 JAX transcription of the PyTorch forward."""
    H_l = H @ W_l
    H_r = H @ W_r
    S = H_l @ H_r.T
    beta = jax.nn.softmax(S, axis=-1)
    B = beta @ H
    O = (B @ W_h) @ W_g
    return adj @ H + gamma[0] * O


if __name__ == "__main__":
    # Small graph: 300 nodes, input_dim = 32.  tile_n=128 / key_chunk=128 ->
    # 3-step row grid and 3 key chunks; the last chunk exercises the padded
    # column masking path of the online softmax.
    N, D = 300, 32
    key = jax.random.PRNGKey(0)
    k_h, k_a, k_l, k_r, k_hh, k_g = jax.random.split(key, 6)

    H = jax.random.normal(k_h, (N, D), jnp.float32)
    adj = (jax.random.uniform(k_a, (N, N)) < 0.3).astype(jnp.float32)

    W_l = xavier_uniform(k_l, D, D)
    W_r = xavier_uniform(k_r, D, D)
    W_h = xavier_uniform(k_hh, D, D)
    W_g = xavier_uniform(k_g, D, D)
    # nn.Parameter(torch.FloatTensor([0])) initializes gamma to 0; use a
    # nonzero value so the attention branch is actually exercised.
    gamma = jnp.array([0.5], dtype=jnp.float32)

    out = attention_layer(H, adj, W_l, W_r, W_h, W_g, gamma,
                          tile_n=128, key_chunk=128,
                          adj_storage_dtype=jnp.int8)   # adj is 0/1 -> exact
    out = jax.block_until_ready(out)

    ref = reference(H, adj, W_l, W_r, W_h, W_g, gamma)
    assert out.shape == (N, D)
    # bf16 MXU operands (f32 accumulation) + folded weights + approx
    # reciprocal => compare with a scaled max-abs-error check.
    err = float(jnp.max(jnp.abs(out - ref)))
    scale = float(jnp.maximum(jnp.max(jnp.abs(ref)), 1.0))
    assert err / scale < 2e-2, f"relative max abs err {err / scale} (abs {err})"

    print("KERNEL_OK")
</pallas_src>

<mosaic_0001>
module attributes {stable_mosaic.version = 11 : i64} {
  func.func @_attention_kernel(%arg0: i32, %arg1: memref<384x128xbf16, #tpu.memory_space<vmem>>, %arg2: memref<128x384xi8, #tpu.memory_space<vmem>>, %arg3: memref<128x128xbf16, #tpu.memory_space<vmem>>, %arg4: memref<128x128xbf16, #tpu.memory_space<vmem>>, %arg5: memref<128x128xf32, #tpu.memory_space<vmem>>) attributes {dimension_semantics = [#tpu.dimension_semantics<parallel>], iteration_bounds = array<i64: 3>, scalar_prefetch = 0 : i64, scratch_operands = 0 : i64, tpu.core_type = #tpu.core_type<tc>, window_params = [{pipeline_mode = #tpu.pipeline_mode<synchronous>, transform_indices = @transform_0, window_bounds = array<i64: 384, 128>}, {transform_indices = @transform_1, window_bounds = array<i64: 128, 384>}, {pipeline_mode = #tpu.pipeline_mode<synchronous>, transform_indices = @transform_2, window_bounds = array<i64: 128, 128>}, {pipeline_mode = #tpu.pipeline_mode<synchronous>, transform_indices = @transform_3, window_bounds = array<i64: 128, 128>}, {transform_indices = @transform_4, window_bounds = array<i64: 128, 128>}]} {
    %c128_i32 = arith.constant 128 : i32
    %0 = arith.muli %arg0, %c128_i32 : i32
    %1 = tpu.assume_multiple %0, 128 : i32
    %2 = arith.index_cast %1 : i32 to index
    %c0 = arith.constant 0 : index
    %3 = vector.load %arg1[%2, %c0] : memref<384x128xbf16, #tpu.memory_space<vmem>>, vector<128x128xbf16>
    %c0_0 = arith.constant 0 : index
    %c0_1 = arith.constant 0 : index
    %4 = vector.load %arg3[%c0_0, %c0_1] : memref<128x128xbf16, #tpu.memory_space<vmem>>, vector<128x128xbf16>
    %cst = arith.constant dense<0.000000e+00> : vector<128x128xf32>
    %5 = tpu.matmul %3, %4, %cst {dimension_numbers = #tpu.dot_dimension_numbers<[1], [0], [0], [1], [0, 0, 1, 1], [], []>} : vector<128x128xbf16>, vector<128x128xbf16>, vector<128x128xf32> -> vector<128x128xf32>
    %6 = arith.truncf %5 : vector<128x128xf32> to vector<128x128xbf16>
    %c0_2 = arith.constant 0 : index
    %c0_3 = arith.constant 0 : index
    %7 = vector.load %arg2[%c0_2, %c0_3] : memref<128x384xi8, #tpu.memory_space<vmem>>, vector<128x384xi8>
    %8 = arith.sitofp %7 : vector<128x384xi8> to vector<128x384xf32>
    %9 = arith.truncf %8 : vector<128x384xf32> to vector<128x384xbf16>
    %c0_4 = arith.constant 0 : index
    %c0_5 = arith.constant 0 : index
    %10 = vector.load %arg1[%c0_4, %c0_5] : memref<384x128xbf16, #tpu.memory_space<vmem>>, vector<384x128xbf16>
    %cst_6 = arith.constant dense<0.000000e+00> : vector<128x128xf32>
    %11 = tpu.matmul %9, %10, %cst_6 {dimension_numbers = #tpu.dot_dimension_numbers<[1], [0], [0], [1], [0, 0, 1, 1], [], []>} : vector<128x384xbf16>, vector<384x128xbf16>, vector<128x128xf32> -> vector<128x128xf32>
    %cst_7 = arith.constant 0xFF800000 : f32
    %12 = vector.broadcast %cst_7 : f32 to vector<128x1xf32>
    %cst_8 = arith.constant 0.000000e+00 : f32
    %13 = vector.broadcast %cst_8 : f32 to vector<128x1xf32>
    %cst_9 = arith.constant 0.000000e+00 : f32
    %14 = vector.broadcast %cst_9 : f32 to vector<128x128xf32>
    %c0_i32 = arith.constant 0 : i32
    %c2_i32 = arith.constant 2 : i32
    %15 = arith.addi %c0_i32, %c2_i32 : i32
    %c1_i32 = arith.constant 1 : i32
    %16:3 = scf.for %arg6 = %c0_i32 to %15 step %c1_i32 iter_args(%arg7 = %12, %arg8 = %13, %arg9 = %14) -> (vector<128x1xf32>, vector<128x1xf32>, vector<128x128xf32>)  : i32 {
      %c128_i32_25 = arith.constant 128 : i32
      %54 = arith.muli %arg6, %c128_i32_25 : i32
      %55 = tpu.assume_multiple %54, 128 : i32
      %56 = arith.index_cast %55 : i32 to index
      %c0_26 = arith.constant 0 : index
      %57 = vector.load %arg1[%56, %c0_26] : memref<384x128xbf16, #tpu.memory_space<vmem>>, vector<128x128xbf16>
      %cst_27 = arith.constant dense<0.000000e+00> : vector<128x128xf32>
      %58 = tpu.matmul %6, %57, %cst_27 {dimension_numbers = #tpu.dot_dimension_numbers<[1], [1], [0], [0], [0, 0, 1, 0], [], []>} : vector<128x128xbf16>, vector<128x128xbf16>, vector<128x128xf32> -> vector<128x128xf32>
      %cst_28 = arith.constant dense<0xFF800000> : vector<128xf32>
      %59 = vector.multi_reduction <maximumf>, %58, %cst_28 [1] : vector<128x128xf32> to vector<128xf32>
      %60 = vector.shape_cast %59 : vector<128xf32> to vector<128x1xf32>
      %61 = arith.maximumf %arg7, %60 : vector<128x1xf32>
      %62 = arith.subf %arg7, %61 : vector<128x1xf32>
      %63 = math.exp %62 : vector<128x1xf32>
      %64 = vector.broadcast %61 : vector<128x1xf32> to vector<128x128xf32>
      %65 = arith.subf %58, %64 : vector<128x128xf32>
      %66 = math.exp %65 : vector<128x128xf32>
      %67 = arith.mulf %63, %arg8 : vector<128x1xf32>
      %cst_29 = arith.constant dense<0.000000e+00> : vector<128xf32>
      %68 = vector.multi_reduction <add>, %66, %cst_29 [1] : vector<128x128xf32> to vector<128xf32>
      %69 = vector.shape_cast %68 : vector<128xf32> to vector<128x1xf32>
      %70 = arith.addf %67, %69 : vector<128x1xf32>
      %71 = vector.broadcast %63 : vector<128x1xf32> to vector<128x128xf32>
      %72 = arith.mulf %71, %arg9 : vector<128x128xf32>
      %73 = arith.truncf %66 : vector<128x128xf32> to vector<128x128xbf16>
      %cst_30 = arith.constant dense<0.000000e+00> : vector<128x128xf32>
      %74 = tpu.matmul %73, %57, %cst_30 {dimension_numbers = #tpu.dot_dimension_numbers<[1], [0], [0], [1], [0, 0, 1, 1], [], []>} : vector<128x128xbf16>, vector<128x128xbf16>, vector<128x128xf32> -> vector<128x128xf32>
      %75 = arith.addf %72, %74 : vector<128x128xf32>
      scf.yield %61, %70, %75 : vector<128x1xf32>, vector<128x1xf32>, vector<128x128xf32>
    }
    %c2_i32_10 = arith.constant 2 : i32
    %c2_i32_11 = arith.constant 2 : i32
    %c128_i32_12 = arith.constant 128 : i32
    %17 = arith.muli %c2_i32_11, %c128_i32_12 : i32
    %18 = tpu.assume_multiple %17, 128 : i32
    %19 = arith.index_cast %18 : i32 to index
    %c0_13 = arith.constant 0 : index
    %20 = vector.load %arg1[%19, %c0_13] : memref<384x128xbf16, #tpu.memory_space<vmem>>, vector<128x128xbf16>
    %cst_14 = arith.constant dense<0.000000e+00> : vector<128x128xf32>
    %21 = tpu.matmul %6, %20, %cst_14 {dimension_numbers = #tpu.dot_dimension_numbers<[1], [1], [0], [0], [0, 0, 1, 0], [], []>} : vector<128x128xbf16>, vector<128x128xbf16>, vector<128x128xf32> -> vector<128x128xf32>
    %22 = tpu.iota {dimensions = array<i32: 1>} : vector<128x128xi32>
    %23 = vector.broadcast %18 : i32 to vector<128x128xi32>
    %24 = arith.addi %23, %22 : vector<128x128xi32>
    %c300_i32 = arith.constant 300 : i32
    %25 = vector.broadcast %c300_i32 : i32 to vector<128x128xi32>
    %26 = arith.cmpi slt, %24, %25 : vector<128x128xi32>
    %cst_15 = arith.constant -1.000000e+30 : f32
    %27 = vector.broadcast %cst_15 : f32 to vector<128x128xf32>
    %28 = arith.select %26, %21, %27 : vector<128x128xi1>, vector<128x128xf32>
    %cst_16 = arith.constant dense<0xFF800000> : vector<128xf32>
    %29 = vector.multi_reduction <maximumf>, %28, %cst_16 [1] : vector<128x128xf32> to vector<128xf32>
    %30 = vector.shape_cast %29 : vector<128xf32> to vector<128x1xf32>
    %31 = arith.maximumf %16#0, %30 : vector<128x1xf32>
    %32 = arith.subf %16#0, %31 : vector<128x1xf32>
    %33 = math.exp %32 : vector<128x1xf32>
    %34 = vector.broadcast %31 : vector<128x1xf32> to vector<128x128xf32>
    %35 = arith.subf %28, %34 : vector<128x128xf32>
    %36 = math.exp %35 : vector<128x128xf32>
    %37 = arith.mulf %33, %16#1 : vector<128x1xf32>
    %cst_17 = arith.constant dense<0.000000e+00> : vector<128xf32>
    %38 = vector.multi_reduction <add>, %36, %cst_17 [1] : vector<128x128xf32> to vector<128xf32>
    %39 = vector.shape_cast %38 : vector<128xf32> to vector<128x1xf32>
    %40 = arith.addf %37, %39 : vector<128x1xf32>
    %41 = vector.broadcast %33 : vector<128x1xf32> to vector<128x128xf32>
    %42 = arith.mulf %41, %16#2 : vector<128x128xf32>
    %43 = arith.truncf %36 : vector<128x128xf32> to vector<128x128xbf16>
    %cst_18 = arith.constant dense<0.000000e+00> : vector<128x128xf32>
    %44 = tpu.matmul %43, %20, %cst_18 {dimension_numbers = #tpu.dot_dimension_numbers<[1], [0], [0], [1], [0, 0, 1, 1], [], []>} : vector<128x128xbf16>, vector<128x128xbf16>, vector<128x128xf32> -> vector<128x128xf32>
    %45 = arith.addf %42, %44 : vector<128x128xf32>
    %c1_i32_19 = arith.constant 1 : i32
    %46 = tpu.reciprocal %40 {approx = true} : vector<128x1xf32> -> vector<128x1xf32>
    %47 = vector.broadcast %46 : vector<128x1xf32> to vector<128x128xf32>
    %48 = arith.mulf %45, %47 : vector<128x128xf32>
    %49 = arith.truncf %48 : vector<128x128xf32> to vector<128x128xbf16>
    %c0_20 = arith.constant 0 : index
    %c0_21 = arith.constant 0 : index
    %50 = vector.load %arg4[%c0_20, %c0_21] : memref<128x128xbf16, #tpu.memory_space<vmem>>, vector<128x128xbf16>
    %cst_22 = arith.constant dense<0.000000e+00> : vector<128x128xf32>
    %51 = tpu.matmul %49, %50, %cst_22 {dimension_numbers = #tpu.dot_dimension_numbers<[1], [0], [0], [1], [0, 0, 1, 1], [], []>} : vector<128x128xbf16>, vector<128x128xbf16>, vector<128x128xf32> -> vector<128x128xf32>
    %52 = arith.addf %11, %51 : vector<128x128xf32>
    %c0_23 = arith.constant 0 : index
    %c0_24 = arith.constant 0 : index
    %53 = vector.load %arg5[%c0_23, %c0_24] : memref<128x128xf32, #tpu.memory_space<vmem>>, vector<128x128xf32>
    tpu.vector_store %arg5[%c0_23, %c0_24], %52 {strides = array<i32>} : memref<128x128xf32, #tpu.memory_space<vmem>>, vector<128x128xf32>,
    return
  }
  func.func @transform_0(%arg0: i32) -> (i32, i32) {
    %c0_i32 = arith.constant 0 : i32
    %c0_i32_0 = arith.constant 0 : i32
    %c0_i32_1 = arith.constant 0 : i32
    return %c0_i32, %c0_i32_0 : i32, i32
  }
  func.func @transform_1(%arg0: i32) -> (i32, i32) {
    %c0_i32 = arith.constant 0 : i32
    %c0_i32_0 = arith.constant 0 : i32
    return %arg0, %c0_i32 : i32, i32
  }
  func.func @transform_2(%arg0: i32) -> (i32, i32) {
    %c0_i32 = arith.constant 0 : i32
    %c0_i32_0 = arith.constant 0 : i32
    %c0_i32_1 = arith.constant 0 : i32
    return %c0_i32, %c0_i32_0 : i32, i32
  }
  func.func @transform_3(%arg0: i32) -> (i32, i32) {
    %c0_i32 = arith.constant 0 : i32
    %c0_i32_0 = arith.constant 0 : i32
    %c0_i32_1 = arith.constant 0 : i32
    return %c0_i32, %c0_i32_0 : i32, i32
  }
  func.func @transform_4(%arg0: i32) -> (i32, i32) {
    %c0_i32 = arith.constant 0 : i32
    %c0_i32_0 = arith.constant 0 : i32
    return %arg0, %c0_i32 : i32, i32
  }
}

module attributes {stable_mosaic.version = 11 : i64} {
  func.func @_attention_kernel(%arg0: i32, %arg1: memref<384x128xbf16, #tpu.memory_space<vmem>>, %arg2: memref<128x384xi8, #tpu.memory_space<vmem>>, %arg3: memref<128x128xbf16, #tpu.memory_space<vmem>>, %arg4: memref<128x128xbf16, #tpu.memory_space<vmem>>, %arg5: memref<128x128xf32, #tpu.memory_space<vmem>>) attributes {dimension_semantics = [#tpu.dimension_semantics<parallel>], iteration_bounds = array<i64: 3>, scalar_prefetch = 0 : i64, scratch_operands = 0 : i64, tpu.core_type = #tpu.core_type<tc>, window_params = [{pipeline_mode = #tpu.pipeline_mode<synchronous>, transform_indices = @transform_0, window_bounds = array<i64: 384, 128>}, {transform_indices = @transform_1, window_bounds = array<i64: 128, 384>}, {pipeline_mode = #tpu.pipeline_mode<synchronous>, transform_indices = @transform_2, window_bounds = array<i64: 128, 128>}, {pipeline_mode = #tpu.pipeline_mode<synchronous>, transform_indices = @transform_3, window_bounds = array<i64: 128, 128>}, {transform_indices = @transform_4, window_bounds = array<i64: 128, 128>}]} {
    %c128_i32 = arith.constant 128 : i32
    %0 = arith.muli %arg0, %c128_i32 : i32
    %1 = tpu.assume_multiple %0, 128 : i32
    %2 = arith.index_cast %1 : i32 to index
    %c0 = arith.constant 0 : index
    %3 = vector.load %arg1[%2, %c0] : memref<384x128xbf16, #tpu.memory_space<vmem>>, vector<128x128xbf16>
    %c0_0 = arith.constant 0 : index
    %c0_1 = arith.constant 0 : index
    %4 = vector.load %arg3[%c0_0, %c0_1] : memref<128x128xbf16, #tpu.memory_space<vmem>>, vector<128x128xbf16>
    %cst = arith.constant dense<0.000000e+00> : vector<128x128xf32>
    %5 = tpu.matmul %3, %4, %cst {dimension_numbers = #tpu.dot_dimension_numbers<[1], [0], [0], [1], [0, 0, 1, 1], [], []>} : vector<128x128xbf16>, vector<128x128xbf16>, vector<128x128xf32> -> vector<128x128xf32>
    %6 = arith.truncf %5 : vector<128x128xf32> to vector<128x128xbf16>
    %c0_2 = arith.constant 0 : index
    %c0_3 = arith.constant 0 : index
    %7 = vector.load %arg2[%c0_2, %c0_3] : memref<128x384xi8, #tpu.memory_space<vmem>>, vector<128x384xi8>
    %8 = arith.sitofp %7 : vector<128x384xi8> to vector<128x384xf32>
    %9 = arith.truncf %8 : vector<128x384xf32> to vector<128x384xbf16>
    %c0_4 = arith.constant 0 : index
    %c0_5 = arith.constant 0 : index
    %10 = vector.load %arg1[%c0_4, %c0_5] : memref<384x128xbf16, #tpu.memory_space<vmem>>, vector<384x128xbf16>
    %cst_6 = arith.constant dense<0.000000e+00> : vector<128x128xf32>
    %11 = tpu.matmul %9, %10, %cst_6 {dimension_numbers = #tpu.dot_dimension_numbers<[1], [0], [0], [1], [0, 0, 1, 1], [], []>} : vector<128x384xbf16>, vector<384x128xbf16>, vector<128x128xf32> -> vector<128x128xf32>
    %cst_7 = arith.constant 0xFF800000 : f32
    %12 = vector.broadcast %cst_7 : f32 to vector<128x1xf32>
    %cst_8 = arith.constant 0.000000e+00 : f32
    %13 = vector.broadcast %cst_8 : f32 to vector<128x1xf32>
    %cst_9 = arith.constant 0.000000e+00 : f32
    %14 = vector.broadcast %cst_9 : f32 to vector<128x128xf32>
    %c0_i32 = arith.constant 0 : i32
    %c2_i32 = arith.constant 2 : i32
    %15 = arith.addi %c0_i32, %c2_i32 : i32
    %c1_i32 = arith.constant 1 : i32
    %16:3 = scf.for %arg6 = %c0_i32 to %15 step %c1_i32 iter_args(%arg7 = %12, %arg8 = %13, %arg9 = %14) -> (vector<128x1xf32>, vector<128x1xf32>, vector<128x128xf32>)  : i32 {
      %c128_i32_25 = arith.constant 128 : i32
      %54 = arith.muli %arg6, %c128_i32_25 : i32
      %55 = tpu.assume_multiple %54, 128 : i32
      %56 = arith.index_cast %55 : i32 to index
      %c0_26 = arith.constant 0 : index
      %57 = vector.load %arg1[%56, %c0_26] : memref<384x128xbf16, #tpu.memory_space<vmem>>, vector<128x128xbf16>
      %cst_27 = arith.constant dense<0.000000e+00> : vector<128x128xf32>
      %58 = tpu.matmul %6, %57, %cst_27 {dimension_numbers = #tpu.dot_dimension_numbers<[1], [1], [0], [0], [0, 0, 1, 0], [], []>} : vector<128x128xbf16>, vector<128x128xbf16>, vector<128x128xf32> -> vector<128x128xf32>
      %cst_28 = arith.constant dense<0xFF800000> : vector<128xf32>
      %59 = vector.multi_reduction <maximumf>, %58, %cst_28 [1] : vector<128x128xf32> to vector<128xf32>
      %60 = vector.shape_cast %59 : vector<128xf32> to vector<128x1xf32>
      %61 = arith.maximumf %arg7, %60 : vector<128x1xf32>
      %62 = arith.subf %arg7, %61 : vector<128x1xf32>
      %63 = math.exp %62 : vector<128x1xf32>
      %64 = vector.broadcast %61 : vector<128x1xf32> to vector<128x128xf32>
      %65 = arith.subf %58, %64 : vector<128x128xf32>
      %66 = math.exp %65 : vector<128x128xf32>
      %67 = arith.mulf %63, %arg8 : vector<128x1xf32>
      %cst_29 = arith.constant dense<0.000000e+00> : vector<128xf32>
      %68 = vector.multi_reduction <add>, %66, %cst_29 [1] : vector<128x128xf32> to vector<128xf32>
      %69 = vector.shape_cast %68 : vector<128xf32> to vector<128x1xf32>
      %70 = arith.addf %67, %69 : vector<128x1xf32>
      %71 = vector.broadcast %63 : vector<128x1xf32> to vector<128x128xf32>
      %72 = arith.mulf %71, %arg9 : vector<128x128xf32>
      %73 = arith.truncf %66 : vector<128x128xf32> to vector<128x128xbf16>
      %cst_30 = arith.constant dense<0.000000e+00> : vector<128x128xf32>
      %74 = tpu.matmul %73, %57, %cst_30 {dimension_numbers = #tpu.dot_dimension_numbers<[1], [0], [0], [1], [0, 0, 1, 1], [], []>} : vector<128x128xbf16>, vector<128x128xbf16>, vector<128x128xf32> -> vector<128x128xf32>
      %75 = arith.addf %72, %74 : vector<128x128xf32>
      scf.yield %61, %70, %75 : vector<128x1xf32>, vector<128x1xf32>, vector<128x128xf32>
    }
    %c2_i32_10 = arith.constant 2 : i32
    %c2_i32_11 = arith.constant 2 : i32
    %c128_i32_12 = arith.constant 128 : i32
    %17 = arith.muli %c2_i32_11, %c128_i32_12 : i32
    %18 = tpu.assume_multiple %17, 128 : i32
    %19 = arith.index_cast %18 : i32 to index
    %c0_13 = arith.constant 0 : index
    %20 = vector.load %arg1[%19, %c0_13] : memref<384x128xbf16, #tpu.memory_space<vmem>>, vector<128x128xbf16>
    %cst_14 = arith.constant dense<0.000000e+00> : vector<128x128xf32>
    %21 = tpu.matmul %6, %20, %cst_14 {dimension_numbers = #tpu.dot_dimension_numbers<[1], [1], [0], [0], [0, 0, 1, 0], [], []>} : vector<128x128xbf16>, vector<128x128xbf16>, vector<128x128xf32> -> vector<128x128xf32>
    %22 = tpu.iota {dimensions = array<i32: 1>} : vector<128x128xi32>
    %23 = vector.broadcast %18 : i32 to vector<128x128xi32>
    %24 = arith.addi %23, %22 : vector<128x128xi32>
    %c300_i32 = arith.constant 300 : i32
    %25 = vector.broadcast %c300_i32 : i32 to vector<128x128xi32>
    %26 = arith.cmpi slt, %24, %25 : vector<128x128xi32>
    %cst_15 = arith.constant -1.000000e+30 : f32
    %27 = vector.broadcast %cst_15 : f32 to vector<128x128xf32>
    %28 = arith.select %26, %21, %27 : vector<128x128xi1>, vector<128x128xf32>
    %cst_16 = arith.constant dense<0xFF800000> : vector<128xf32>
    %29 = vector.multi_reduction <maximumf>, %28, %cst_16 [1] : vector<128x128xf32> to vector<128xf32>
    %30 = vector.shape_cast %29 : vector<128xf32> to vector<128x1xf32>
    %31 = arith.maximumf %16#0, %30 : vector<128x1xf32>
    %32 = arith.subf %16#0, %31 : vector<128x1xf32>
    %33 = math.exp %32 : vector<128x1xf32>
    %34 = vector.broadcast %31 : vector<128x1xf32> to vector<128x128xf32>
    %35 = arith.subf %28, %34 : vector<128x128xf32>
    %36 = math.exp %35 : vector<128x128xf32>
    %37 = arith.mulf %33, %16#1 : vector<128x1xf32>
    %cst_17 = arith.constant dense<0.000000e+00> : vector<128xf32>
    %38 = vector.multi_reduction <add>, %36, %cst_17 [1] : vector<128x128xf32> to vector<128xf32>
    %39 = vector.shape_cast %38 : vector<128xf32> to vector<128x1xf32>
    %40 = arith.addf %37, %39 : vector<128x1xf32>
    %41 = vector.broadcast %33 : vector<128x1xf32> to vector<128x128xf32>
    %42 = arith.mulf %41, %16#2 : vector<128x128xf32>
    %43 = arith.truncf %36 : vector<128x128xf32> to vector<128x128xbf16>
    %cst_18 = arith.constant dense<0.000000e+00> : vector<128x128xf32>
    %44 = tpu.matmul %43, %20, %cst_18 {dimension_numbers = #tpu.dot_dimension_numbers<[1], [0], [0], [1], [0, 0, 1, 1], [], []>} : vector<128x128xbf16>, vector<128x128xbf16>, vector<128x128xf32> -> vector<128x128xf32>
    %45 = arith.addf %42, %44 : vector<128x128xf32>
    %c1_i32_19 = arith.constant 1 : i32
    %46 = tpu.reciprocal %40 {approx = true} : vector<128x1xf32> -> vector<128x1xf32>
    %47 = vector.broadcast %46 : vector<128x1xf32> to vector<128x128xf32>
    %48 = arith.mulf %45, %47 : vector<128x128xf32>
    %49 = arith.truncf %48 : vector<128x128xf32> to vector<128x128xbf16>
    %c0_20 = arith.constant 0 : index
    %c0_21 = arith.constant 0 : index
    %50 = vector.load %arg4[%c0_20, %c0_21] : memref<128x128xbf16, #tpu.memory_space<vmem>>, vector<128x128xbf16>
    %cst_22 = arith.constant dense<0.000000e+00> : vector<128x128xf32>
    %51 = tpu.matmul %49, %50, %cst_22 {dimension_numbers = #tpu.dot_dimension_numbers<[1], [0], [0], [1], [0, 0, 1, 1], [], []>} : vector<128x128xbf16>, vector<128x128xbf16>, vector<128x128xf32> -> vector<128x128xf32>
    %52 = arith.addf %11, %51 : vector<128x128xf32>
    %c0_23 = arith.constant 0 : index
    %c0_24 = arith.constant 0 : index
    %53 = vector.load %arg5[%c0_23, %c0_24] : memref<128x128xf32, #tpu.memory_space<vmem>>, vector<128x128xf32>
    tpu.vector_store %arg5[%c0_23, %c0_24], %52 {strides = array<i32>} : memref<128x128xf32, #tpu.memory_space<vmem>>, vector<128x128xf32>,
    return
  }
  func.func @transform_0(%arg0: i32) -> (i32, i32) {
    %c0_i32 = arith.constant 0 : i32
    %c0_i32_0 = arith.constant 0 : i32
    %c0_i32_1 = arith.constant 0 : i32
    return %c0_i32, %c0_i32_0 : i32, i32
  }
  func.func @transform_1(%arg0: i32) -> (i32, i32) {
    %c0_i32 = arith.constant 0 : i32
    %c0_i32_0 = arith.constant 0 : i32
    return %arg0, %c0_i32 : i32, i32
  }
  func.func @transform_2(%arg0: i32) -> (i32, i32) {
    %c0_i32 = arith.constant 0 : i32
    %c0_i32_0 = arith.constant 0 : i32
    %c0_i32_1 = arith.constant 0 : i32
    return %c0_i32, %c0_i32_0 : i32, i32
  }
  func.func @transform_3(%arg0: i32) -> (i32, i32) {
    %c0_i32 = arith.constant 0 : i32
    %c0_i32_0 = arith.constant 0 : i32
    %c0_i32_1 = arith.constant 0 : i32
    return %c0_i32, %c0_i32_0 : i32, i32
  }
  func.func @transform_4(%arg0: i32) -> (i32, i32) {
    %c0_i32 = arith.constant 0 : i32
    %c0_i32_0 = arith.constant 0 : i32
    return %arg0, %c0_i32 : i32, i32
  }
}

</mosaic_0001>

<bundles_post_ra>
// kernel: tpu_custom_call.1
= control target key start
LH: loop header
LB: loop body
LE: loop exit
PB: predicated region body
PF: predicated region fallthrough
CT: control target
= control target key end

     0   :  { %s5872_s0 = inlined_call_operand.hbm [shape: bf16[384,128], index: 0, kind: input, shape index: {}]   ;;  %s5873_s1 = inlined_call_operand.hbm [shape: s8[384,384], index: 1, kind: input, shape index: {}]   ;;  %s5874_s2 = inlined_call_operand.hbm [shape: bf16[128,128], index: 2, kind: input, shape index: {}]   ;;  %s5875_s3 = inlined_call_operand.hbm [shape: bf16[128,128], index: 3, kind: input, shape index: {}]   ;;  %s5876_s4 = inlined_call_operand.hbm [shape: f32[384,128], index: 4, kind: output, shape index: {}]  }
   0x1   :  { %5953 = sst [smem:[#allocation138_spill]] %s5874_s2 }
   0x2   :  { %9 = vsyncpa [#allocation3], 0 }
   0x3   :  { %10 = vsyncpa [#allocation6], 0 }
   0x4   :  { %12 = vsyncpa [#allocation6 + $0x1], 0 }
   0x5   :  { %13 = vsyncpa [#allocation9], 0 }
   0x6   :  { %14 = vsyncpa [#allocation4], 0 }
   0x7   :  { %16 = vsyncpa [#allocation4 + $0x1], 0  ;;  %s4341_s15 = smov 0   ;;  %s4343_s16 = smov 0  }
   0x8   :  { %s4345_s17 = smov 0   ;;  %s4347_s18 = smov 0  }
   0x9 LB: > { %s4362_s19 = sadd.s32 4294967295, %s4107_s18   ;;  %s2505_s20 = sadd.s32 4294967294, %s4107_s18   ;;  %s4107_s18 = sphi %s4347_s18, %s6379_s18   ;;  %s4103_s17 = sphi %s4345_s17, %s6378_s17   ;;  %s4099_s16 = sphi %s4343_s16, %s6377_s16   ;;  %s4095_s15 = sphi %s4341_s15, %s6376_s15  }
   0xa   : > { %s4366_s21 = sadd.s32 1, %s4107_s18   ;;  %s50_s22 = sadd.s32 1, %s4103_s17 }
   0xb   : > { %s47_s23 = ssub.s32 %s4107_s18, %s4366_s21  ;;  %p57_p0 = scmp.ne.s32.totalorder %s4103_s17, %s4099_s16 }
   0xc   : > { %p48_p1 = scmp.eq.s32.totalorder %s47_s23, 0  ;;  %p58_p2 = scmp.eq.s32.totalorder %s4107_s18, 0 }
   0xd   : > { %p63_p3 = scmp.ne.s32.totalorder %s4099_s16, %s4095_s15  ;;  %p5877_p4 = scmp.eq.s32.totalorder %s4362_s19, 0 }
   0xe   : > { %s4378_s24 = scalar_select %p48_p1, %s4103_s17, %s50_s22  }
   0xf   : > { %p4380_p5 = por %p58_p2, %p57_p0  ;;  %p4386_p6 = por %p5877_p4, %p63_p3 }
  0x10   : > { %5954 = sst [smem:[#allocation16_spill]] %s4378_s24  ;;  %p129_p7 = scmp.eq.s32.totalorder %s4362_s19, 2 }
  0x11   : > { %s5955_s25 = scalar_select %p4380_p5, 1, 0 }
  0x12   : > { %s5956_s26 = scalar_select %p4386_p6, 1, 0 }
  0x13   : > { %p135_p8 = scmp.eq.s32.totalorder %s2505_s20, 2  ;;  %p2506_p9 = scmp.ge.s32.totalorder %s4107_s18, 1 }
  0x14   : > { %p142_p10 = scmp.lt.s32.totalorder %s4107_s18, 4  ;;  %p4393_p11 = por %p129_p7, %p57_p0 }
  0x15   : > { %p4397_p12 = por %p135_p8, %p63_p3  ;;  %s4305_s30 = smov [#allocation7]  }
  0x16   : > { %s5957_s27 = scalar_select %p4393_p11, 1, 0 }
  0x17   : > { %s5958_s28 = scalar_select %p4397_p12, 1, 0 }
  0x18   : > { %p4401_p13 = pnand %p2506_p9, %p142_p10  ;;  %s167_s5 = sshll.u32 %s4305_s30, 4  ;;  %s168_s5 = int_to_ptr.vmem [resolvable:$true] %s167_s5 }
  0x19   : > { %s4306_s7 = smov [#allocation2]   ;;  %s5961_s2 = sld [smem:[#allocation138_spill]] }
  0x1a   : > { %s5959_s29 = scalar_select %p4401_p13, 1, 0 }
  0x1b   : > { %p3060_p1 = pneg %p4401_p13  ;;  %s154_s8 = sshll.u32 %s4306_s7, 4  ;;  %s155_s8 = int_to_ptr.vmem [resolvable:$true] %s154_s8 }
  0x1d   : > { %p4409_p2 = pnand %p3060_p1, %p5877_p4 }
  0x1f   : > { %s3719_s11 = scalar_lea.hbm %s5961_s2, 1024  ;;  %p4422_p7 = pneg %p4409_p2 }
  0x20   : > { %p3720_p3 = scmp.ne.s32.totalorder %s5961_s2, %s3719_s11  ;;  %p3726_p10 = scmp.lt.u32.totalorder %s3719_s11, %s5961_s2 }
  0x22   : > { %p3722_p8 = pnand %p4422_p7, %p3720_p3 }
  0x24   : > { %p3723_p9 = pneg %p3722_p8 }
  0x26   : > { %p3728_p1 = pnand %p3726_p10, %p3723_p9 }
  0x28   : > { %3731 = shalt.err (!%p3728_p1)
}
  0x29   : > { %s3732_s23 = scalar_lea.vmem %s168_s5, 1024  ;;  %p3740_p11 = scmp.lt.s32.totalorder %s168_s5, %s168_s5 }
  0x2a   : > { %p3733_p4 = scmp.ne.s32.totalorder %s168_s5, %s3732_s23  ;;  %p3741_p6 = scmp.lt.s32.totalorder %s3732_s23, %s3732_s23 }
  0x2c   : > { %p3735_p0 = pnand %p3733_p4, %p4422_p7  ;;  %p3742_p13 = por %p3741_p6, %p3740_p11 }
  0x2e   : > { %p3736_p12 = pneg %p3735_p0 }
  0x30   : > { %p3743_p5 = pnand %p3742_p13, %p3736_p12 }
  0x32   : > { %3746 = shalt.err (!%p3743_p5)
}
  0x33   : > { %s4307_s30 = smov 64   ;;  %s4308_s7 = smov 4  }
  0x34   : > { %3066 = dma.hbm_to_vmem [thread:$0]  (!%p4409_p2), %s5961_s2, 1024, %s168_s5, [#allocation6], %s4307_s30, %s4307_s30, %s4308_s7  }
  0x35   : > { %p5963_p4 = scmp.ne.s32.totalorder %s5955_s25, 0  ;;  %p5964_p0 = scmp.lt.s32.totalorder %s4107_s18, 3 }
  0x36   : > { %s3747_s20 = scalar_lea.hbm %s5872_s0, 3072 }
  0x37   : > { %p4445_p3 = pnand %p5964_p0, %p5963_p4  ;;  %p3748_p5 = scmp.ne.s32.totalorder %s5872_s0, %s3747_s20 }
  0x38   : > { %p3754_p12 = scmp.lt.u32.totalorder %s3747_s20, %s5872_s0 }
  0x39   : > { %s5965_s11 = scalar_select %p4445_p3, 1, 0 }
  0x3a   : > { %p3750_p6 = pnand %p3748_p5, %p4422_p7 }
  0x3c   : > { %p3751_p11 = pneg %p3750_p6 }
  0x3e   : > { %p3756_p13 = pnand %p3754_p12, %p3751_p11 }
  0x40   : > { %3759 = shalt.err (!%p3756_p13)
}
  0x41   : > { %s3760_s25 = scalar_lea.vmem %s155_s8, 3072  ;;  %p3768_p1 = scmp.lt.s32.totalorder %s155_s8, %s155_s8 }
  0x42   : > { %p3761_p8 = scmp.ne.s32.totalorder %s155_s8, %s3760_s25  ;;  %p3769_p4 = scmp.lt.s32.totalorder %s3760_s25, %s3760_s25 }
  0x44   : > { %p3763_p9 = pnand %p3761_p8, %p4422_p7  ;;  %p3770_p0 = por %p3769_p4, %p3768_p1 }
  0x46   : > { %p3764_p10 = pneg %p3763_p9 }
  0x48   : > { %p3771_p3 = pnand %p3770_p0, %p3764_p10 }
  0x4a   : > { %3774 = shalt.err (!%p3771_p3)
}
  0x4b   : > { %3063 = dma.hbm_to_vmem [thread:$0]  (!%p4409_p2), %s5872_s0, 3072, %s155_s8, [#allocation3], %s4307_s30, %s4307_s30, %s4308_s7  }
  0x4c   : > { %s4309_s13 = smov [#allocation8]   ;;  %s194_s22 = sand.u32 1, %s4107_s18  }
  0x4d   : > { %s180_s20 = sshll.u32 %s4309_s13, 4  ;;  %s3775_s5 = scalar_lea.hbm %s5875_s3, 1024  ;;  %s181_s20 = int_to_ptr.vmem [resolvable:$true] %s180_s20 }
  0x4e   : > { %p3776_p3 = scmp.ne.s32.totalorder %s5875_s3, %s3775_s5  ;;  %p3782_p11 = scmp.lt.u32.totalorder %s3775_s5, %s5875_s3 }
  0x50   : > { %p3778_p5 = pnand %p3776_p3, %p4422_p7 }
  0x52   : > { %p3779_p6 = pneg %p3778_p5 }
  0x54   : > { %p3784_p12 = pnand %p3782_p11, %p3779_p6 }
  0x56   : > { %3787 = shalt.err (!%p3784_p12)
}
  0x57   : > { %s3788_s8 = scalar_lea.vmem %s181_s20, 1024  ;;  %p3796_p10 = scmp.lt.s32.totalorder %s181_s20, %s181_s20 }
  0x58   : > { %p3789_p13 = scmp.ne.s32.totalorder %s181_s20, %s3788_s8  ;;  %p3797_p1 = scmp.lt.s32.totalorder %s3788_s8, %s3788_s8 }
  0x5a   : > { %p3791_p8 = pnand %p3789_p13, %p4422_p7  ;;  %p3798_p4 = por %p3797_p1, %p3796_p10 }
  0x5c   : > { %p3792_p9 = pneg %p3791_p8 }
  0x5e   : > { %p3799_p0 = pnand %p3798_p4, %p3792_p9 }
  0x60   : > { %3802 = shalt.err (!%p3799_p0)
}
  0x61   : > { %3069 = dma.hbm_to_vmem [thread:$0]  (!%p4409_p2), %s5875_s3, 1024, %s181_s20, [#allocation9], %s4307_s30, %s4307_s30, %s4308_s7  }
  0x62   : > { %s196_s14 = sand.u32 1, %s4103_s17   ;;  %s3042_s12 = smul.u32 1536, %s4107_s18 }
  0x63   : > { %s3041_s13 = smul.u32 96, %s196_s14  ;;  %s4501_s10 = scalar_lea.sflag [#allocation6], %s194_s22 }
  0x64   : > { %s4497_s5 = scalar_lea.hbm %s5873_s1, %s3042_s12  ;;  %p5966_p7 = scmp.ne.s32.totalorder %s5965_s11, 0 }
  0x65   : > { %s198_s6 = scalar_lea.vmem [#allocation5], %s3041_s13  ;;  %s3803_s8 = scalar_lea.hbm %s4497_s5, 1536 }
  0x66   : > { %s206_s25 = sshll.u32 %s198_s6, 4  ;;  %p3804_p2 = scmp.ne.s32.totalorder %s4497_s5, %s3803_s8  ;;  %s4499_s25 = int_to_ptr.vmem [resolvable:$true] %s206_s25 }
  0x67   : > { %p3805_p3 = pneg %p5966_p7  ;;  %s3808_s20 = scalar_lea.hbm %s5873_s1, 4608 }
  0x68   : > { %p3809_p11 = scmp.lt.u32.totalorder %s4497_s5, %s5873_s1  ;;  %p3810_p12 = scmp.lt.u32.totalorder %s3808_s20, %s3803_s8 }
  0x69   : > { %p3806_p5 = pnand %p3805_p3, %p3804_p2  ;;  %p3812_p8 = scmp.lt.u32.totalorder %s3803_s8, %s4497_s5 }
  0x6a   : > { %p3811_p13 = por %p3810_p12, %p3809_p11 }
  0x6b   : > { %p3807_p6 = pneg %p3806_p5 }
  0x6c   : > { %p3813_p9 = por %p3812_p8, %p3811_p13 }
  0x6e   : > { %p3814_p10 = pnand %p3813_p9, %p3807_p6 }
  0x70   : > { %3817 = shalt.err (!%p3814_p10)
}
  0x71   : > { %s3818_s22 = scalar_lea.vmem %s4499_s25, 1536  ;;  %s4310_s14 = smov [#allocation5]  }
  0x72   : > { %p3819_p1 = scmp.ne.s32.totalorder %s4499_s25, %s3818_s22  ;;  %s3823_s12 = sshll.u32 %s4310_s14, 4  ;;  %s3824_s12 = int_to_ptr.vmem [resolvable:$false] %s3823_s12 }
  0x73   : > { %s3825_s13 = scalar_lea.vmem %s3824_s12, 3072  ;;  %p3826_p2 = scmp.lt.s32.totalorder %s4499_s25, %s3824_s12 }
  0x74   : > { %p3821_p4 = pnand %p3819_p1, %p3805_p3  ;;  %p3827_p5 = scmp.lt.s32.totalorder %s3825_s13, %s3818_s22 }
  0x76   : > { %p3822_p0 = pneg %p3821_p4  ;;  %p3828_p11 = por %p3827_p5, %p3826_p2 }
  0x78   : > { %p3829_p12 = pnand %p3828_p11, %p3822_p0 }
  0x7a   : > { %3832 = shalt.err (!%p3829_p12)
}
  0x7b   : > { %s4311_s23 = smov 384   ;;  %s4312_s9 = smov 24  }
  0x7c   : > { %3073 = dma.hbm_to_vmem [thread:$0]  (!%p5966_p7), %s4497_s5, 1536, %s4499_s25, %s4501_s10, %s4311_s23, %s4311_s23, %s4312_s9  }
  0x7d   : > { %p5967_p3 = scmp.ne.s32.totalorder %s5959_s29, 0 }
  0x7f   : > { %218 = sbr.rel (%p5967_p3) target bundleno = 2088 (0x828), region = 36 }
  0x86   : > { %p5968_p6 = scmp.eq.s32.totalorder %s4362_s19, 0 }
  0x88   : > { %4074 = dma.done.wait (%p5968_p6), [#allocation3], 3072   ;;  %p5969_p13 = pmov %p5968_p6 }
  0x89   : > { %s224_s6 = sand.u32 1, %s4362_s19   ;;  %s4537_s8 = sand.u32 1, %s4099_s16  }
  0x8a   : > { %4076 = vsyncadd (%p5969_p13), [#allocation3], 4294964224  ;;  %s3043_s30 = smul.u32 96, %s4537_s8  ;;  %s225_s7 = scalar_lea.sflag [#allocation6], %s224_s6 }
  0x8b   : > { %p5970_p7 = scmp.ne.s32.totalorder %s5956_s26, 0 }
  0x8c   : > { %s228_s11 = scalar_lea.vmem [#allocation5], %s3043_s30 }
  0x8d   : > { %4078 = dma.done.wait (%p5970_p7), %s225_s7, 1536  }
  0x8e   : > { %4080 = vsyncadd (%p5970_p7), %s225_s7, 4294965760  ;;  %p5971_p8 = pmov %p5968_p6 }
  0x8f   : > { %p5972_p9 = pmov %p5968_p6 }
  0x90   : > { %4082 = dma.done.wait (%p5971_p8), [#allocation6], 1024  }
  0x91   : > { %4084 = vsyncadd (%p5972_p9), [#allocation6], 4294966272  ;;  %p5973_p10 = pmov %p5968_p6 }
  0x92   : > { %p5974_p1 = pmov %p5968_p6 }
  0x93   : > { %4086 = dma.done.wait (%p5973_p10), [#allocation9], 1024  }
  0x94   : > { %4088 = vsyncadd (%p5974_p1), [#allocation9], 4294966272  ;;  %s2518_s29 = sshll.u32 %s4537_s8, 7  ;;  %v4553_v0 = vld [vmem:[%s228_s11] sm:$0xff]  ;;  %v4555_v1 = vld [vmem:[%s228_s11 + $0x8] sm:$0xff]  ;;  %s2519_s26 = sshll.u32 %s4362_s19, 7 }
  0x95   : > { %5975 = vst [vmem:[#allocation17_spill] sm:$0xff] %v4553_v0  ;;  %5976 = vst [vmem:[#allocation18_spill] sm:$0xff] %v4555_v1  ;;  %v4557_v2 = vld [vmem:[%s228_s11 + $0x10] sm:$0xff]  ;;  %v4560_v3 = vld [vmem:[%s228_s11 + $0x18] sm:$0xff]  ;;  %s4590_s5 = sshra.s32 %s2519_s26, 3  ;;  %s4729_s20 = scalar_lea.vmem [#allocation10], %s2518_s29 }
  0x96   : > { %5977 = vst [vmem:[#allocation19_spill] sm:$0xff] %v4557_v2  ;;  %5978 = vst [vmem:[#allocation20_spill] sm:$0xff] %v4560_v3  ;;  %v4562_v4 = vld [vmem:[%s228_s11 + $0x20] sm:$0xff]  ;;  %v4564_v5 = vld [vmem:[%s228_s11 + $0x28] sm:$0xff]  ;;  %s2520_s25 = sshll.u32 %s4590_s5, 2  ;;  %v4767_v3 = vmov 0.0  }
  0x97   : > { %5979 = vst [vmem:[#allocation21_spill] sm:$0xff] %v4562_v4  ;;  %5980 = vst [vmem:[#allocation22_spill] sm:$0xff] %v4564_v5  ;;  %v4570_v10 = vld [vmem:[%s228_s11 + $0x30] sm:$0xff]  ;;  %v4572_v11 = vld [vmem:[%s228_s11 + $0x38] sm:$0xff]  ;;  %s4701_s10 = scalar_lea.vmem [#allocation2], %s2520_s25  ;;  %v4769_v4 = vmov 0.0  }
  0x98   : > { %5981 = vst [vmem:[#allocation23_spill] sm:$0xff] %v4570_v10  ;;  %5982 = vst [vmem:[#allocation24_spill] sm:$0xff] %v4572_v11  ;;  %v4574_v12 = vld [vmem:[%s228_s11 + $0x40] sm:$0xff]  ;;  %v4580_v17 = vld [vmem:[%s228_s11 + $0x48] sm:$0xff]  ;;  %v4763_v10 = vmov 0.0   ;;  %v4765_v11 = vmov 0.0  }
  0x99   : > { %5983 = vst [vmem:[#allocation25_spill] sm:$0xff] %v4574_v12  ;;  %5984 = vst [vmem:[#allocation26_spill] sm:$0xff] %v4580_v17  ;;  %v4582_v18 = vld [vmem:[%s228_s11 + $0x50] sm:$0xff]  ;;  %v4584_v19 = vld [vmem:[%s228_s11 + $0x58] sm:$0xff]  ;;  %v4759_v17 = vmov 0.0   ;;  %v4775_v0 = vmov 0.0  }
  0x9a   : > { %5985 = vst [vmem:[#allocation27_spill] sm:$0xff] %v4582_v18  ;;  %5986 = vst [vmem:[#allocation28_spill] sm:$0xff] %v4584_v19  ;;  %v4596_v28 = vld [vmem:[#allocation2] sm:$0xf]  ;;  %v4598_v29 = vld [vmem:[#allocation2 + $0x4] sm:$0xf] }
  0x9b   : > { %5987 = vst [vmem:[#allocation29_spill] sm:$0xff] %v4596_v28  ;;  %5988 = vst [vmem:[#allocation30_spill] sm:$0xff] %v4598_v29  ;;  %v4600_v30 = vld [vmem:[#allocation2 + $0x8] sm:$0xf]  ;;  %v4606_v35 = vld [vmem:[#allocation2 + $0xc] sm:$0xf] }
  0x9c   : > { %5989 = vst [vmem:[#allocation31_spill] sm:$0xff] %v4600_v30  ;;  %5990 = vst [vmem:[#allocation32_spill] sm:$0xff] %v4606_v35  ;;  %v4608_v36 = vld [vmem:[#allocation2 + $0x10] sm:$0xf]  ;;  %v4610_v37 = vld [vmem:[#allocation2 + $0x14] sm:$0xf] }
  0x9d   : > { %5991 = vst [vmem:[#allocation33_spill] sm:$0xff] %v4608_v36  ;;  %5992 = vst [vmem:[#allocation34_spill] sm:$0xff] %v4610_v37  ;;  %v4616_v42 = vld [vmem:[#allocation2 + $0x18] sm:$0xf]  ;;  %v4618_v43 = vld [vmem:[#allocation2 + $0x1c] sm:$0xf] }
  0x9e   : > { %5993 = vst [vmem:[#allocation35_spill] sm:$0xff] %v4616_v42  ;;  %5994 = vst [vmem:[#allocation36_spill] sm:$0xff] %v4618_v43  ;;  %v4620_v44 = vld [vmem:[#allocation2 + $0x20] sm:$0xf]  ;;  %v4622_v45 = vld [vmem:[#allocation2 + $0x24] sm:$0xf] }
  0x9f   : > { %5995 = vst [vmem:[#allocation37_spill] sm:$0xff] %v4620_v44  ;;  %5996 = vst [vmem:[#allocation38_spill] sm:$0xff] %v4622_v45  ;;  %v4624_v46 = vld [vmem:[#allocation2 + $0x28] sm:$0xf]  ;;  %v4626_v47 = vld [vmem:[#allocation2 + $0x2c] sm:$0xf] }
  0xa0   : > { %5997 = vst [vmem:[#allocation39_spill] sm:$0xff] %v4624_v46  ;;  %5998 = vst [vmem:[#allocation40_spill] sm:$0xff] %v4626_v47  ;;  %v4628_v48 = vld [vmem:[#allocation2 + $0x30] sm:$0xf]  ;;  %v4630_v49 = vld [vmem:[#allocation2 + $0x34] sm:$0xf] }
  0xa1   : > { %5999 = vst [vmem:[#allocation41_spill] sm:$0xff] %v4628_v48  ;;  %6000 = vst [vmem:[#allocation42_spill] sm:$0xff] %v4630_v49  ;;  %v4632_v50 = vld [vmem:[#allocation2 + $0x38] sm:$0xf]  ;;  %v4634_v51 = vld [vmem:[#allocation2 + $0x3c] sm:$0xf] }
  0xa2   : > { %6001 = vst [vmem:[#allocation43_spill] sm:$0xff] %v4632_v50  ;;  %6002 = vst [vmem:[#allocation44_spill] sm:$0xff] %v4634_v51  ;;  %v4636_v52 = vld [vmem:[#allocation2 + $0x40] sm:$0xf]  ;;  %v4638_v53 = vld [vmem:[#allocation2 + $0x44] sm:$0xf] }
  0xa3   : > { %6003 = vst [vmem:[#allocation45_spill] sm:$0xff] %v4636_v52  ;;  %6004 = vst [vmem:[#allocation46_spill] sm:$0xff] %v4638_v53  ;;  %v4640_v54 = vld [vmem:[#allocation2 + $0x48] sm:$0xf]  ;;  %v4642_v55 = vld [vmem:[#allocation2 + $0x4c] sm:$0xf] }
  0xa4   : > { %6005 = vst [vmem:[#allocation47_spill] sm:$0xff] %v4640_v54  ;;  %6006 = vst [vmem:[#allocation48_spill] sm:$0xff] %v4642_v55  ;;  %v4644_v56 = vld [vmem:[#allocation2 + $0x50] sm:$0xf]  ;;  %v4646_v57 = vld [vmem:[#allocation2 + $0x54] sm:$0xf] }
  0xa5   : > { %6007 = vst [vmem:[#allocation49_spill] sm:$0xff] %v4644_v56  ;;  %6008 = vst [vmem:[#allocation50_spill] sm:$0xff] %v4646_v57  ;;  %v4648_v58 = vld [vmem:[#allocation2 + $0x58] sm:$0xf]  ;;  %v4650_v59 = vld [vmem:[#allocation2 + $0x5c] sm:$0xf] }
  0xa6   : > { %6009 = vst [vmem:[#allocation51_spill] sm:$0xff] %v4648_v58  ;;  %6010 = vst [vmem:[#allocation52_spill] sm:$0xff] %v4650_v59  ;;  %v4652_v60 = vld [vmem:[#allocation2 + $0x60] sm:$0xf]  ;;  %v4654_v61 = vld [vmem:[#allocation2 + $0x64] sm:$0xf] }
  0xa7   : > { %6011 = vst [vmem:[#allocation53_spill] sm:$0xff] %v4652_v60  ;;  %6012 = vst [vmem:[#allocation54_spill] sm:$0xff] %v4654_v61  ;;  %v4656_v62 = vld [vmem:[#allocation2 + $0x68] sm:$0xf]  ;;  %v4658_v63 = vld [vmem:[#allocation2 + $0x6c] sm:$0xf] }
  0xa8   : > { %6013 = vst [vmem:[#allocation55_spill] sm:$0xff] %v4656_v62  ;;  %6014 = vst [vmem:[#allocation56_spill] sm:$0xff] %v4658_v63  ;;  %v4660_v41 = vld [vmem:[#allocation2 + $0x70] sm:$0xf]  ;;  %v4662_v38 = vld [vmem:[#allocation2 + $0x74] sm:$0xf] }
  0xa9   : > { %6015 = vst [vmem:[#allocation57_spill] sm:$0xff] %v4660_v41  ;;  %6016 = vst [vmem:[#allocation58_spill] sm:$0xff] %v4662_v38  ;;  %v4664_v32 = vld [vmem:[#allocation2 + $0x78] sm:$0xf]  ;;  %v4666_v26 = vld [vmem:[#allocation2 + $0x7c] sm:$0xf] }
  0xaa   : > { %6017 = vst [vmem:[#allocation59_spill] sm:$0xff] %v4664_v32  ;;  %6018 = vst [vmem:[#allocation60_spill] sm:$0xff] %v4666_v26  ;;  %v4668_v23 = vld [vmem:[#allocation2 + $0x80] sm:$0xf]  ;;  %v4670_v20 = vld [vmem:[#allocation2 + $0x84] sm:$0xf] }
  0xab   : > { %6019 = vst [vmem:[#allocation61_spill] sm:$0xff] %v4668_v23  ;;  %6020 = vst [vmem:[#allocation62_spill] sm:$0xff] %v4670_v20  ;;  %v4672_v14 = vld [vmem:[#allocation2 + $0x88] sm:$0xf]  ;;  %v4674_v8 = vld [vmem:[#allocation2 + $0x8c] sm:$0xf] }
  0xac   : > { %6021 = vst [vmem:[#allocation63_spill] sm:$0xff] %v4672_v14  ;;  %6022 = vst [vmem:[#allocation64_spill] sm:$0xff] %v4674_v8  ;;  %v4676_v39 = vld [vmem:[#allocation2 + $0x90] sm:$0xf]  ;;  %v4678_v40 = vld [vmem:[#allocation2 + $0x94] sm:$0xf] }
  0xad   : > { %6023 = vst [vmem:[#allocation65_spill] sm:$0xff] %v4676_v39  ;;  %6024 = vst [vmem:[#allocation66_spill] sm:$0xff] %v4678_v40  ;;  %v4680_v33 = vld [vmem:[#allocation2 + $0x98] sm:$0xf]  ;;  %v4682_v34 = vld [vmem:[#allocation2 + $0x9c] sm:$0xf] }
  0xae   : > { %6025 = vst [vmem:[#allocation67_spill] sm:$0xff] %v4680_v33  ;;  %6026 = vst [vmem:[#allocation68_spill] sm:$0xff] %v4682_v34  ;;  %v4684_v27 = vld [vmem:[#allocation2 + $0xa0] sm:$0xf]  ;;  %v4686_v31 = vld [vmem:[#allocation2 + $0xa4] sm:$0xf] }
  0xaf   : > { %6027 = vst [vmem:[#allocation69_spill] sm:$0xff] %v4684_v27  ;;  %6028 = vst [vmem:[#allocation70_spill] sm:$0xff] %v4686_v31  ;;  %v4688_v24 = vld [vmem:[#allocation2 + $0xa8] sm:$0xf]  ;;  %v4690_v25 = vld [vmem:[#allocation2 + $0xac] sm:$0xf] }
  0xb0   : > { %6029 = vst [vmem:[#allocation71_spill] sm:$0xff] %v4688_v24  ;;  %6030 = vst [vmem:[#allocation72_spill] sm:$0xff] %v4690_v25  ;;  %v4692_v21 = vld [vmem:[#allocation2 + $0xb0] sm:$0xf]  ;;  %v4694_v22 = vld [vmem:[#allocation2 + $0xb4] sm:$0xf] }
  0xb1   : > { %6031 = vst [vmem:[#allocation73_spill] sm:$0xff] %v4692_v21  ;;  %6032 = vst [vmem:[#allocation74_spill] sm:$0xff] %v4694_v22  ;;  %v4696_v15 = vld [vmem:[#allocation2 + $0xb8] sm:$0xf]  ;;  %v4698_v16 = vld [vmem:[#allocation2 + $0xbc] sm:$0xf] }
  0xb2   : > { %6033 = vst [vmem:[#allocation75_spill] sm:$0xff] %v4696_v15  ;;  %6034 = vst [vmem:[#allocation76_spill] sm:$0xff] %v4698_v16  ;;  %v3519_v9 = vld [vmem:[#allocation7] sm:$0xff]   ;;  %v3520_v13 = vld [vmem:[#allocation7 + $0x8] sm:$0xff]   ;;  %v4755_v14 = vmov 0.0   ;;  %v4757_v8 = vmov 0.0  }
  0xb3   : > { %2769 = vmatprep.subr.bf16.mxu0 %v3519_v9  ;;  %2993 = vmatprep.subr.bf16.mxu1 %v3519_v9  ;;  %v3521_v6 = vld [vmem:[#allocation7 + $0x10] sm:$0xff]   ;;  %v3522_v7 = vld [vmem:[#allocation7 + $0x18] sm:$0xff]   ;;  %v3527_v19 = vld [vmem:[%s4701_s10] sm:$0xff]   ;;  %v4761_v18 = vmov 0.0   ;;  %v4771_v23 = vmov 0.0   ;;  %v4773_v20 = vmov 0.0  }
  0xb4   : > { %2770 = vmatpush3.bf16.msra.mxu0 %v3519_v9  ;;  %3001 = vmatpush3.bf16.msra.mxu1 %v3519_v9  ;;  %v3528_v12 = vld [vmem:[%s4701_s10 + $0x20] sm:$0xff]   ;;  %v3532_v5 = vld [vmem:[%s4701_s10 + $0x30] sm:$0xff]   ;;  %v3534_v2 = vld [vmem:[%s4701_s10 + $0x38] sm:$0xff]   ;;  %v4777_v50 = vmov 0.0   ;;  %v4779_v51 = vmov 0.0   ;;  %v4781_v32 = vmov 0.0  }
  0xb5   : > { %2771 = vmatprep.subr.bf16.mxu0 %v3520_v13  ;;  %2994 = vmatprep.subr.bf16.mxu1 %v3520_v13  ;;  %v3523_v9 = vld [vmem:[#allocation7 + $0x20] sm:$0xff]   ;;  %v4783_v26 = vmov 0.0   ;;  %v4785_v48 = vmov 0.0   ;;  %v4787_v49 = vmov 0.0   ;;  %v4789_v41 = vmov 0.0   ;;  %s4827_s2 = smov 0  }
  0xb6   : > { %2785 = vmatprep.mubr.bf16.mxu0 %v3527_v19  ;;  %2793 = vmatprep.mubr.bf16.mxu1 %v3528_v12  ;;  %v3525_v19 = vld [vmem:[#allocation7 + $0x30] sm:$0xff]   ;;  %v3530_v12 = vld [vmem:[%s4701_s10 + $0x28] sm:$0xff]   ;;  %v4791_v38 = vmov 0.0   ;;  %v4793_v46 = vmov 0.0   ;;  %v4795_v47 = vmov -inf   ;;  %v4797_v62 = vmov -inf  }
  0xb7   : > { %v4799_v63 = vmov -inf   ;;  %v4801_v44 = vmov -inf   ;;  %v4803_v45 = vmov -inf   ;;  %v4805_v60 = vmov -inf  }
  0xb8   : > { %2772 = vmatpush3.bf16.msra.mxu0 %v3520_v13  ;;  %3002 = vmatpush3.bf16.msra.mxu1 %v3520_v13  ;;  %v3524_v13 = vld [vmem:[#allocation7 + $0x28] sm:$0xff]   ;;  %v4807_v61 = vmov -inf   ;;  %v4809_v42 = vmov -inf   ;;  %v4811_v43 = vmov -inf   ;;  %v4813_v58 = vmov -inf  }
  0xb9   : > { %2773 = vmatprep.subr.bf16.mxu0 %v3521_v6  ;;  %2995 = vmatprep.subr.bf16.mxu1 %v3521_v6  ;;  %v4815_v59 = vmov -inf   ;;  %v4817_v36 = vmov -inf   ;;  %v4819_v37 = vmov -inf   ;;  %v4821_v56 = vmov -inf  }
  0xba   : > { %v4823_v57 = vmov -inf   ;;  %v4825_v30 = vmov -inf  }
  0xbc   : > { %2774 = vmatpush3.bf16.msra.mxu0 %v3521_v6  ;;  %3003 = vmatpush3.bf16.msra.mxu1 %v3521_v6  ;;  %v3526_v6 = vld [vmem:[#allocation7 + $0x38] sm:$0xff]  }
  0xbd   : > { %2775 = vmatprep.subr.bf16.mxu0 %v3522_v7  ;;  %2996 = vmatprep.subr.bf16.mxu1 %v3522_v7 }
  0xc0   : > { %2776 = vmatpush3.bf16.msra.mxu0 %v3522_v7  ;;  %3004 = vmatpush3.bf16.msra.mxu1 %v3522_v7  ;;  %v3529_v7 = vld [vmem:[%s4701_s10 + $0x8] sm:$0xff]  }
  0xc1   : > { %2777 = vmatprep.subr.bf16.mxu0 %v3523_v9  ;;  %2997 = vmatprep.subr.bf16.mxu1 %v3523_v9 }
  0xc4   : > { %2778 = vmatpush3.bf16.msra.mxu0 %v3523_v9  ;;  %3005 = vmatpush3.bf16.msra.mxu1 %v3523_v9  ;;  %v3531_v9 = vld [vmem:[%s4701_s10 + $0x10] sm:$0xff]  }
  0xc5   : > { %2779 = vmatprep.subr.bf16.mxu0 %v3524_v13  ;;  %2998 = vmatprep.subr.bf16.mxu1 %v3524_v13 }
  0xc8   : > { %2780 = vmatpush3.bf16.msra.mxu0 %v3524_v13  ;;  %3006 = vmatpush3.bf16.msra.mxu1 %v3524_v13  ;;  %v3533_v13 = vld [vmem:[%s4701_s10 + $0x18] sm:$0xff]  }
  0xc9   : > { %2781 = vmatprep.subr.bf16.mxu0 %v3525_v19  ;;  %2999 = vmatprep.subr.bf16.mxu1 %v3525_v19 }
  0xcc   : > { %2782 = vmatpush3.bf16.msra.mxu0 %v3525_v19  ;;  %3007 = vmatpush3.bf16.msra.mxu1 %v3525_v19 }
  0xcd   : > { %2783 = vmatprep.subr.bf16.mxu0 %v3526_v6  ;;  %3000 = vmatprep.subr.bf16.mxu1 %v3526_v6 }
  0xd0   : > { %2784 = vmatpush3.bf16.msra.mxu0 %v3526_v6  ;;  %3008 = vmatpush3.bf16.msra.mxu1 %v3526_v6 }
  0xd3   : > { %2786 = vmatmul.mubr.bf16.vlgmr.msra.gmra.mrb[0].mxu0 %v3529_v7  ;;  %2794 = vmatmul.mubr.bf16.vlgmr.msra.gmra.mrb[0].mxu1 %v3530_v12 }
  0xd4   : > { %2789 = vmatprep.mubr.bf16.mxu0 %v3531_v9  ;;  %2797 = vmatprep.mubr.bf16.mxu1 %v3532_v5 }
  0xdb   : > { %2790 = vmatmul.mubr.bf16.gmra.mrb[4].mxu0 %v3533_v13  ;;  %2798 = vmatmul.mubr.bf16.gmra.mrb[4].mxu1 %v3534_v2 }
 0x1a6   : > { %v2787_v15 = vpop.f32.mrb[0].mxu0  ;;  %v2795_v16 = vpop.f32.mrb[0].mxu1 }
 0x1a7   : > { %v431_v21 = vpop.f32.mrb[1].mxu0  ;;  %v463_v19 = vpop.f32.mrb[1].mxu1 }
 0x1a8   : > { %v2788_v22 = vpop.f32.mrb[2].mxu0  ;;  %v2796_v24 = vpop.f32.mrb[2].mxu1 }
 0x1a9   : > { %v4711_v25 = vpack.c.bf16 %v2788_v22, %v2787_v15  ;;  %v4713_v27 = vpack.c.bf16 %v2796_v24, %v2795_v16  ;;  %v434_v6 = vpop.f32.mrb[3].mxu0  ;;  %v466_v7 = vpop.f32.mrb[3].mxu1 }
 0x1aa   : > { %v4715_v12 = vpack.c.bf16 %v434_v6, %v431_v21  ;;  %v4717_v5 = vpack.c.bf16 %v466_v7, %v463_v19  ;;  %v4731_v21 = vmov 0.0   ;;  %v4733_v19 = vmov 0.0  }
 0x1ab   : > { %6035 = vst [vmem:[#allocation77_spill] sm:$0xff] %v4711_v25  ;;  %6036 = vst [vmem:[#allocation78_spill] sm:$0xff] %v4713_v27  ;;  %v4735_v6 = vmov 0.0   ;;  %v4737_v7 = vmov 0.0  }
 0x1ac   : > { %6037 = vst [vmem:[#allocation79_spill] sm:$0xff] %v4715_v12  ;;  %6038 = vst [vmem:[#allocation80_spill] sm:$0xff] %v4717_v5 }
 0x1ad   : > { %6043 = vst [vmem:[#allocation85_spill] sm:$0xff] %v4737_v7 }
 0x1ae   : > { %v2791_v9 = vpop.f32.mrb[4].mxu0  ;;  %v2799_v13 = vpop.f32.mrb[4].mxu1 }
 0x1af   : > { %v447_v2 = vpop.f32.mrb[5].mxu0  ;;  %v479_v31 = vpop.f32.mrb[5].mxu1 }
 0x1b0   : > { %v2792_v33 = vpop.f32.mrb[6].mxu0  ;;  %v2800_v34 = vpop.f32.mrb[6].mxu1 }
 0x1b1   : > { %v4719_v39 = vpack.c.bf16 %v2792_v33, %v2791_v9  ;;  %v4721_v40 = vpack.c.bf16 %v2800_v34, %v2799_v13  ;;  %v450_v15 = vpop.f32.mrb[7].mxu0  ;;  %v482_v16 = vpop.f32.mrb[7].mxu1  ;;  %v4739_v33 = vmov 0.0   ;;  %v4741_v34 = vmov 0.0  }
 0x1b2   : > { %v4723_v22 = vpack.c.bf16 %v450_v15, %v447_v2  ;;  %v4725_v24 = vpack.c.bf16 %v482_v16, %v479_v31  ;;  %v4743_v9 = vmov 0.0   ;;  %v4745_v13 = vmov 0.0  }
 0x1b3   : > { %6039 = vst [vmem:[#allocation81_spill] sm:$0xff] %v4719_v39  ;;  %6040 = vst [vmem:[#allocation82_spill] sm:$0xff] %v4721_v40  ;;  %v4747_v31 = vmov 0.0   ;;  %v4749_v2 = vmov 0.0   ;;  %v4751_v15 = vmov 0.0   ;;  %v4753_v16 = vmov 0.0  }
 0x1b4   : > { %6041 = vst [vmem:[#allocation83_spill] sm:$0xff] %v4723_v22  ;;  %6042 = vst [vmem:[#allocation84_spill] sm:$0xff] %v4725_v24 }
 0x1b5   : > { %6044 = vst [vmem:[#allocation86_spill] sm:$0xff] %v4745_v13  ;;  %6045 = vst [vmem:[#allocation87_spill] sm:$0xff] %v4751_v15 }
 0x1b6   : > { %6046 = vst [vmem:[#allocation88_spill] sm:$0xff] %v4753_v16 }
 0x1b7 LB: >> { %6051 = vst [vmem:[#allocation89_spill] sm:$0xff] %v4111_v21  ;;  %6052 = vst [vmem:[#allocation90_spill] sm:$0xff] %v4115_v19  ;;  %v6054_v7 = vld [vmem:[#allocation85_spill] sm:$0xff]  ;;  %v6069_v12 = vld [vmem:[#allocation79_spill] sm:$0xff]  ;;  %s2537_s24 = sshll.u32 %s4303_s2, 7  ;;  %s591_s13 = sadd.s32 1, %s4303_s2   ;;  %s4303_s2 = sphi %s4827_s2, %s6245_s2   ;;  %v4299_v30 = vphi %v4825_v30, %v6244_v30   ;;  %v4295_v57 = vphi %v4823_v57, %v6243_v57   ;;  %v4291_v56 = vphi %v4821_v56, %v6242_v56   ;;  %v4287_v37 = vphi %v4819_v37, %v6241_v37   ;;  %v4283_v36 = vphi %v4817_v36, %v6240_v36   ;;  %v4279_v59 = vphi %v4815_v59, %v6239_v59   ;;  %v4275_v58 = vphi %v4813_v58, %v6238_v58   ;;  %v4271_v43 = vphi %v4811_v43, %v6237_v43   ;;  %v4267_v42 = vphi %v4809_v42, %v6236_v42   ;;  %v4263_v61 = vphi %v4807_v61, %v6235_v61   ;;  %v4259_v60 = vphi %v4805_v60, %v6234_v60   ;;  %v4255_v45 = vphi %v4803_v45, %v6233_v45   ;;  %v4251_v44 = vphi %v4801_v44, %v6232_v44   ;;  %v4247_v63 = vphi %v4799_v63, %v6231_v63   ;;  %v4243_v62 = vphi %v4797_v62, %v6230_v62   ;;  %v4239_v47 = vphi %v4795_v47, %v6229_v47   ;;  %v4235_v46 = vphi %v4793_v46, %v6228_v46   ;;  %v4231_v38 = vphi %v4791_v38, %v6227_v38   ;;  %v4227_v41 = vphi %v4789_v41, %v6226_v41   ;;  %v4223_v49 = vphi %v4787_v49, %v6225_v49   ;;  %v4219_v48 = vphi %v4785_v48, %v6224_v48   ;;  %v4215_v26 = vphi %v4783_v26, %v6223_v26   ;;  %v4211_v32 = vphi %v4781_v32, %v6222_v32   ;;  %v4207_v51 = vphi %v4779_v51, %v6221_v51   ;;  %v4203_v50 = vphi %v4777_v50, %v6220_v50   ;;  %v4199_v0 = vphi %v4775_v0, %v6219_v0   ;;  %v4195_v20 = vphi %v4773_v20, %v6218_v20   ;;  %v4191_v23 = vphi %v4771_v23, %v6217_v23   ;;  %v4187_v4 = vphi %v4769_v4, %v6216_v4   ;;  %v4183_v3 = vphi %v4767_v3, %v6215_v3   ;;  %v4179_v11 = vphi %v4765_v11, %v6214_v11   ;;  %v4175_v10 = vphi %v4763_v10, %v6213_v10   ;;  %v4171_v18 = vphi %v4761_v18, %v6212_v18   ;;  %v4167_v17 = vphi %v4759_v17, %v6211_v17   ;;  %v4163_v8 = vphi %v4757_v8, %v6210_v8   ;;  %v4159_v14 = vphi %v4755_v14, %v6209_v14   ;;  %v4147_v2 = vphi %v4749_v2, %v6206_v2   ;;  %v4143_v31 = vphi %v4747_v31, %v6205_v31   ;;  %v4135_v9 = vphi %v4743_v9, %v6202_v9   ;;  %v4131_v34 = vphi %v4741_v34, %v6200_v34   ;;  %v4127_v33 = vphi %v4739_v33, %v6199_v33   ;;  %v4119_v6 = vphi %v4735_v6, %v6196_v6   ;;  %v4115_v19 = vphi %v4733_v19, %v6194_v19   ;;  %v4111_v21 = vphi %v4731_v21, %v6192_v21  }
 0x1b8   : >> { %6053 = vst [vmem:[#allocation91_spill] sm:$0xff] %v4119_v6  ;;  %6055 = vst [vmem:[#allocation85_spill] sm:$0xff] %v6054_v7  ;;  %2817 = vmatprep.mubr.bf16.mxu0 %v6069_v12  ;;  %s641_s22 = sshra.s32 %s2537_s24, 3  ;;  %v6070_v25 = vld [vmem:[#allocation77_spill] sm:$0xff]  ;;  %v6073_v5 = vld [vmem:[#allocation80_spill] sm:$0xff]  ;;  %p5308_p4 = scmp.ge.s32.totalorder %s591_s13, 2  }
 0x1b9   : >> { %6056 = vst [vmem:[#allocation92_spill] sm:$0xff] %v4127_v33  ;;  %6057 = vst [vmem:[#allocation93_spill] sm:$0xff] %v4131_v34  ;;  %s2538_s14 = sshll.u32 %s641_s22, 2  ;;  %v6074_v27 = vld [vmem:[#allocation78_spill] sm:$0xff]  ;;  %s6245_s2 = smov %s591_s13 }
 0x1ba   : >> { %6058 = vst [vmem:[#allocation94_spill] sm:$0xff] %v4135_v9  ;;  %6061 = vst [vmem:[#allocation95_spill] sm:$0xff] %v4143_v31  ;;  %s644_s12 = scalar_lea.vmem [#allocation2], %s2538_s14  ;;  %v6072_v39 = vld [vmem:[#allocation81_spill] sm:$0xff]  ;;  %v6076_v40 = vld [vmem:[#allocation82_spill] sm:$0xff]  ;;  %s2592_s9 = sshll.u32 (%p5308_p4), %s4362_s19, 11 }
 0x1bb   : >> { %6062 = vst [vmem:[#allocation96_spill] sm:$0xff] %v4147_v2  ;;  %6067 = vst [vmem:[#allocation97_spill] sm:$0xff] %v4159_v14  ;;  %v3535_v35 = vld [vmem:[%s644_s12] sm:$0xff]   ;;  %v3536_v54 = vld [vmem:[%s644_s12 + $0x8] sm:$0xff]   ;;  %s2248_s6 = sshll.u32 (%p5308_p4), %s4729_s20, 4  ;;  %s5824_s11 = scalar_lea.hbm (%p5308_p4), %s5876_s4, %s2592_s9  ;;  %s5826_s6 = int_to_ptr.vmem [resolvable:$true] %s2248_s6 }
 0x1bc   : >> { %v6059_v13 = vld [vmem:[#allocation86_spill] sm:$0xff]  ;;  %v6063_v15 = vld [vmem:[#allocation87_spill] sm:$0xff]  ;;  %6068 = vst [vmem:[#allocation98_spill] sm:$0xff] %v4167_v17  ;;  %2801 = vmatprep.subr.bf16.mxu0 %v3535_v35  ;;  %2833 = vmatprep.subr.bf16.mxu1 %v3535_v35  ;;  %v3538_v28 = vld [vmem:[%s644_s12 + $0x18] sm:$0xff]   ;;  %s2235_s19 = scalar_lea.sflag (%p5308_p4), [#allocation4], %s4537_s8  ;;  %s3833_s29 = scalar_lea.vmem (%p5308_p4), %s5826_s6, 2048 }
 0x1bd   : >> { %6060 = vst [vmem:[#allocation86_spill] sm:$0xff] %v6059_v13  ;;  %6064 = vst [vmem:[#allocation87_spill] sm:$0xff] %v6063_v15  ;;  %v6065_v16 = vld [vmem:[#allocation88_spill] sm:$0xff]  ;;  %2802 = vmatpush3.bf16.xpose.msra.mxu0 %v3535_v35  ;;  %2834 = vmatpush3.bf16.msra.mxu1 %v3535_v35  ;;  %v3537_v55 = vld [vmem:[%s644_s12 + $0x10] sm:$0xff]   ;;  %p3834_p0 = scmp.ne.s32.totalorder (%p5308_p4), %s5826_s6, %s3833_s29  ;;  %p6373_p2 = scmp.ne.s32.totalorder (%p5308_p4), %s5957_s27, 0 }
 0x1be   : >> { %6066 = vst [vmem:[#allocation88_spill] sm:$0xff] %v6065_v16  ;;  %2803 = vmatprep.subr.bf16.mxu0 %v3536_v54  ;;  %2835 = vmatprep.subr.bf16.mxu1 %v3536_v54  ;;  %v3539_v29 = vld [vmem:[%s644_s12 + $0x20] sm:$0xff]   ;;  %v3540_v52 = vld [vmem:[%s644_s12 + $0x28] sm:$0xff]   ;;  %v3541_v53 = vld [vmem:[%s644_s12 + $0x30] sm:$0xff]   ;;  %s4313_s26 = smov (%p5308_p4), [#allocation10]  }
 0x1bf   : >> { %v3542_v35 = vld [vmem:[%s644_s12 + $0x38] sm:$0xff]   ;;  %v6071_v22 = vld [vmem:[#allocation83_spill] sm:$0xff]  ;;  %p3835_p5 = pnand (%p5308_p4), %p3834_p0, %p6373_p2  ;;  %s3837_s5 = sshll.u32 (%p5308_p4), %s4313_s26, 4  ;;  %s3838_s5 = int_to_ptr.vmem [resolvable:$false] %s3837_s5 }
 0x1c0   : >> { %v6075_v24 = vld [vmem:[#allocation84_spill] sm:$0xff]  ;;  %s3839_s25 = scalar_lea.vmem (%p5308_p4), %s3838_s5, 4096  ;;  %p3840_p12 = scmp.lt.s32.totalorder (%p5308_p4), %s5826_s6, %s3838_s5 }
 0x1c1   : >> { %2836 = vmatpush3.bf16.msra.mxu1 %v3536_v54  ;;  %p3836_p11 = pneg (%p5308_p4), %p3835_p5  ;;  %p3841_p3 = scmp.lt.s32.totalorder (%p5308_p4), %s3839_s25, %s3833_s29 }
 0x1c2   : >> { %2837 = vmatprep.subr.bf16.mxu1 %v3537_v55 }
 0x1c3   : > { %p3842_p6 = por (%p5308_p4), %p3841_p3, %p3840_p12 }
 0x1c5   : >> { %2804 = vmatpush3.bf16.xpose.msra.mxu0 %v3536_v54  ;;  %2838 = vmatpush3.bf16.msra.mxu1 %v3537_v55  ;;  %p3843_p13 = pnand (%p5308_p4), %p3842_p6, %p3836_p11 }
 0x1c6   : >> { %2805 = vmatprep.subr.bf16.mxu0 %v3537_v55  ;;  %2839 = vmatprep.subr.bf16.mxu1 %v3538_v28 }
 0x1c9   : >> { %2840 = vmatpush3.bf16.msra.mxu1 %v3538_v28 }
 0x1ca   : >> { %2841 = vmatprep.subr.bf16.mxu1 %v3539_v29 }
 0x1cd   : >> { %2806 = vmatpush3.bf16.xpose.msra.mxu0 %v3537_v55  ;;  %2842 = vmatpush3.bf16.msra.mxu1 %v3539_v29 }
 0x1ce   : >> { %2807 = vmatprep.subr.bf16.mxu0 %v3538_v28  ;;  %2843 = vmatprep.subr.bf16.mxu1 %v3540_v52 }
 0x1d1   : >> { %2844 = vmatpush3.bf16.msra.mxu1 %v3540_v52 }
 0x1d2   : >> { %2845 = vmatprep.subr.bf16.mxu1 %v3541_v53 }
 0x1d5   : >> { %2808 = vmatpush3.bf16.xpose.msra.mxu0 %v3538_v28  ;;  %2846 = vmatpush3.bf16.msra.mxu1 %v3541_v53 }
 0x1d6   : >> { %2809 = vmatprep.subr.bf16.mxu0 %v3539_v29  ;;  %2847 = vmatprep.subr.bf16.mxu1 %v3542_v35 }
 0x1d9   : >> { %2848 = vmatpush3.bf16.msra.mxu1 %v3542_v35 }
 0x1dd   : >> { %2810 = vmatpush3.bf16.xpose.msra.mxu0 %v3539_v29 }
 0x1de   : >> { %2811 = vmatprep.subr.bf16.mxu0 %v3540_v52 }
 0x1e5   : >> { %2812 = vmatpush3.bf16.xpose.msra.mxu0 %v3540_v52 }
 0x1e6   : >> { %2813 = vmatprep.subr.bf16.mxu0 %v3541_v53 }
 0x1ed   : >> { %2814 = vmatpush3.bf16.xpose.msra.mxu0 %v3541_v53 }
 0x1ee   : >> { %2815 = vmatprep.subr.bf16.mxu0 %v3542_v35 }
 0x1f5   : >> { %2816 = vmatpush3.bf16.xpose.msra.mxu0 %v3542_v35 }
 0x1fc   : >> { %2818 = vmatmul.mubr.bf16.vlgmr.msra.gmra.mrb[0].mxu0 %v6070_v25 }
 0x1fd   : >> { %2821 = vmatprep.mubr.bf16.mxu0 %v6071_v22 }
 0x204   : >> { %2822 = vmatmul.mubr.bf16.gmra.mrb[4].mxu0 %v6072_v39 }
 0x205   : >> { %2825 = vmatprep.mubr.bf16.mxu0 %v6073_v5 }
 0x20c   : >> { %2826 = vmatmul.mubr.bf16.gmra.mrb[8].mxu0 %v6074_v27 }
 0x20d   : >> { %2829 = vmatprep.mubr.bf16.mxu0 %v6075_v24 }
 0x214   : >> { %2830 = vmatmul.mubr.bf16.gmra.mrb[12].mxu0 %v6076_v40 }
 0x2cf   : >> { %v2819_v28 = vpop.f32.mrb[0].mxu0 }
 0x2d0   : >> { %810 = vmax.xlane.f32.xlu1 %v2819_v28  ;;  %v743_v29 = vpop.f32.mrb[1].mxu0 }
 0x2d1   : >> { %806 = vmax.xlane.f32.xlu0 %v743_v29  ;;  %v2820_v52 = vpop.f32.mrb[2].mxu0 }
 0x2d2   : >> { %v746_v53 = vpop.f32.mrb[3].mxu0 }
 0x2d4   : >> { %812 = vmax.xlane.f32.xlu1 %v2820_v52 }
 0x2d5   : >> { %808 = vmax.xlane.f32.xlu0 %v746_v53 }
 0x2d7   : >> { %v4985_v54 = vpop.f32.mrb[4].mxu0 }
 0x2d8   : >> { %v759_v55 = vpop.f32.mrb[5].mxu0 }
 0x2d9   : >> { %814 = vmax.xlane.f32.xlu0 %v759_v55  ;;  %v4987_v35 = vpop.f32.mrb[6].mxu0 }
 0x2da   : >> { %v762_v1 = vpop.f32.mrb[7].mxu0 }
 0x2db   : >> { %816 = vmax.xlane.f32.xlu1 %v762_v1 }
 0x2dd   : >> { %818 = vmax.xlane.f32.xlu0 %v4985_v54 }
 0x2df   : >> { %820 = vmax.xlane.f32.xlu1 %v4987_v35  ;;  %v4991_v40 = vpop.f32.mrb[8].mxu0 }
 0x2e0   : >> { %6077 = vst [vmem:[#allocation99_spill] sm:$0xff] %v4991_v40  ;;  %v4993_v24 = vpop.f32.mrb[9].mxu0 }
 0x2e1   : >> { %822 = vmax.xlane.f32.xlu0 %v4993_v24  ;;  %v4996_v27 = vpop.f32.mrb[10].mxu0 }
 0x2e2   : >> { %6078 = vst [vmem:[#allocation100_spill] sm:$0xff] %v4996_v27  ;;  %v4998_v5 = vpop.f32.mrb[11].mxu0 }
 0x2e3   : >> { %824 = vmax.xlane.f32.xlu1 %v4998_v5 }
 0x2e5   : >> { %826 = vmax.xlane.f32.xlu0 %v4991_v40 }
 0x2e7   : >> { %828 = vmax.xlane.f32.xlu1 %v4996_v27  ;;  %v5003_v39 = vpop.f32.mrb[12].mxu0 }
 0x2e8   : >> { %6079 = vst [vmem:[#allocation101_spill] sm:$0xff] %v5003_v39  ;;  %v5005_v22 = vpop.f32.mrb[13].mxu0 }
 0x2e9   : >> { %830 = vmax.xlane.f32.xlu0 %v5005_v22  ;;  %v5008_v25 = vpop.f32.mrb[14].mxu0 }
 0x2ea   : >> { %6080 = vst [vmem:[#allocation102_spill] sm:$0xff] %v5008_v25  ;;  %v5010_v12 = vpop.f32.mrb[15].mxu0 }
 0x2eb   : >> { %832 = vmax.xlane.f32.xlu1 %v5010_v12 }
 0x2ed   : >> { %834 = vmax.xlane.f32.xlu0 %v5003_v39 }
 0x2ef   : >> { %836 = vmax.xlane.f32.xlu1 %v5008_v25 }
 0x35d   : >> { %v811_v6 = vpop.xlane.xlu1 %810 }
 0x35e   : >> { %v5016_v21 = vmax.f32 %v4291_v56, %v811_v6   ;;  %v807_v7 = vpop.xlane.xlu0 %806 }
 0x35f   : >> { %v5019_v19 = vmax.f32 %v4299_v30, %v807_v7  }
 0x360   : >> { %6081 = vst [vmem:[#allocation103_spill] sm:$0xff] %v5016_v21  ;;  %v6082_v27 = vmov %v5016_v21 }
 0x361   : >> { %6083 = vst [vmem:[#allocation104_spill] sm:$0xff] %v5019_v19  ;;  %v6084_v40 = vmov %v5019_v19  ;;  %v904_v33 = vsub.f32 %v2819_v28, %v6082_v27  ;;  %v813_v15 = vpop.xlane.xlu1 %812 }
 0x362   : >> { %v902_v34 = vsub.f32 %v743_v29, %v6084_v40  ;;  %v5028_v16 = vmax.f32 %v4287_v37, %v813_v15   ;;  %v809_v21 = vpop.xlane.xlu0 %808 }
 0x363   : >> { %v922_v31 = vmul.f32 1.442695, %v904_v33  ;;  %v5031_v6 = vmax.f32 %v4295_v57, %v809_v21  }
 0x364   : >> { %6085 = vst [vmem:[#allocation105_spill] sm:$0xff] %v5028_v16  ;;  %v6086_v25 = vmov %v5028_v16  ;;  %v918_v19 = vmul.f32 1.442695, %v902_v34 }
 0x365   : >> { %6087 = vst [vmem:[#allocation106_spill] sm:$0xff] %v5031_v6  ;;  %v6088_v39 = vmov %v5031_v6  ;;  %v905_v28 = vsub.f32 %v2820_v52, %v6086_v25  ;;  %3543 = vpow2.f32 %v922_v31 }
 0x366   : >> { %v903_v29 = vsub.f32 %v746_v53, %v6088_v39  ;;  %v815_v9 = vpop.xlane.xlu0 %814  ;;  %3545 = vpow2.f32 %v918_v19 }
 0x367   : >> { %v924_v33 = vmul.f32 1.442695, %v905_v28  ;;  %v5040_v16 = vmax.f32 %v4283_v36, %v815_v9  }
 0x368   : >> { %v920_v15 = vmul.f32 1.442695, %v903_v29  ;;  %v817_v21 = vpop.xlane.xlu1 %816 }
 0x369   : >> { %6089 = vst [vmem:[#allocation107_spill] sm:$0xff] %v5040_v16  ;;  %v6090_v40 = vmov %v5040_v16  ;;  %3547 = vpow2.f32 %v924_v33  ;;  %v5046_v31 = vmax.f32 %v4279_v59, %v817_v21  }
 0x36a   : >> { %v906_v52 = vsub.f32 %v759_v55, %v6090_v40  ;;  %v819_v6 = vpop.xlane.xlu0 %818  ;;  %3549 = vpow2.f32 %v920_v15 }
 0x36b   : >> { %6091 = vst [vmem:[#allocation108_spill] sm:$0xff] %v5046_v31  ;;  %v6092_v7 = vmov %v5046_v31  ;;  %v5052_v9 = vmax.f32 %v4275_v58, %v819_v6  }
 0x36c   : >> { %v907_v28 = vsub.f32 %v762_v1, %v6092_v7  ;;  %v821_v19 = vpop.xlane.xlu1 %820  ;;  %v926_v33 = vmul.f32 1.442695, %v906_v52 }
 0x36d   : >> { %6093 = vst [vmem:[#allocation109_spill] sm:$0xff] %v5052_v9  ;;  %v6094_v29 = vmov %v5052_v9  ;;  %v5055_v16 = vmax.f32 %v4271_v43, %v821_v19  }
 0x36e   : >> { %v928_v34 = vmul.f32 1.442695, %v907_v28  ;;  %v908_v15 = vsub.f32 %v4985_v54, %v6094_v29  ;;  %v823_v21 = vpop.xlane.xlu0 %822 }
 0x36f   : >> { %6095 = vst [vmem:[#allocation110_spill] sm:$0xff] %v5055_v16  ;;  %v6096_v13 = vmov %v5055_v16  ;;  %v3544_v31 = vpop.eup %3543  ;;  %v5066_v52 = vmax.f32 %v4267_v42, %v823_v21  }
 0x370   : >> { %v909_v6 = vsub.f32 %v4987_v35, %v6096_v13  ;;  %3551 = vpow2.f32 %v928_v34  ;;  %v930_v9 = vmul.f32 1.442695, %v908_v15  ;;  %970 = vadd.xlane.f32.xlu0 %v3544_v31  ;;  %v825_v28 = vpop.xlane.xlu1 %824  ;;  %v3546_v53 = vpop.eup %3545 }
 0x371   : >> { %6097 = vst [vmem:[#allocation111_spill] sm:$0xff] %v5066_v52  ;;  %3553 = vpow2.f32 %v926_v33  ;;  %v910_v16 = vsub.f32 %v4993_v24, %v5066_v52  ;;  %v5073_v1 = vmax.f32 %v4263_v61, %v825_v28  }
 0x372   : >> { %v932_v19 = vmul.f32 1.442695, %v909_v6  ;;  %v827_v35 = vpop.xlane.xlu0 %826  ;;  %3555 = vpow2.f32 %v930_v9  ;;  %v6101_v9 = vld [vmem:[#allocation99_spill] sm:$0xff] }
 0x373   : >> { %6098 = vst [vmem:[#allocation112_spill] sm:$0xff] %v5073_v1  ;;  %v3548_v55 = vpop.eup %3547  ;;  %v5076_v34 = vmax.f32 %v4259_v60, %v827_v35   ;;  %v934_v15 = vmul.f32 1.442695, %v910_v16  ;;  %v911_v21 = vsub.f32 %v4998_v5, %v5073_v1 }
 0x374   : >> { %966 = vadd.xlane.f32.xlu0 %v3546_v53  ;;  %972 = vadd.xlane.f32.xlu1 %v3548_v55  ;;  %v829_v24 = vpop.xlane.xlu1 %828  ;;  %v1031_v6 = vpack.c.bf16 %v3548_v55, %v3544_v31  ;;  %v3550_v54 = vpop.eup %3549  ;;  %3557 = vpow2.f32 %v932_v19  ;;  %v6104_v55 = vld [vmem:[#allocation100_spill] sm:$0xff] }
 0x375   : >> { %6099 = vst [vmem:[#allocation113_spill] sm:$0xff] %v5076_v34  ;;  %v6100_v7 = vmov %v5076_v34  ;;  %v5087_v16 = vmax.f32 %v4255_v45, %v829_v24   ;;  %v936_v34 = vmul.f32 1.442695, %v911_v21  ;;  %v1030_v2 = vpack.c.bf16 %v3550_v54, %v3546_v53 }
 0x376   : >> { %v912_v35 = vsub.f32 %v6101_v9, %v6100_v7  ;;  %v831_v33 = vpop.xlane.xlu0 %830  ;;  %3559 = vpow2.f32 %v934_v15 }
 0x377   : >> { %6102 = vst [vmem:[#allocation114_spill] sm:$0xff] %v5087_v16  ;;  %v6103_v52 = vmov %v5087_v16  ;;  %v5094_v19 = vmax.f32 %v4251_v44, %v831_v33   ;;  %2849 = vmatprep.mubr.bf16.mxu1 %v1030_v2  ;;  %3561 = vpow2.f32 %v936_v34 }
 0x378   : >> { %v938_v17 = vmul.f32 1.442695, %v912_v35  ;;  %v913_v31 = vsub.f32 %v6104_v55, %v6103_v52  ;;  %968 = vadd.xlane.f32.xlu1 %v3550_v54  ;;  %v833_v9 = vpop.xlane.xlu1 %832  ;;  %2850 = vmatmul.mubr.bf16.vlgmr.msra.gmra.mrb[0].mxu1 %v1031_v6 }
 0x379   : >> { %6105 = vst [vmem:[#allocation115_spill] sm:$0xff] %v5094_v19  ;;  %v6106_v28 = vmov %v5094_v19  ;;  %v5097_v21 = vmax.f32 %v4247_v63, %v833_v9  }
 0x37a   : >> { %v3552_v53 = vpop.eup %3551  ;;  %v940_v35 = vmul.f32 1.442695, %v913_v31  ;;  %v914_v15 = vsub.f32 %v5005_v22, %v6106_v28  ;;  %v835_v55 = vpop.xlane.xlu0 %834  ;;  %3563 = vpow2.f32 %v938_v17  ;;  %v6111_v17 = vld [vmem:[#allocation101_spill] sm:$0xff] }
 0x37b   : >> { %6107 = vst [vmem:[#allocation116_spill] sm:$0xff] %v5097_v21  ;;  %v6108_v24 = vmov %v5097_v21  ;;  %v3554_v5 = vpop.eup %3553  ;;  %v5108_v33 = vmax.f32 %v4243_v62, %v835_v55  }
 0x37c   : >> { %v915_v54 = vsub.f32 %v5010_v12, %v6108_v24  ;;  %v942_v6 = vmul.f32 1.442695, %v914_v15  ;;  %v837_v34 = vpop.xlane.xlu1 %836  ;;  %v1032_v31 = vpack.c.bf16 %v3552_v53, %v3554_v5  ;;  %v3556_v19 = vpop.eup %3555  ;;  %3565 = vpow2.f32 %v940_v35  ;;  %v6114_v35 = vld [vmem:[#allocation102_spill] sm:$0xff] }
 0x37d   : >> { %6109 = vst [vmem:[#allocation117_spill] sm:$0xff] %v5108_v33  ;;  %v6110_v1 = vmov %v5108_v33  ;;  %v5115_v2 = vmax.f32 %v4239_v47, %v837_v34   ;;  %978 = vadd.xlane.f32.xlu0 %v3556_v19 }
 0x37e   : >> { %v944_v9 = vmul.f32 1.442695, %v915_v54  ;;  %v916_v21 = vsub.f32 %v6111_v17, %v6110_v1  ;;  %2853 = vmatprep.mubr.bf16.mxu1 %v1032_v31  ;;  %v3558_v12 = vpop.eup %3557  ;;  %3567 = vpow2.f32 %v942_v6 }
 0x37f   : >> { %6112 = vst [vmem:[#allocation118_spill] sm:$0xff] %v5115_v2  ;;  %v6113_v16 = vmov %v5115_v2  ;;  %980 = vadd.xlane.f32.xlu1 %v3558_v12  ;;  %v1033_v33 = vpack.c.bf16 %v3558_v12, %v3556_v19 }
 0x380   : >> { %v946_v55 = vmul.f32 1.442695, %v916_v21  ;;  %v917_v54 = vsub.f32 %v6114_v35, %v6113_v16  ;;  %3569 = vpow2.f32 %v944_v9  ;;  %v3560_v22 = vpop.eup %3559 }
 0x381   : >> { %974 = vadd.xlane.f32.xlu0 %v3554_v5  ;;  %v3562_v17 = vpop.eup %3561  ;;  %2854 = vmatmul.mubr.bf16.gmra.mrb[4].mxu1 %v1033_v33  ;;  %v6118_v33 = vsub.f32 %v4287_v37, %v6086_v25 }
 0x382   : >> { %v948_v14 = vmul.f32 1.442695, %v917_v54  ;;  %3571 = vpow2.f32 %v946_v55  ;;  %v1034_v2 = vpack.c.bf16 %v3562_v17, %v3560_v22  ;;  %v6116_v55 = vld [vmem:[#allocation104_spill] sm:$0xff] }
 0x383   : >> { %976 = vadd.xlane.f32.xlu1 %v3552_v53 }
 0x384   : >> { %v3564_v34 = vpop.eup %3563  ;;  %3573 = vpow2.f32 %v948_v14  ;;  %2857 = vmatprep.mubr.bf16.mxu1 %v1034_v2  ;;  %v6115_v14 = vsub.f32 %v4291_v56, %v6082_v27  ;;  %v6119_v2 = vsub.f32 %v4295_v57, %v6088_v39  ;;  %v6120_v56 = vsub.f32 %v4275_v58, %v6094_v29  ;;  %v6124_v58 = vld [vmem:[#allocation108_spill] sm:$0xff] }
 0x385   : >> { %986 = vadd.xlane.f32.xlu0 %v3564_v34  ;;  %v6122_v57 = vsub.f32 %v4283_v36, %v6090_v40  ;;  %v6126_v36 = vsub.f32 %v4259_v60, %v6100_v7 }
 0x386   : >> { %v3566_v6 = vpop.eup %3565  ;;  %v874_v12 = vmul.f32 1.442695, %v6115_v14  ;;  %v6125_v14 = vsub.f32 %v4279_v59, %v6124_v58  ;;  %v6129_v59 = vsub.f32 %v4255_v45, %v6103_v52 }
 0x387   : >> { %988 = vadd.xlane.f32.xlu1 %v3566_v6  ;;  %v1035_v31 = vpack.c.bf16 %v3566_v6, %v3564_v34  ;;  %v872_v34 = vmul.f32 1.442695, %v6119_v2 }
 0x388   : >> { %v3568_v21 = vpop.eup %3567  ;;  %3575 = vpow2.f32 %v874_v12 }
 0x389   : >> { %982 = vadd.xlane.f32.xlu0 %v3560_v22  ;;  %2858 = vmatmul.mubr.bf16.gmra.mrb[8].mxu1 %v1035_v31  ;;  %v6117_v22 = vsub.f32 %v4299_v30, %v6116_v55  ;;  %v882_v31 = vmul.f32 1.442695, %v6120_v56  ;;  %v6121_v30 = vsub.f32 %v4271_v43, %v6096_v13  ;;  %v880_v43 = vmul.f32 1.442695, %v6125_v14 }
 0x38a   : >> { %v3570_v35 = vpop.eup %3569  ;;  %v6137_v14 = vsub.f32 %v4251_v44, %v6106_v28  ;;  %v6140_v44 = vsub.f32 %v4243_v62, %v6110_v1 }
 0x38b   : >> { %984 = vadd.xlane.f32.xlu1 %v3562_v17  ;;  %v1036_v19 = vpack.c.bf16 %v3570_v35, %v3568_v21  ;;  %v870_v54 = vmul.f32 1.442695, %v6117_v22  ;;  %v876_v17 = vmul.f32 1.442695, %v6118_v33 }
 0x38c   : >> { %v3572_v9 = vpop.eup %3571 }
 0x38d   : >> { %990 = vadd.xlane.f32.xlu0 %v3568_v21  ;;  %2861 = vmatprep.mubr.bf16.mxu1 %v1036_v19  ;;  %3577 = vpow2.f32 %v870_v54  ;;  %v884_v21 = vmul.f32 1.442695, %v6121_v30 }
 0x38e   : >> { %v3574_v5 = vpop.eup %3573  ;;  %3579 = vpow2.f32 %v876_v17  ;;  %v890_v17 = vmul.f32 1.442695, %v6126_v36 }
 0x38f   : >> { %992 = vadd.xlane.f32.xlu1 %v3570_v35  ;;  %v1037_v53 = vpack.c.bf16 %v3574_v5, %v3572_v9  ;;  %3581 = vpow2.f32 %v872_v34  ;;  %v892_v34 = vmul.f32 1.442695, %v6129_v59 }
 0x390   : >> { %3583 = vpow2.f32 %v882_v31  ;;  %v6130_v31 = vld [vmem:[#allocation111_spill] sm:$0xff] }
 0x391   : >> { %994 = vadd.xlane.f32.xlu0 %v3572_v9  ;;  %2862 = vmatmul.mubr.bf16.gmra.mrb[12].mxu1 %v1037_v53  ;;  %v878_v9 = vmul.f32 1.442695, %v6122_v57  ;;  %3585 = vpow2.f32 %v884_v21  ;;  %v6131_v30 = vmov %v6130_v31  ;;  %v6132_v21 = vsub.f32 %v4267_v42, %v6130_v31 }
 0x392   : >> { %v5133_v6 = vpop.eup %3575 }
 0x393   : >> { %996 = vadd.xlane.f32.xlu1 %v3574_v5  ;;  %v952_v37 = vmul.f32 %v4227_v41, %v5133_v6  ;;  %3587 = vpow2.f32 %v878_v9 }
 0x394   : >> { %3589 = vpow2.f32 %v880_v43  ;;  %v894_v43 = vmul.f32 1.442695, %v6137_v14 }
 0x395   : >> { %3591 = vpow2.f32 %v890_v17 }
 0x396   : >> { %3593 = vpow2.f32 %v892_v34 }
 0x397   : >> { %v5141_v35 = vpop.eup %3577 }
 0x398   : >> { %v5145_v19 = vpop.eup %3579  ;;  %v950_v22 = vmul.f32 %v4235_v46, %v5141_v35 }
 0x399   : >> { %v953_v54 = vmul.f32 %v4223_v49, %v5145_v19  ;;  %v5159_v33 = vpop.eup %3581 }
 0x39a   : >> { %v951_v56 = vmul.f32 %v4231_v38, %v5159_v33  ;;  %v5178_v57 = vpop.eup %3583 }
 0x39b   : >> { %v5183_v45 = vpop.eup %3585  ;;  %v956_v42 = vmul.f32 %v4211_v32, %v5178_v57 }
 0x39c   : >> { %v957_v36 = vmul.f32 %v4207_v51, %v5183_v45 }
 0x3fd   : >> { %v971_v5 = vpop.xlane.xlu0 %970 }
 0x3fe   : >> { %v5150_v41 = vadd.f32 %v971_v5, %v952_v37   ;;  %v886_v37 = vmul.f32 1.442695, %v6132_v21 }
 0x400   : >> { %6123 = vst [vmem:[#allocation119_spill] sm:$0xff] %v5150_v41  ;;  %3595 = vpow2.f32 %v886_v37 }
 0x401   : >> { %v967_v2 = vpop.xlane.xlu0 %966  ;;  %v973_v41 = vpop.xlane.xlu1 %972 }
 0x402   : >> { %v5164_v46 = vadd.f32 %v967_v2, %v950_v22   ;;  %v5166_v49 = vadd.f32 %v973_v41, %v953_v54   ;;  %v5190_v22 = vpop.eup %3587  ;;  %v898_v2 = vmul.f32 1.442695, %v6140_v44 }
 0x403   : >> { %v5199_v17 = vpop.eup %3589 }
 0x404   : >> { %6127 = vst [vmem:[#allocation120_spill] sm:$0xff] %v5164_v46  ;;  %6128 = vst [vmem:[#allocation121_spill] sm:$0xff] %v5166_v49  ;;  %v6134_v46 = vld [vmem:[#allocation112_spill] sm:$0xff]  ;;  %v5208_v59 = vpop.eup %3591  ;;  %v955_v62 = vmul.f32 %v4215_v26, %v5199_v17 }
 0x405   : >> { %v969_v60 = vpop.xlane.xlu1 %968  ;;  %v6135_v58 = vmov %v6134_v46  ;;  %v6136_v49 = vsub.f32 %v4263_v61, %v6134_v46  ;;  %v5217_v31 = vpop.eup %3593  ;;  %v960_v21 = vmul.f32 %v4195_v20, %v5208_v59 }
 0x406   : >> { %v5176_v38 = vadd.f32 %v969_v60, %v951_v56  }
 0x407   : >> { %v888_v9 = vmul.f32 1.442695, %v6136_v49 }
 0x408   : >> { %6133 = vst [vmem:[#allocation122_spill] sm:$0xff] %v5176_v38  ;;  %v6138_v38 = vsub.f32 %v4247_v63, %v6108_v24  ;;  %v954_v63 = vmul.f32 %v4219_v48, %v5190_v22 }
 0x409   : >> { %3597 = vpow2.f32 %v888_v9 }
 0x40a   : >> { %v896_v54 = vmul.f32 1.442695, %v6138_v38  ;;  %v979_v61 = vpop.xlane.xlu0 %978  ;;  %3599 = vpow2.f32 %v894_v43  ;;  %v3596_v37 = vpop.eup %3595 }
 0x40b   : >> { %v5195_v32 = vadd.f32 %v979_v61, %v956_v42   ;;  %v958_v49 = vmul.f32 %v4203_v50, %v3596_v37 }
 0x40c   : >> { %v981_v41 = vpop.xlane.xlu1 %980  ;;  %3601 = vpow2.f32 %v896_v54 }
 0x40d   : >> { %6139 = vst [vmem:[#allocation123_spill] sm:$0xff] %v5195_v32  ;;  %v5204_v51 = vadd.f32 %v981_v41, %v957_v36   ;;  %v6142_v32 = vsub.f32 %v4239_v47, %v6113_v16  ;;  %3603 = vpow2.f32 %v898_v2  ;;  %v961_v47 = vmul.f32 %v4191_v23, %v5217_v31 }
 0x40e   : >> { %v975_v56 = vpop.xlane.xlu0 %974 }
 0x40f   : >> { %6141 = vst [vmem:[#allocation124_spill] sm:$0xff] %v5204_v51  ;;  %v900_v34 = vmul.f32 1.442695, %v6142_v32  ;;  %v5213_v48 = vadd.f32 %v975_v56, %v954_v63   ;;  %v1016_v63 = vmul.f32 %v4163_v8, %v5133_v6  ;;  %v1014_v32 = vmul.f32 %v4171_v18, %v5141_v35 }
 0x410   : >> { %v977_v51 = vpop.xlane.xlu1 %976 }
 0x411   : >> { %6143 = vst [vmem:[#allocation125_spill] sm:$0xff] %v5213_v48  ;;  %v5219_v26 = vadd.f32 %v977_v51, %v955_v62   ;;  %3605 = vpow2.f32 %v900_v34  ;;  %v6154_v34 = vld [vmem:[#allocation97_spill] sm:$0xff]  ;;  %v6156_v62 = vld [vmem:[#allocation98_spill] sm:$0xff] }
 0x412   : >> { %v987_v60 = vpop.xlane.xlu0 %986  ;;  %v1017_v56 = vmul.f32 %v6154_v34, %v5145_v19  ;;  %v1015_v51 = vmul.f32 %v6156_v62, %v5159_v33 }
 0x413   : >> { %6144 = vst [vmem:[#allocation126_spill] sm:$0xff] %v5219_v26  ;;  %v5223_v20 = vadd.f32 %v987_v60, %v960_v21   ;;  %v3598_v48 = vpop.eup %3597  ;;  %v6159_v21 = vld [vmem:[#allocation96_spill] sm:$0xff] }
 0x414   : >> { %v989_v46 = vpop.xlane.xlu1 %988  ;;  %v3600_v9 = vpop.eup %3599  ;;  %v959_v26 = vmul.f32 %v4199_v0, %v3598_v48  ;;  %v1020_v35 = vmul.f32 %v6159_v21, %v5178_v57  ;;  %v6185_v21 = vld [vmem:[#allocation91_spill] sm:$0xff] }
 0x415   : >> { %6145 = vst [vmem:[#allocation127_spill] sm:$0xff] %v5223_v20  ;;  %v5227_v23 = vadd.f32 %v989_v46, %v961_v47   ;;  %v962_v20 = vmul.f32 %v4187_v4, %v3600_v9 }
 0x416   : >> { %v983_v14 = vpop.xlane.xlu0 %982  ;;  %v3602_v43 = vpop.eup %3601 }
 0x417   : >> { %6146 = vst [vmem:[#allocation128_spill] sm:$0xff] %v5227_v23  ;;  %v5230_v50 = vadd.f32 %v983_v14, %v958_v49   ;;  %v3604_v38 = vpop.eup %3603  ;;  %v963_v23 = vmul.f32 %v4183_v3, %v3602_v43 }
 0x418   : >> { %v985_v42 = vpop.xlane.xlu1 %984 }
 0x419   : >> { %6147 = vst [vmem:[#allocation129_spill] sm:$0xff] %v5230_v50  ;;  %v5233_v0 = vadd.f32 %v985_v42, %v959_v26   ;;  %v964_v50 = vmul.f32 %v4179_v11, %v3604_v38 }
 0x41a   : >> { %v991_v61 = vpop.xlane.xlu0 %990 }
 0x41b   : >> { %6148 = vst [vmem:[#allocation130_spill] sm:$0xff] %v5233_v0  ;;  %v5236_v4 = vadd.f32 %v991_v61, %v962_v20   ;;  %v3606_v36 = vpop.eup %3605  ;;  %v6167_v61 = vld [vmem:[#allocation93_spill] sm:$0xff] }
 0x41c   : >> { %v993_v44 = vpop.xlane.xlu1 %992  ;;  %v965_v41 = vmul.f32 %v4175_v10, %v3606_v36 }
 0x41d   : >> { %v6149_v7 = vmov %v5236_v4  ;;  %v5239_v3 = vadd.f32 %v993_v44, %v963_v23   ;;  %v6168_v44 = vld [vmem:[#allocation86_spill] sm:$0xff] }
 0x41e   : >> { %v995_v2 = vpop.xlane.xlu0 %994 }
 0x41f   : >> { %v6150_v52 = vmov %v5239_v3  ;;  %v5242_v11 = vadd.f32 %v995_v2, %v964_v50   ;;  %v1022_v50 = vmul.f32 %v6168_v44, %v3596_v37  ;;  %v6179_v37 = vld [vmem:[#allocation85_spill] sm:$0xff] }
 0x420   : >> { %v997_v0 = vpop.xlane.xlu1 %996  ;;  %v1026_v62 = vmul.f32 %v6179_v37, %v3600_v9  ;;  %v6232_v44 = vld [vmem:[#allocation115_spill] sm:$0xff]  ;;  %v6241_v37 = vld [vmem:[#allocation105_spill] sm:$0xff] }
 0x421   : >> { %v6151_v28 = vmov %v5242_v11  ;;  %v5245_v10 = vadd.f32 %v997_v0, %v965_v41  }
 0x423   : >> { %v6152_v24 = vmov %v5245_v10 }
 0x44b   : >> { %v2851_v4 = vpop.f32.mrb[0].mxu1 }
 0x44c   : >> { %v5251_v8 = vadd.f32 %v2851_v4, %v1016_v63   ;;  %v1072_v3 = vpop.f32.mrb[1].mxu1  ;;  %v6173_v63 = vld [vmem:[#allocation94_spill] sm:$0xff] }
 0x44d   : >> { %v5255_v18 = vadd.f32 %v1072_v3, %v1014_v32   ;;  %v2852_v11 = vpop.f32.mrb[2].mxu1  ;;  %v1023_v4 = vmul.f32 %v6173_v63, %v3598_v48  ;;  %v1027_v48 = vmul.f32 %v6185_v21, %v3602_v43  ;;  %v6231_v63 = vld [vmem:[#allocation116_spill] sm:$0xff]  ;;  %v6237_v43 = vld [vmem:[#allocation110_spill] sm:$0xff] }
 0x44e   : >> { %v6153_v1 = vmov %v5251_v8  ;;  %v5259_v14 = vadd.f32 %v2852_v11, %v1017_v56   ;;  %v1075_v10 = vpop.f32.mrb[3].mxu1  ;;  %v6160_v8 = vld [vmem:[#allocation88_spill] sm:$0xff]  ;;  %v6249_v43 = vld [vmem:[#allocation81_spill] sm:$0xff] (%p5308_p4) }
 0x44f   : >> { %v6155_v16 = vmov %v5255_v18  ;;  %v5261_v6 = vadd.f32 %v1075_v10, %v1015_v51   ;;  %v1018_v47 = vmul.f32 %v6160_v8, %v5190_v22  ;;  %v6162_v18 = vld [vmem:[#allocation95_spill] sm:$0xff]  ;;  %v1024_v22 = vmul.f32 %v6167_v61, %v5208_v59  ;;  %v6178_v59 = vld [vmem:[#allocation90_spill] sm:$0xff]  ;;  %v6182_v51 = vld [vmem:[#allocation89_spill] sm:$0xff] }
 0x450   : >> { %v6157_v5 = vmov %v5259_v14  ;;  %v1021_v46 = vmul.f32 %v6162_v18, %v5183_v45  ;;  %v6164_v14 = vld [vmem:[#allocation87_spill] sm:$0xff]  ;;  %v1028_v56 = vmul.f32 %v6178_v59, %v3604_v38  ;;  %v6210_v8 = vmov %v6153_v1  ;;  %v6227_v38 = vld [vmem:[#allocation122_spill] sm:$0xff]  ;;  %v6239_v59 = vld [vmem:[#allocation108_spill] sm:$0xff] }
 0x451   : >> { %v6158_v55 = vmov %v5261_v6  ;;  %v1019_v26 = vmul.f32 %v6164_v14, %v5199_v17  ;;  %v6209_v14 = vmov %v6157_v5  ;;  %v6212_v18 = vmov %v6155_v16  ;;  %v6250_v38 = vld [vmem:[#allocation80_spill] sm:$0xff] (%p5308_p4)  ;;  %v6253_v8 = vld [vmem:[#allocation82_spill] sm:$0xff] (%p5308_p4) }
 0x452   : >> { %v6235_v61 = vmov %v6135_v58  ;;  %v6238_v58 = vld [vmem:[#allocation109_spill] sm:$0xff]  ;;  %v1313_v18 = vlaneseq (%p5308_p4) }
 0x453   : > { %v3612_v58 = vld [vmem:[#allocation2 + $0xa8] sm:$0xff] (%p5308_p4)  }
 0x454   : >> { %v2855_v60 = vpop.f32.mrb[4].mxu1 }
 0x455   : >> { %v5267_v2 = vadd.f32 %v2855_v60, %v1020_v35   ;;  %v1088_v19 = vpop.f32.mrb[5].mxu1 }
 0x456   : >> { %v5271_v49 = vadd.f32 %v1088_v19, %v1018_v47   ;;  %v2856_v33 = vpop.f32.mrb[6].mxu1  ;;  %v6229_v47 = vld [vmem:[#allocation118_spill] sm:$0xff] }
 0x457   : >> { %v6161_v53 = vmov %v5267_v2  ;;  %v5275_v42 = vadd.f32 %v2856_v33, %v1021_v46   ;;  %v1091_v20 = vpop.f32.mrb[7].mxu1  ;;  %v6170_v2 = vld [vmem:[#allocation92_spill] sm:$0xff]  ;;  %v6228_v46 = vld [vmem:[#allocation120_spill] sm:$0xff] }
 0x458   : >> { %v6163_v15 = vmov %v5271_v49  ;;  %v5277_v57 = vadd.f32 %v1091_v20, %v1019_v26   ;;  %v1025_v41 = vmul.f32 %v6170_v2, %v5217_v31  ;;  %v1029_v31 = vmul.f32 %v6182_v51, %v3606_v36  ;;  %v6218_v20 = vld [vmem:[#allocation127_spill] sm:$0xff]  ;;  %v6221_v51 = vld [vmem:[#allocation124_spill] sm:$0xff]  ;;  %v6223_v26 = vld [vmem:[#allocation126_spill] sm:$0xff] }
 0x459   : >> { %v6165_v25 = vmov %v5275_v42  ;;  %v6206_v2 = vmov %v6161_v53  ;;  %6208 = vst [vmem:[#allocation88_spill] sm:$0xff] %v6163_v15  ;;  %v6225_v49 = vld [vmem:[#allocation121_spill] sm:$0xff]  ;;  %v6236_v42 = vmov %v6131_v30  ;;  %v6240_v36 = vld [vmem:[#allocation107_spill] sm:$0xff]  ;;  %v6244_v30 = vld [vmem:[#allocation104_spill] sm:$0xff]  ;;  %v1314_v46 = vand.u32 (%p5308_p4), 127, %v1313_v18 }
 0x45a   : >> { %v6166_v40 = vmov %v5277_v57  ;;  %v6243_v57 = vld [vmem:[#allocation106_spill] sm:$0xff]  ;;  %v3611_v30 = vld [vmem:[#allocation2 + $0xa0] sm:$0xff] (%p5308_p4)   ;;  %v6254_v47 = vld [vmem:[#allocation18_spill] sm:$0xff] (%p5308_p4) }
 0x45b   : >> { %6207 = vst [vmem:[#allocation87_spill] sm:$0xff] %v6166_v40  ;;  %v6252_v36 = vld [vmem:[#allocation84_spill] sm:$0xff] (%p5308_p4)  ;;  %v1316_v49 = vadd.s32 (%p5308_p4), 256, %v1314_v46 }
 0x45c   : >> { %v2859_v23 = vpop.f32.mrb[8].mxu1  ;;  %v6259_v18 = vld [vmem:[#allocation106_spill] sm:$0xff] (%p5308_p4) }
 0x45d   : >> { %v5282_v34 = vadd.f32 %v2859_v23, %v1024_v22   ;;  %v1104_v45 = vpop.f32.mrb[9].mxu1  ;;  %v6217_v23 = vld [vmem:[#allocation128_spill] sm:$0xff]  ;;  %vm1317_vm0 = vcmp.lt.s32.totalorder (%p5308_p4), %v1316_v49, 300 }
 0x45e   : >> { %v5286_v0 = vadd.f32 %v1104_v45, %v1022_v50   ;;  %v2860_v17 = vpop.f32.mrb[10].mxu1  ;;  %v6220_v50 = vld [vmem:[#allocation129_spill] sm:$0xff]  ;;  %v6233_v45 = vld [vmem:[#allocation114_spill] sm:$0xff] }
 0x45f   : >> { %v6169_v35 = vmov %v5282_v34  ;;  %v5289_v33 = vadd.f32 %v2860_v17, %v1025_v41   ;;  %v1107_v32 = vpop.f32.mrb[11].mxu1  ;;  %v6211_v17 = vmov %v6158_v55  ;;  %v6226_v41 = vld [vmem:[#allocation119_spill] sm:$0xff] }
 0x460   : >> { %6171 = vst [vmem:[#allocation131_spill] sm:$0xff] %v5286_v0  ;;  %v5291_v3 = vadd.f32 %v1107_v32, %v1023_v4   ;;  %v6203_v39 = vmov %v5286_v0  ;;  %v6216_v4 = vmov %v6149_v7  ;;  %v6219_v0 = vld [vmem:[#allocation130_spill] sm:$0xff]  ;;  %v6222_v32 = vld [vmem:[#allocation123_spill] sm:$0xff] }
 0x461   : >> { %6174 = vst [vmem:[#allocation132_spill] sm:$0xff] %v5289_v33  ;;  %v6175_v27 = vmov %v5289_v33  ;;  %6204 = vst [vmem:[#allocation86_spill] sm:$0xff] %v6203_v39 }
 0x462   : >> { %6176 = vst [vmem:[#allocation133_spill] sm:$0xff] %v5291_v3  ;;  %v6199_v33 = vmov %v6175_v27  ;;  %v6201_v29 = vmov %v5291_v3  ;;  %v6215_v3 = vmov %v6150_v52  ;;  %v6277_v27 = vld [vmem:[#allocation47_spill] sm:$0xff] (%p5308_p4) }
 0x463   : >> { %v6202_v9 = vmov %v6201_v29  ;;  %v3610_v29 = vld [vmem:[#allocation2 + $0x98] sm:$0xff] (%p5308_p4)  }
 0x464   : >> { %v2863_v11 = vpop.f32.mrb[12].mxu1  ;;  %v6248_v9 = vld [vmem:[#allocation83_spill] sm:$0xff] (%p5308_p4) }
 0x465   : >> { %v5295_v19 = vadd.f32 %v2863_v11, %v1028_v56   ;;  %v1120_v34 = vpop.f32.mrb[13].mxu1  ;;  %v6214_v11 = vmov %v6151_v28  ;;  %v6242_v56 = vld [vmem:[#allocation103_spill] sm:$0xff]  ;;  %590 = sbr.rel (!%p5308_p4) target bundleno = 439 (0x1b7), region = 104 }
 0x466   : >> { %v5298_v10 = vadd.f32 %v1120_v34, %v1026_v62   ;;  %v2864_v6 = vpop.f32.mrb[14].mxu1  ;;  %v6200_v34 = vmov %v6169_v35  ;;  %v6230_v62 = vld [vmem:[#allocation117_spill] sm:$0xff] }
 0x467   : >> { %6180 = vst [vmem:[#allocation134_spill] sm:$0xff] %v5295_v19  ;;  %v5301_v21 = vadd.f32 %v2864_v6, %v1029_v31   ;;  %v1123_v60 = vpop.f32.mrb[15].mxu1  ;;  %v6193_v22 = vmov %v5295_v19  ;;  %v6205_v31 = vmov %v6165_v25 }
 0x468   : >> { %6183 = vst [vmem:[#allocation135_spill] sm:$0xff] %v5298_v10  ;;  %v5303_v6 = vadd.f32 %v1123_v60, %v1027_v48   ;;  %v6194_v19 = vmov %v6193_v22  ;;  %v6197_v13 = vmov %v5298_v10  ;;  %v6213_v10 = vmov %v6152_v24  ;;  %v6224_v48 = vld [vmem:[#allocation125_spill] sm:$0xff] }
 0x469   : >> { %6186 = vst [vmem:[#allocation136_spill] sm:$0xff] %v5301_v21  ;;  %v6191_v54 = vmov %v5301_v21  ;;  %6198 = vst [vmem:[#allocation85_spill] sm:$0xff] %v6197_v13  ;;  %v6234_v60 = vld [vmem:[#allocation113_spill] sm:$0xff]  ;;  %v3608_v13 = vld [vmem:[#allocation2 + $0x88] sm:$0xff] (%p5308_p4)   ;;  %v6255_v19 = vunpack.c.l.s8.bf16 (%p5308_p4), %v6254_v47 }
 0x46a   : >> { %6188 = vst [vmem:[#allocation137_spill] sm:$0xff] %v5303_v6  ;;  %v6192_v21 = vmov %v6191_v54  ;;  %v6195_v12 = vmov %v5303_v6  ;;  %v6246_v54 = vld [vmem:[#allocation79_spill] sm:$0xff] (%p5308_p4) }
 0x46b   : >> { %v6196_v6 = vmov %v6195_v12  ;;  %v3607_v12 = vld [vmem:[#allocation2 + $0x80] sm:$0xff] (%p5308_p4)   ;;  %2881 = vmatprep.mubr.bf16.mxu0 (%p5308_p4), %v6246_v54  ;;  %v3609_v22 = vld [vmem:[#allocation2 + $0x90] sm:$0xff] (%p5308_p4)  }
 0x46c   : > { %2865 = vmatprep.subr.bf16.mxu0 %v3607_v12  ;;  %2897 = vmatprep.subr.bf16.mxu1 %v3607_v12  ;;  %v3613_v54 = vld [vmem:[#allocation2 + $0xb0] sm:$0xff]  }
 0x46d   : > { %2866 = vmatpush3.bf16.xpose.msra.mxu0 %v3607_v12  ;;  %2898 = vmatpush3.bf16.msra.mxu1 %v3607_v12  ;;  %v3614_v12 = vld [vmem:[#allocation2 + $0xb8] sm:$0xff]  }
 0x46e   : > { %2867 = vmatprep.subr.bf16.mxu0 %v3608_v13  ;;  %2899 = vmatprep.subr.bf16.mxu1 %v3608_v13 }
 0x471   : > { %2900 = vmatpush3.bf16.msra.mxu1 %v3608_v13 }
 0x472   : > { %2901 = vmatprep.subr.bf16.mxu1 %v3609_v22 }
 0x475   : > { %2868 = vmatpush3.bf16.xpose.msra.mxu0 %v3608_v13  ;;  %2902 = vmatpush3.bf16.msra.mxu1 %v3609_v22  ;;  %v6247_v13 = vld [vmem:[#allocation77_spill] sm:$0xff] }
 0x476   : > { %2869 = vmatprep.subr.bf16.mxu0 %v3609_v22  ;;  %2903 = vmatprep.subr.bf16.mxu1 %v3610_v29 }
 0x479   : > { %2904 = vmatpush3.bf16.msra.mxu1 %v3610_v29 }
 0x47a   : > { %2905 = vmatprep.subr.bf16.mxu1 %v3611_v30 }
 0x47d   : > { %2870 = vmatpush3.bf16.xpose.msra.mxu0 %v3609_v22  ;;  %2906 = vmatpush3.bf16.msra.mxu1 %v3611_v30 }
 0x47e   : > { %2871 = vmatprep.subr.bf16.mxu0 %v3610_v29  ;;  %2907 = vmatprep.subr.bf16.mxu1 %v3612_v58 }
 0x481   : > { %2908 = vmatpush3.bf16.msra.mxu1 %v3612_v58 }
 0x482   : > { %2909 = vmatprep.subr.bf16.mxu1 %v3613_v54 }
 0x485   : > { %2872 = vmatpush3.bf16.xpose.msra.mxu0 %v3610_v29  ;;  %2910 = vmatpush3.bf16.msra.mxu1 %v3613_v54  ;;  %v6251_v29 = vld [vmem:[#allocation78_spill] sm:$0xff] }
 0x486   : > { %2873 = vmatprep.subr.bf16.mxu0 %v3611_v30  ;;  %2911 = vmatprep.subr.bf16.mxu1 %v3614_v12 }
 0x489   : > { %2912 = vmatpush3.bf16.msra.mxu1 %v3614_v12 }
 0x48d   : > { %2874 = vmatpush3.bf16.xpose.msra.mxu0 %v3611_v30  ;;  %v6256_v30 = vld [vmem:[#allocation103_spill] sm:$0xff] }
 0x48e   : > { %2875 = vmatprep.subr.bf16.mxu0 %v3612_v58 }
 0x495   : > { %2876 = vmatpush3.bf16.xpose.msra.mxu0 %v3612_v58 }
 0x496   : > { %2877 = vmatprep.subr.bf16.mxu0 %v3613_v54 }
 0x49d   : > { %2878 = vmatpush3.bf16.xpose.msra.mxu0 %v3613_v54 }
 0x49e   : > { %2879 = vmatprep.subr.bf16.mxu0 %v3614_v12 }
 0x4a5   : > { %2880 = vmatpush3.bf16.xpose.msra.mxu0 %v3614_v12  ;;  %v6257_v12 = vld [vmem:[#allocation104_spill] sm:$0xff] }
 0x4ac   : > { %2882 = vmatmul.mubr.bf16.vlgmr.msra.gmra.mrb[0].mxu0 %v6247_v13 }
 0x4ad   : > { %2885 = vmatprep.mubr.bf16.mxu0 %v6248_v9 }
 0x4b4   : > { %2886 = vmatmul.mubr.bf16.gmra.mrb[4].mxu0 %v6249_v43 }
 0x4b5   : > { %2889 = vmatprep.mubr.bf16.mxu0 %v6250_v38 }
 0x4bc   : > { %2890 = vmatmul.mubr.bf16.gmra.mrb[8].mxu0 %v6251_v29  ;;  %v6258_v29 = vld [vmem:[#allocation105_spill] sm:$0xff] }
 0x4bd   : > { %2893 = vmatprep.mubr.bf16.mxu0 %v6252_v36 }
 0x4c4   : > { %2894 = vmatmul.mubr.bf16.gmra.mrb[12].mxu0 %v6253_v8 }
 0x4c5   : > { %2056 = vmatprep.mubr.bf16.mxu0 %v6255_v19 }
 0x57f   : > { %v2883_v33 = vpop.f32.mrb[0].mxu0 }
 0x580   : > { %v1250_v14 = vpop.f32.mrb[1].mxu0  ;;  %v1320_v26 = vsel %vm1317_vm0, %v2883_v33, -1e+30 }
 0x581   : > { %1338 = vmax.xlane.f32.xlu1 %v1320_v26  ;;  %v2884_v42 = vpop.f32.mrb[2].mxu0  ;;  %v1318_v20 = vsel %vm1317_vm0, %v1250_v14, -1e+30 }
 0x582   : > { %1334 = vmax.xlane.f32.xlu0 %v1318_v20  ;;  %v1253_v57 = vpop.f32.mrb[3].mxu0  ;;  %v1321_v61 = vsel %vm1317_vm0, %v2884_v42, -1e+30 }
 0x583   : > { %v1319_v23 = vsel %vm1317_vm0, %v1253_v57, -1e+30 }
 0x585   : > { %1340 = vmax.xlane.f32.xlu1 %v1321_v61 }
 0x586   : > { %1336 = vmax.xlane.f32.xlu0 %v1319_v23 }
 0x587   : > { %v2887_v44 = vpop.f32.mrb[4].mxu0 }
 0x588   : > { %v1266_v50 = vpop.f32.mrb[5].mxu0  ;;  %v5479_v17 = vsel %vm1317_vm0, %v2887_v44, -1e+30  ;;  %v6260_v44 = vld [vmem:[#allocation107_spill] sm:$0xff] }
 0x589   : > { %v2888_v45 = vpop.f32.mrb[6].mxu0  ;;  %v1322_v2 = vsel %vm1317_vm0, %v1266_v50, -1e+30 }
 0x58a   : > { %1342 = vmax.xlane.f32.xlu0 %v1322_v2  ;;  %v1269_v41 = vpop.f32.mrb[7].mxu0  ;;  %v5483_v4 = vsel %vm1317_vm0, %v2888_v45, -1e+30 }
 0x58b   : > { %v1323_v0 = vsel %vm1317_vm0, %v1269_v41, -1e+30  ;;  %v6261_v41 = vld [vmem:[#allocation108_spill] sm:$0xff] }
 0x58c   : > { %1344 = vmax.xlane.f32.xlu1 %v1323_v0 }
 0x58e   : > { %1346 = vmax.xlane.f32.xlu0 %v5479_v17 }
 0x58f   : > { %v2891_v63 = vpop.f32.mrb[8].mxu0 }
 0x590   : > { %1348 = vmax.xlane.f32.xlu1 %v5483_v4  ;;  %v1282_v32 = vpop.f32.mrb[9].mxu0  ;;  %v5495_v37 = vsel %vm1317_vm0, %v2891_v63, -1e+30 }
 0x591   : > { %v2892_v3 = vpop.f32.mrb[10].mxu0  ;;  %v5487_v59 = vsel %vm1317_vm0, %v1282_v32, -1e+30 }
 0x592   : > { %1350 = vmax.xlane.f32.xlu0 %v5487_v59  ;;  %v1285_v56 = vpop.f32.mrb[11].mxu0  ;;  %v5499_v22 = vsel %vm1317_vm0, %v2892_v3, -1e+30  ;;  %v6262_v3 = vld [vmem:[#allocation109_spill] sm:$0xff] }
 0x593   : > { %v5491_v11 = vsel %vm1317_vm0, %v1285_v56, -1e+30 }
 0x594   : > { %1352 = vmax.xlane.f32.xlu1 %v5491_v11 }
 0x596   : > { %1354 = vmax.xlane.f32.xlu0 %v5495_v37 }
 0x597   : > { %v2895_v62 = vpop.f32.mrb[12].mxu0 }
 0x598   : > { %1356 = vmax.xlane.f32.xlu1 %v5499_v22  ;;  %v1298_v34 = vpop.f32.mrb[13].mxu0  ;;  %v5511_v21 = vsel %vm1317_vm0, %v2895_v62, -1e+30 }
 0x599   : > { %v2896_v51 = vpop.f32.mrb[14].mxu0  ;;  %v5503_v31 = vsel %vm1317_vm0, %v1298_v34, -1e+30  ;;  %v6263_v34 = vld [vmem:[#allocation110_spill] sm:$0xff] }
 0x59a   : > { %1358 = vmax.xlane.f32.xlu0 %v5503_v31  ;;  %v1301_v10 = vpop.f32.mrb[15].mxu0  ;;  %v5515_v48 = vsel %vm1317_vm0, %v2896_v51, -1e+30 }
 0x59b   : > { %v5507_v6 = vsel %vm1317_vm0, %v1301_v10, -1e+30 }
 0x59c   : > { %1360 = vmax.xlane.f32.xlu1 %v5507_v6 }
 0x59e   : > { %1362 = vmax.xlane.f32.xlu0 %v5511_v21 }
 0x5a0   : > { %1364 = vmax.xlane.f32.xlu1 %v5515_v48 }
 0x60e   : > { %v1339_v60 = vpop.xlane.xlu1 %1338 }
 0x60f   : > { %v5519_v58 = vmax.f32 %v6256_v30, %v1339_v60  ;;  %v1335_v54 = vpop.xlane.xlu0 %1334 }
 0x610   : > { %v5522_v13 = vmax.f32 %v6257_v12, %v1335_v54 }
 0x611   : > { %v1432_v9 = vsub.f32 %v1320_v26, %v5519_v58 }
 0x612   : > { %v1430_v43 = vsub.f32 %v1318_v20, %v5522_v13  ;;  %v1341_v38 = vpop.xlane.xlu1 %1340 }
 0x613   : > { %v5527_v36 = vmax.f32 %v6258_v29, %v1341_v38  ;;  %v1337_v8 = vpop.xlane.xlu0 %1336  ;;  %v1450_v33 = vmul.f32 1.442695, %v1432_v9  ;;  %v6264_v9 = vld [vmem:[#allocation111_spill] sm:$0xff] }
 0x614   : > { %v1446_v19 = vmul.f32 1.442695, %v1430_v43  ;;  %v5530_v46 = vmax.f32 %v6259_v18, %v1337_v8 }
 0x615   : > { %v1433_v49 = vsub.f32 %v1321_v61, %v5527_v36 }
 0x616   : > { %v1431_v14 = vsub.f32 %v1319_v23, %v5530_v46  ;;  %3623 = vpow2.f32 %v1446_v19 }
 0x617   : > { %v1452_v42 = vmul.f32 1.442695, %v1433_v49  ;;  %v1343_v57 = vpop.xlane.xlu0 %1342  ;;  %3625 = vpow2.f32 %v1450_v33  ;;  %v6265_v33 = vld [vmem:[#allocation112_spill] sm:$0xff] }
 0x618   : > { %v1448_v26 = vmul.f32 1.442695, %v1431_v14  ;;  %v5535_v20 = vmax.f32 %v6260_v44, %v1343_v57 }
 0x619   : > { %v1345_v50 = vpop.xlane.xlu1 %1344  ;;  %3627 = vpow2.f32 %v1452_v42 }
 0x61a   : > { %v1434_v45 = vsub.f32 %v1322_v2, %v5535_v20  ;;  %v5539_v63 = vmax.f32 %v6261_v41, %v1345_v50  ;;  %3629 = vpow2.f32 %v1448_v26 }
 0x61b   : > { %v1347_v32 = vpop.xlane.xlu0 %1346 }
 0x61c   : > { %v1454_v61 = vmul.f32 1.442695, %v1434_v45  ;;  %v1435_v23 = vsub.f32 %v1323_v0, %v5539_v63  ;;  %v5543_v56 = vmax.f32 %v6262_v3, %v1347_v32 }
 0x61d   : > { %v1349_v62 = vpop.xlane.xlu1 %1348 }
 0x61e   : > { %v5546_v51 = vmax.f32 %v6263_v34, %v1349_v62  ;;  %3631 = vpow2.f32 %v1454_v61  ;;  %v1456_v10 = vmul.f32 1.442695, %v1435_v23  ;;  %v1436_v2 = vsub.f32 %v5479_v17, %v5543_v56  ;;  %v6267_v23 = vld [vmem:[#allocation114_spill] sm:$0xff] }
 0x61f   : > { %v1351_v60 = vpop.xlane.xlu0 %1350 }
 0x620   : > { %v1437_v54 = vsub.f32 %v5483_v4, %v5546_v51  ;;  %v5553_v43 = vmax.f32 %v6264_v9, %v1351_v60  ;;  %3633 = vpow2.f32 %v1456_v10  ;;  %v1458_v0 = vmul.f32 1.442695, %v1436_v2  ;;  %v3624_v8 = vpop.eup %3623  ;;  %v6266_v4 = vld [vmem:[#allocation113_spill] sm:$0xff] }
 0x621   : > { %v1353_v38 = vpop.xlane.xlu1 %1352  ;;  %1494 = vadd.xlane.f32.xlu0 %v3624_v8  ;;  %v3626_v42 = vpop.eup %3625 }
 0x622   : > { %v1460_v19 = vmul.f32 1.442695, %v1437_v54  ;;  %v1438_v49 = vsub.f32 %v5487_v59, %v5553_v43  ;;  %v5558_v14 = vmax.f32 %v6265_v33, %v1353_v38  ;;  %3635 = vpow2.f32 %v1458_v0 }
 0x623   : > { %v1355_v17 = vpop.xlane.xlu0 %1354  ;;  %v3628_v50 = vpop.eup %3627 }
 0x624   : > { %v1462_v57 = vmul.f32 1.442695, %v1438_v49  ;;  %v5561_v26 = vmax.f32 %v6266_v4, %v1355_v17  ;;  %v1439_v45 = vsub.f32 %v5491_v11, %v5558_v14  ;;  %v3630_v61 = vpop.eup %3629  ;;  %3637 = vpow2.f32 %v1460_v19  ;;  %v6268_v19 = vld [vmem:[#allocation115_spill] sm:$0xff]  ;;  %v6269_v17 = vld [vmem:[#allocation116_spill] sm:$0xff] }
 0x625   : > { %v1357_v32 = vpop.xlane.xlu1 %1356  ;;  %1498 = vadd.xlane.f32.xlu0 %v3626_v42  ;;  %1496 = vadd.xlane.f32.xlu1 %v3630_v61  ;;  %v1558_v2 = vpack.c.bf16 %v3630_v61, %v3624_v8  ;;  %v1559_v0 = vpack.c.bf16 %v3628_v50, %v3626_v42  ;;  %v6270_v61 = vld [vmem:[#allocation117_spill] sm:$0xff] }
 0x626   : > { %v1440_v59 = vsub.f32 %v5495_v37, %v5561_v26  ;;  %v5568_v62 = vmax.f32 %v6267_v23, %v1357_v32  ;;  %v1464_v10 = vmul.f32 1.442695, %v1439_v45  ;;  %3639 = vpow2.f32 %v1462_v57 }
 0x627   : > { %v1359_v60 = vpop.xlane.xlu0 %1358  ;;  %2913 = vmatprep.mubr.bf16.mxu1 %v1558_v2 }
 0x628   : > { %v1466_v54 = vmul.f32 1.442695, %v1440_v59  ;;  %v3632_v38 = vpop.eup %3631  ;;  %v1441_v11 = vsub.f32 %v5499_v22, %v5568_v62  ;;  %v5573_v49 = vmax.f32 %v6268_v19, %v1359_v60  ;;  %3641 = vpow2.f32 %v1464_v10  ;;  %2914 = vmatmul.mubr.bf16.vlgmr.msra.gmra.mrb[0].mxu1 %v1559_v0 }
 0x629   : > { %v1361_v37 = vpop.xlane.xlu1 %1360  ;;  %1502 = vadd.xlane.f32.xlu0 %v3632_v38  ;;  %1500 = vadd.xlane.f32.xlu1 %v3628_v50 }
 0x62a   : > { %v5576_v45 = vmax.f32 %v6269_v17, %v1361_v37  ;;  %v3634_v32 = vpop.eup %3633  ;;  %v1468_v8 = vmul.f32 1.442695, %v1441_v11  ;;  %v1442_v57 = vsub.f32 %v5503_v31, %v5573_v49  ;;  %3643 = vpow2.f32 %v1466_v54  ;;  %v6271_v31 = vld [vmem:[#allocation118_spill] sm:$0xff] }
 0x62b   : > { %v1363_v42 = vpop.xlane.xlu0 %1362  ;;  %v1560_v2 = vpack.c.bf16 %v3634_v32, %v3632_v38 }
 0x62c   : > { %v1443_v22 = vsub.f32 %v5507_v6, %v5576_v45  ;;  %v5583_v59 = vmax.f32 %v6270_v61, %v1363_v42  ;;  %v1470_v10 = vmul.f32 1.442695, %v1442_v57  ;;  %v3636_v0 = vpop.eup %3635  ;;  %3645 = vpow2.f32 %v1468_v8 }
 0x62d   : > { %v1365_v60 = vpop.xlane.xlu1 %1364  ;;  %2917 = vmatprep.mubr.bf16.mxu1 %v1560_v2  ;;  %1506 = vadd.xlane.f32.xlu0 %v3636_v0 }
 0x62e   : > { %v1472_v37 = vmul.f32 1.442695, %v1443_v22  ;;  %v1444_v11 = vsub.f32 %v5511_v21, %v5583_v59  ;;  %v5588_v50 = vmax.f32 %v6271_v31, %v1365_v60  ;;  %v3638_v54 = vpop.eup %3637  ;;  %3647 = vpow2.f32 %v1470_v10  ;;  %1504 = vadd.xlane.f32.xlu1 %v3634_v32 }
 0x62f   : > { %v1561_v42 = vpack.c.bf16 %v3638_v54, %v3636_v0 }
 0x630   : > { %v1474_v6 = vmul.f32 1.442695, %v1444_v11  ;;  %v1445_v57 = vsub.f32 %v5515_v48, %v5588_v50  ;;  %v3640_v38 = vpop.eup %3639  ;;  %3649 = vpow2.f32 %v1472_v37 }
 0x631   : > { %1510 = vadd.xlane.f32.xlu0 %v3640_v38  ;;  %2918 = vmatmul.mubr.bf16.gmra.mrb[4].mxu1 %v1561_v42  ;;  %v6274_v42 = vld [vmem:[#allocation30_spill] sm:$0xff] }
 0x632   : > { %v1476_v8 = vmul.f32 1.442695, %v1445_v57  ;;  %v3642_v22 = vpop.eup %3641  ;;  %3651 = vpow2.f32 %v1474_v6  ;;  %1508 = vadd.xlane.f32.xlu1 %v3638_v54  ;;  %v6272_v6 = vld [vmem:[#allocation46_spill] sm:$0xff]  ;;  %v6273_v57 = vld [vmem:[#allocation45_spill] sm:$0xff] }
 0x633   : > { %v1562_v21 = vpack.c.bf16 %v3642_v22, %v3640_v38  ;;  %v2571_v38 = vcombine.low %v6273_v57, %v6272_v6  ;;  %v3617_v6 = vld [vmem:[#allocation8 + $0x10] sm:$0xff]   ;;  %v6282_v57 = vld [vmem:[#allocation34_spill] sm:$0xff] }
 0x634   : > { %v3644_v2 = vpop.eup %3643  ;;  %3653 = vpow2.f32 %v1476_v8  ;;  %v6275_v8 = vld [vmem:[#allocation29_spill] sm:$0xff] }
 0x635   : > { %2921 = vmatprep.mubr.bf16.mxu1 %v1562_v21  ;;  %1514 = vadd.xlane.f32.xlu0 %v3644_v2  ;;  %v3615_v21 = vld [vmem:[#allocation8] sm:$0xff]  }
 0x636   : > { %v3646_v10 = vpop.eup %3645  ;;  %1512 = vadd.xlane.f32.xlu1 %v3642_v22  ;;  %v2563_v22 = vcombine.low %v6275_v8, %v6274_v42  ;;  %2689 = vmatprep.subr.bf16.mxu0 %v2571_v38  ;;  %v6283_v42 = vld [vmem:[#allocation33_spill] sm:$0xff]  ;;  %v6285_v38 = vld [vmem:[#allocation51_spill] sm:$0xff] }
 0x637   : > { %v1563_v32 = vpack.c.bf16 %v3646_v10, %v3644_v2  ;;  %v6276_v2 = vld [vmem:[#allocation48_spill] sm:$0xff]  ;;  %2929 = vmatprep.subr.bf16.mxu1 %v3615_v21  ;;  %v2565_v8 = vcombine.low %v6283_v42, %v6282_v57 }
 0x638   : > { %v3648_v60 = vpop.eup %3647  ;;  %2690 = vmatpush3.bf16.msra.mxu0 %v2563_v22  ;;  %2930 = vmatpush3.bf16.msra.mxu1 %v3615_v21  ;;  %v3618_v21 = vld [vmem:[#allocation8 + $0x18] sm:$0xff]  }
 0x639   : > { %1518 = vadd.xlane.f32.xlu0 %v3648_v60  ;;  %2922 = vmatmul.mubr.bf16.gmra.mrb[8].mxu1 %v1563_v32  ;;  %v2572_v32 = vcombine.low %v6277_v27, %v6276_v2  ;;  %v6284_v27 = vld [vmem:[#allocation52_spill] sm:$0xff] }
 0x63a   : > { %v3650_v48 = vpop.eup %3649  ;;  %1516 = vadd.xlane.f32.xlu1 %v3646_v10  ;;  %v3616_v10 = vld [vmem:[#allocation8 + $0x8] sm:$0xff]   ;;  %v2574_v22 = vcombine.low %v6285_v38, %v6284_v27  ;;  %v6286_v2 = vld [vmem:[#allocation36_spill] sm:$0xff]  ;;  %v6293_v27 = vld [vmem:[#allocation55_spill] sm:$0xff] }
 0x63b   : > { %v1564_v0 = vpack.c.bf16 %v3650_v48, %v3648_v60  ;;  %v6278_v60 = vld [vmem:[#allocation32_spill] sm:$0xff]  ;;  %2691 = vmatprep.subr.bf16.mxu0 %v2572_v32  ;;  %2931 = vmatprep.subr.bf16.mxu1 %v3616_v10  ;;  %v6287_v32 = vld [vmem:[#allocation35_spill] sm:$0xff] }
 0x63c   : > { %v3652_v37 = vpop.eup %3651  ;;  %2932 = vmatpush3.bf16.msra.mxu1 %v3616_v10  ;;  %v3619_v10 = vld [vmem:[#allocation8 + $0x20] sm:$0xff]   ;;  %v6292_v42 = vld [vmem:[#allocation56_spill] sm:$0xff] }
 0x63d   : > { %1522 = vadd.xlane.f32.xlu0 %v3652_v37  ;;  %2925 = vmatprep.mubr.bf16.mxu1 %v1564_v0  ;;  %v6294_v38 = vld [vmem:[#allocation40_spill] sm:$0xff] }
 0x63e   : > { %v3654_v11 = vpop.eup %3653  ;;  %1520 = vadd.xlane.f32.xlu1 %v3650_v48  ;;  %v6279_v48 = vld [vmem:[#allocation31_spill] sm:$0xff]  ;;  %2933 = vmatprep.subr.bf16.mxu1 %v3617_v6 }
 0x63f   : > { %v1565_v54 = vpack.c.bf16 %v3654_v11, %v3652_v37  ;;  %v2564_v0 = vcombine.low %v6279_v48, %v6278_v60  ;;  %v6280_v37 = vld [vmem:[#allocation50_spill] sm:$0xff]  ;;  %v2566_v60 = vcombine.low %v6287_v32, %v6286_v2 }
 0x640   : > { %2934 = vmatpush3.bf16.msra.mxu1 %v3617_v6  ;;  %v6288_v48 = vld [vmem:[#allocation54_spill] sm:$0xff] }
 0x641   : > { %2926 = vmatmul.mubr.bf16.gmra.mrb[12].mxu1 %v1565_v54  ;;  %2692 = vmatpush3.bf16.msra.mxu0 %v2564_v0  ;;  %v3620_v6 = vld [vmem:[#allocation8 + $0x28] sm:$0xff]  }
 0x642   : > { %1524 = vadd.xlane.f32.xlu1 %v3654_v11  ;;  %v6281_v11 = vld [vmem:[#allocation49_spill] sm:$0xff]  ;;  %2935 = vmatprep.subr.bf16.mxu1 %v3618_v21  ;;  %v6296_v32 = vld [vmem:[#allocation58_spill] sm:$0xff] }
 0x643   : > { %v2573_v54 = vcombine.low %v6281_v11, %v6280_v37  ;;  %v6289_v37 = vld [vmem:[#allocation53_spill] sm:$0xff]  ;;  %v6290_v11 = vld [vmem:[#allocation38_spill] sm:$0xff] }
 0x644   : > { %v2575_v0 = vcombine.low %v6289_v37, %v6288_v48  ;;  %2936 = vmatpush3.bf16.msra.mxu1 %v3618_v21  ;;  %v6297_v48 = vld [vmem:[#allocation57_spill] sm:$0xff]  ;;  %v6298_v21 = vld [vmem:[#allocation42_spill] sm:$0xff] }
 0x645   : > { %2693 = vmatprep.subr.bf16.mxu0 %v2573_v54  ;;  %v6291_v54 = vld [vmem:[#allocation37_spill] sm:$0xff]  ;;  %2937 = vmatprep.subr.bf16.mxu1 %v3619_v10 }
 0x646   : > { %2694 = vmatpush3.bf16.msra.mxu0 %v2565_v8  ;;  %v2567_v57 = vcombine.low %v6291_v54, %v6290_v11  ;;  %v2576_v8 = vcombine.low %v6293_v27, %v6292_v42  ;;  %v6299_v37 = vld [vmem:[#allocation41_spill] sm:$0xff]  ;;  %v3621_v11 = vld [vmem:[#allocation8 + $0x30] sm:$0xff]   ;;  %v6300_v54 = vld [vmem:[#allocation60_spill] sm:$0xff] }
 0x647   : > { %2695 = vmatprep.subr.bf16.mxu0 %v2574_v22  ;;  %v6295_v22 = vld [vmem:[#allocation39_spill] sm:$0xff] }
 0x648   : > { %2938 = vmatpush3.bf16.msra.mxu1 %v3619_v10  ;;  %v2568_v2 = vcombine.low %v6295_v22, %v6294_v38  ;;  %v6301_v42 = vld [vmem:[#allocation59_spill] sm:$0xff]  ;;  %v6302_v10 = vld [vmem:[#allocation44_spill] sm:$0xff]  ;;  %v6306_v22 = vunpack.c.h.s8.bf16 %v6254_v47 }
 0x649   : > { %2939 = vmatprep.subr.bf16.mxu1 %v3620_v6  ;;  %v6303_v27 = vld [vmem:[#allocation43_spill] sm:$0xff]  ;;  %v3622_v38 = vld [vmem:[#allocation8 + $0x38] sm:$0xff]  }
 0x64a   : > { %2696 = vmatpush3.bf16.msra.mxu0 %v2566_v60  ;;  %v2577_v60 = vcombine.low %v6297_v48, %v6296_v32  ;;  %v2570_v39 = vcombine.low %v6303_v27, %v6302_v10  ;;  %v6308_v32 = vld [vmem:[#allocation61_spill] sm:$0xff] }
 0x64b   : > { %2697 = vmatprep.subr.bf16.mxu0 %v2575_v0  ;;  %v2569_v0 = vcombine.low %v6299_v37, %v6298_v21  ;;  %v6310_v21 = vld [vmem:[#allocation21_spill] sm:$0xff] }
 0x64c   : > { %2940 = vmatpush3.bf16.msra.mxu1 %v3620_v6  ;;  %v6311_v37 = vunpack.c.l.s8.bf16 %v6310_v21 }
 0x64d   : > { %2941 = vmatprep.subr.bf16.mxu1 %v3621_v11 }
 0x64e   : > { %2698 = vmatpush3.bf16.msra.mxu0 %v2567_v57  ;;  %v2578_v57 = vcombine.low %v6301_v42, %v6300_v54  ;;  %v6316_v54 = vld [vmem:[#allocation24_spill] sm:$0xff] }
 0x64f   : > { %2699 = vmatprep.subr.bf16.mxu0 %v2576_v8  ;;  %v6304_v8 = vld [vmem:[#allocation17_spill] sm:$0xff]  ;;  %v6317_v42 = vunpack.c.l.s8.bf16 %v6316_v54  ;;  %v6320_v27 = vunpack.c.h.s8.bf16 %v6316_v54 }
 0x650   : > { %2942 = vmatpush3.bf16.msra.mxu1 %v3621_v11  ;;  %v6305_v6 = vunpack.c.l.s8.bf16 %v6304_v8  ;;  %v6314_v11 = vunpack.c.h.s8.bf16 %v6310_v21  ;;  %v1384_v21 = vsub.f32 %v6256_v30, %v5519_v58  ;;  %v1388_v30 = vsub.f32 %v6262_v3, %v5543_v56 }
 0x651   : > { %2943 = vmatprep.subr.bf16.mxu1 %v3622_v38  ;;  %v1391_v3 = vsub.f32 %v6265_v33, %v5558_v14  ;;  %v6328_v14 = vld [vmem:[#allocation119_spill] sm:$0xff] }
 0x652   : > { %2700 = vmatpush3.bf16.msra.mxu0 %v2568_v2  ;;  %v6307_v2 = vld [vmem:[#allocation62_spill] sm:$0xff] }
 0x653   : > { %2701 = vmatprep.subr.bf16.mxu0 %v2577_v60  ;;  %v5630_v48 = vcombine.low %v6308_v32, %v6307_v2  ;;  %v6309_v60 = vunpack.c.h.s8.bf16 %v6304_v8  ;;  %v6322_v8 = vld [vmem:[#allocation27_spill] sm:$0xff] }
 0x654   : > { %2944 = vmatpush3.bf16.msra.mxu1 %v3622_v38  ;;  %v6326_v32 = vunpack.c.h.s8.bf16 %v6322_v8 }
 0x655   : > { %2961 = vmatprep.subr.bf16.mxu1 %v5630_v48 }
 0x656   : > { %2702 = vmatpush3.bf16.msra.mxu0 %v2569_v0 }
 0x657   : > { %2703 = vmatprep.subr.bf16.mxu0 %v2578_v57  ;;  %v6318_v57 = vld [vmem:[#allocation23_spill] sm:$0xff] }
 0x658   : > { %v6319_v10 = vunpack.c.l.s8.bf16 %v6318_v57  ;;  %v6321_v38 = vunpack.c.h.s8.bf16 %v6318_v57 }
 0x65a   : > { %2704 = vmatpush3.bf16.msra.mxu0 %v2570_v39  ;;  %v6312_v39 = vld [vmem:[#allocation20_spill] sm:$0xff] }
 0x65b   : > { %v6313_v0 = vunpack.c.l.s8.bf16 %v6312_v39  ;;  %v6315_v47 = vunpack.c.h.s8.bf16 %v6312_v39  ;;  %v1385_v39 = vsub.f32 %v6258_v29, %v5527_v36  ;;  %v1387_v36 = vsub.f32 %v6261_v41, %v5539_v63 }
 0x65d   : > { %2057 = vmatmul.mubr.bf16.vlgmr.msra.gmra.mrb[16].mxu0 %v6305_v6  ;;  %v6323_v6 = vunpack.c.l.s8.bf16 %v6322_v8  ;;  %v1408_v8 = vmul.f32 1.442695, %v1387_v36 }
 0x65e   : > { %2064 = vmatprep.mubr.bf16.mxu0 %v6306_v22  ;;  %v6324_v22 = vld [vmem:[#allocation26_spill] sm:$0xff] }
 0x65f   : > { %v6325_v2 = vunpack.c.l.s8.bf16 %v6324_v22 }
 0x665   : > { %2065 = vmatmul.mubr.bf16.gmra.mrb[20].mxu0 %v6309_v60  ;;  %v6327_v60 = vunpack.c.h.s8.bf16 %v6324_v22 }
 0x666   : > { %2072 = vmatprep.mubr.bf16.mxu0 %v6311_v37  ;;  %v1382_v37 = vsub.f32 %v6257_v12, %v5522_v13  ;;  %v1386_v12 = vsub.f32 %v6260_v44, %v5535_v20  ;;  %v1389_v13 = vsub.f32 %v6263_v34, %v5546_v51  ;;  %v1392_v44 = vsub.f32 %v6266_v4, %v5561_v26  ;;  %v6329_v4 = vld [vmem:[#allocation120_spill] sm:$0xff] }
 0x667   : > { %v1393_v34 = vsub.f32 %v6267_v23, %v5568_v62  ;;  %v6330_v23 = vld [vmem:[#allocation121_spill] sm:$0xff] }
 0x668   : > { %v1398_v54 = vmul.f32 1.442695, %v1382_v37  ;;  %v1418_v33 = vmul.f32 1.442695, %v1392_v44  ;;  %v6331_v37 = vld [vmem:[#allocation122_spill] sm:$0xff] }
 0x669   : > { %v6335_v44 = vld [vmem:[#allocation126_spill] sm:$0xff] }
 0x66d   : > { %2073 = vmatmul.mubr.bf16.gmra.mrb[24].mxu0 %v6313_v0  ;;  %v1383_v0 = vsub.f32 %v6259_v18, %v5530_v46  ;;  %v1410_v18 = vmul.f32 1.442695, %v1388_v30  ;;  %v1406_v46 = vmul.f32 1.442695, %v1386_v12  ;;  %v1395_v30 = vsub.f32 %v6269_v17, %v5576_v45  ;;  %v6332_v45 = vld [vmem:[#allocation123_spill] sm:$0xff] }
 0x66e   : > { %2080 = vmatprep.mubr.bf16.mxu0 %v6314_v11  ;;  %v1402_v11 = vmul.f32 1.442695, %v1384_v21 }
 0x66f   : > { %v1424_v17 = vmul.f32 1.442695, %v1395_v30 }
 0x670   : > { %3655 = vpow2.f32 %v1402_v11  ;;  %v1394_v11 = vsub.f32 %v6268_v19, %v5573_v49 }
 0x671   : > { %3657 = vpow2.f32 %v1398_v54 }
 0x672   : > { %v1422_v19 = vmul.f32 1.442695, %v1394_v11 }
 0x675   : > { %2081 = vmatmul.mubr.bf16.gmra.mrb[28].mxu0 %v6315_v47 }
 0x676   : > { %2088 = vmatprep.mubr.bf16.mxu0 %v6317_v42  ;;  %v1404_v42 = vmul.f32 1.442695, %v1385_v39 }
 0x678   : > { %3659 = vpow2.f32 %v1404_v42  ;;  %v1396_v42 = vsub.f32 %v6270_v61, %v5583_v59 }
 0x67a   : > { %v3656_v20 = vpop.eup %3655 }
 0x67b   : > { %v3658_v63 = vpop.eup %3657  ;;  %v1480_v22 = vmul.f32 %v3656_v20, %v6328_v14 }
 0x67c   : > { %v1478_v26 = vmul.f32 %v3658_v63, %v6329_v4 }
 0x67d   : > { %2089 = vmatmul.mubr.bf16.gmra.mrb[32].mxu0 %v6319_v10  ;;  %v1400_v10 = vmul.f32 1.442695, %v1383_v0 }
 0x67e   : > { %2096 = vmatprep.mubr.bf16.mxu0 %v6320_v27  ;;  %v1390_v27 = vsub.f32 %v6264_v9, %v5553_v43  ;;  %v1416_v9 = vmul.f32 1.442695, %v1391_v3 }
 0x67f   : > { %3661 = vpow2.f32 %v1400_v10 }
 0x680   : > { %3663 = vpow2.f32 %v1410_v18  ;;  %v1414_v51 = vmul.f32 1.442695, %v1390_v27  ;;  %v6333_v18 = vld [vmem:[#allocation125_spill] sm:$0xff]  ;;  %v6334_v27 = vld [vmem:[#allocation124_spill] sm:$0xff] }
 0x681   : > { %3665 = vpow2.f32 %v1406_v46 }
 0x685   : > { %2097 = vmatmul.mubr.bf16.gmra.mrb[36].mxu0 %v6321_v38  ;;  %v1412_v38 = vmul.f32 1.442695, %v1389_v13 }
 0x686   : > { %2104 = vmatprep.mubr.bf16.mxu0 %v6323_v6  ;;  %v3660_v6 = vpop.eup %3659 }
 0x687   : > { %3667 = vpow2.f32 %v1412_v38  ;;  %v1481_v62 = vmul.f32 %v3660_v6, %v6330_v23  ;;  %v1545_v23 = vmul.f32 %v3660_v6, %v6157_v5  ;;  %v6337_v6 = vld [vmem:[#allocation129_spill] sm:$0xff] }
 0x688   : > { %3669 = vpow2.f32 %v1408_v8 }
 0x689   : > { %v5683_v43 = vpop.eup %3661  ;;  %3671 = vpow2.f32 %v1414_v51 }
 0x68a   : > { %3673 = vpow2.f32 %v1416_v9  ;;  %v1479_v39 = vmul.f32 %v5683_v43, %v6331_v37  ;;  %v1544_v9 = vmul.f32 %v3656_v20, %v6153_v1  ;;  %v1543_v20 = vmul.f32 %v5683_v43, %v6158_v55  ;;  %v6338_v43 = vld [vmem:[#allocation128_spill] sm:$0xff] }
 0x68b   : > { %3675 = vpow2.f32 %v1418_v33 }
 0x68d   : > { %2105 = vmatmul.mubr.bf16.gmra.mrb[40].mxu0 %v6325_v2  ;;  %v1420_v2 = vmul.f32 1.442695, %v1393_v34 }
 0x68e   : > { %2112 = vmatprep.mubr.bf16.mxu0 %v6326_v32 }
 0x68f   : > { %3677 = vpow2.f32 %v1420_v2  ;;  %v1542_v2 = vmul.f32 %v3658_v63, %v6155_v16 }
 0x695   : > { %2113 = vmatmul.mubr.bf16.gmra.mrb[44].mxu0 %v6327_v60 }
 0x6ae   : > { %v1495_v47 = vpop.xlane.xlu0 %1494 }
 0x6af   : > { %v1526_v21 = vadd.f32 %v1495_v47, %v1478_v26  ;;  %v1397_v47 = vsub.f32 %v6271_v31, %v5588_v50 }
 0x6b1   : > { %v1428_v36 = vmul.f32 1.442695, %v1397_v47 }
 0x6b2   : > { %v1497_v57 = vpop.xlane.xlu1 %1496  ;;  %v1499_v58 = vpop.xlane.xlu0 %1498 }
 0x6b3   : > { %v1528_v60 = vadd.f32 %v1499_v58, %v1480_v22  ;;  %v1527_v10 = vadd.f32 %v1497_v57, %v1479_v39  ;;  %v5696_v58 = vpop.eup %3663 }
 0x6b4   : > { %v5700_v13 = vpop.eup %3665  ;;  %v1484_v57 = vmul.f32 %v5696_v58, %v6332_v45  ;;  %v6339_v45 = vld [vmem:[#allocation130_spill] sm:$0xff] }
 0x6b5   : > { %3679 = vrcp.f32 %v1528_v60  ;;  %v5702_v49 = vpop.eup %3667  ;;  %v1482_v31 = vmul.f32 %v5700_v13, %v6333_v18 }
 0x6b6   : > { %v1501_v29 = vpop.xlane.xlu1 %1500  ;;  %v1503_v56 = vpop.xlane.xlu0 %1502  ;;  %3681 = vrcp.f32 %v1526_v21  ;;  %v1485_v38 = vmul.f32 %v5702_v49, %v6334_v27 }
 0x6b7   : > { %v1529_v54 = vadd.f32 %v1501_v29, %v1481_v62  ;;  %v1426_v29 = vmul.f32 1.442695, %v1396_v42  ;;  %v5704_v59 = vpop.eup %3669  ;;  %v1530_v8 = vadd.f32 %v1503_v56, %v1482_v31 }
 0x6b8   : > { %v5710_v50 = vpop.eup %3671  ;;  %v1483_v34 = vmul.f32 %v5704_v59, %v6335_v44  ;;  %v1548_v44 = vmul.f32 %v5696_v58, %v6161_v53  ;;  %v1549_v53 = vmul.f32 %v5702_v49, %v6165_v25  ;;  %v1547_v58 = vmul.f32 %v5704_v59, %v6166_v40  ;;  %v6342_v40 = vld [vmem:[#allocation66_spill] sm:$0xff]  ;;  %v6343_v59 = vld [vmem:[#allocation65_spill] sm:$0xff] }
 0x6b9   : > { %3683 = vrcp.f32 %v1529_v54  ;;  %v5714_v3 = vpop.eup %3673 }
 0x6ba   : > { %v1507_v32 = vpop.xlane.xlu0 %1506  ;;  %3685 = vrcp.f32 %v1527_v10  ;;  %v5719_v33 = vpop.eup %3675  ;;  %v1486_v10 = vmul.f32 %v5710_v50, %v6337_v6 }
 0x6bb   : > { %v1505_v41 = vpop.xlane.xlu1 %1504  ;;  %3687 = vpow2.f32 %v1422_v19  ;;  %v1532_v46 = vadd.f32 %v1507_v32, %v1484_v57  ;;  %v5722_v4 = vpop.eup %3677  ;;  %v1487_v57 = vmul.f32 %v5714_v3, %v6339_v45 }
 0x6bc   : > { %3689 = vpow2.f32 %v1426_v29  ;;  %v1531_v26 = vadd.f32 %v1505_v41, %v1483_v34  ;;  %v6336_v41 = vld [vmem:[#allocation127_spill] sm:$0xff]  ;;  %v1489_v19 = vmul.f32 %v5722_v4, %v6338_v43  ;;  %v6340_v34 = vld [vmem:[#allocation64_spill] sm:$0xff] }
 0x6bd   : > { %3691 = vpow2.f32 %v1424_v17  ;;  %v1488_v11 = vmul.f32 %v5719_v33, %v6336_v41  ;;  %v6346_v43 = vld [vmem:[#allocation131_spill] sm:$0xff] }
 0x6be   : > { %v1511_v12 = vpop.xlane.xlu0 %1510  ;;  %3693 = vpow2.f32 %v1428_v36 }
 0x6bf   : > { %v1509_v0 = vpop.xlane.xlu1 %1508  ;;  %v3680_v62 = vpop.eup %3679  ;;  %3695 = vrcp.f32 %v1532_v46  ;;  %v1534_v17 = vadd.f32 %v1511_v12, %v1486_v10  ;;  %v6344_v10 = vld [vmem:[#allocation68_spill] sm:$0xff] }
 0x6c0   : > { %v1533_v14 = vadd.f32 %v1509_v0, %v1485_v38  ;;  %v3682_v37 = vpop.eup %3681  ;;  %3697 = vrcp.f32 %v1530_v8 }
 0x6c2   : > { %v1515_v51 = vpop.xlane.xlu0 %1514  ;;  %3699 = vrcp.f32 %v1533_v14 }
 0x6c3   : > { %v1513_v61 = vpop.xlane.xlu1 %1512  ;;  %v3684_v0 = vpop.eup %3683  ;;  %3701 = vrcp.f32 %v1531_v26  ;;  %v1536_v55 = vadd.f32 %v1515_v51, %v1488_v11  ;;  %v6341_v51 = vld [vmem:[#allocation63_spill] sm:$0xff] }
 0x6c4   : > { %v3686_v5 = vpop.eup %3685  ;;  %v1535_v8 = vadd.f32 %v1513_v61, %v1487_v57 }
 0x6c5   : > { %v5735_v31 = vpop.eup %3687  ;;  %3703 = vrcp.f32 %v1536_v55 }
 0x6c6   : > { %v1519_v30 = vpop.xlane.xlu0 %1518  ;;  %v5737_v38 = vpop.eup %3689  ;;  %3705 = vrcp.f32 %v1534_v17  ;;  %v6347_v17 = vld [vmem:[#allocation132_spill] sm:$0xff] }
 0x6c7   : > { %v1517_v32 = vpop.xlane.xlu1 %1516  ;;  %v5743_v14 = vpop.eup %3691  ;;  %v1553_v45 = vmul.f32 %v5722_v4, %v6347_v17 }
 0x6c8   : > { %v1537_v46 = vadd.f32 %v1517_v32, %v1489_v19 }
 0x6ca   : > { %v1523_v26 = vpop.xlane.xlu0 %1522  ;;  %3707 = vrcp.f32 %v1537_v46 }
 0x6cb   : > { %v1521_v36 = vpop.xlane.xlu1 %1520  ;;  %3709 = vrcp.f32 %v1535_v8 }
 0x6fb   : > { %v2915_v22 = vpop.f32.mrb[0].mxu1 }
 0x6fc   : > { %v1665_v60 = vadd.f32 %v2915_v22, %v1544_v9  ;;  %v1600_v56 = vpop.f32.mrb[1].mxu1  ;;  %v2580_v9 = vcombine.low %v6341_v51, %v6340_v34  ;;  %v1546_v22 = vmul.f32 %v5700_v13, %v6163_v15  ;;  %v1492_v15 = vmul.f32 %v5737_v38, %v6151_v28  ;;  %v6350_v34 = vld [vmem:[#allocation69_spill] sm:$0xff] }
 0x6fd   : > { %v1663_v21 = vadd.f32 %v1600_v56, %v1542_v2  ;;  %v2916_v1 = vpop.f32.mrb[2].mxu1  ;;  %v5747_v2 = vpop.eup %3693  ;;  %v1490_v56 = vmul.f32 %v5735_v31, %v6149_v7 }
 0x6fe   : > { %v1697_v39 = vmul.f32 %v3680_v62, %v1665_v60  ;;  %v1666_v16 = vadd.f32 %v2916_v1, %v1545_v23  ;;  %v1603_v63 = vpop.f32.mrb[3].mxu1  ;;  %v3696_v60 = vpop.eup %3695  ;;  %v1540_v7 = vadd.f32 %v1523_v26, %v1492_v15 }
 0x6ff   : > { %v1695_v54 = vmul.f32 %v3682_v37, %v1663_v21  ;;  %v1664_v42 = vadd.f32 %v1603_v63, %v1543_v20  ;;  %v3698_v62 = vpop.eup %3697  ;;  %v1525_v21 = vpop.xlane.xlu1 %1524  ;;  %v2581_v20 = vcombine.low %v6343_v59, %v6342_v40 }
 0x700   : > { %v1698_v47 = vmul.f32 %v3684_v0, %v1666_v16  ;;  %v3700_v37 = vpop.eup %3699  ;;  %v1538_v0 = vadd.f32 %v1519_v30, %v1490_v56  ;;  %3711 = vrcp.f32 %v1540_v7  ;;  %v1550_v30 = vmul.f32 %v5710_v50, %v6346_v43 }
 0x701   : > { %v1696_v29 = vmul.f32 %v3686_v5, %v1664_v42  ;;  %v3702_v63 = vpop.eup %3701  ;;  %v1552_v5 = vmul.f32 %v5719_v33, %v6169_v35 }
 0x702   : > { %v1712_v18 = vpack.c.bf16 %v1698_v47, %v1697_v39  ;;  %v1493_v39 = vmul.f32 %v5747_v2, %v6152_v24  ;;  %v6345_v47 = vld [vmem:[#allocation67_spill] sm:$0xff]  ;;  %3713 = vrcp.f32 %v1538_v0  ;;  %v3704_v57 = vpop.eup %3703 }
 0x703   : > { %v1711_v27 = vpack.c.bf16 %v1696_v29, %v1695_v54  ;;  %v2582_v24 = vcombine.low %v6345_v47, %v6344_v10  ;;  %v3706_v46 = vpop.eup %3705 }
 0x704   : > { %v2919_v12 = vpop.f32.mrb[4].mxu1  ;;  %v1541_v11 = vadd.f32 %v1525_v21, %v1493_v39  ;;  %v3708_v4 = vpop.eup %3707 }
 0x705   : > { %2945 = vmatprep.mubr.bf16.mxu1 %v1711_v27  ;;  %v1669_v32 = vadd.f32 %v2919_v12, %v1548_v44  ;;  %v1616_v61 = vpop.f32.mrb[5].mxu1  ;;  %v6349_v44 = vld [vmem:[#allocation70_spill] sm:$0xff] }
 0x706   : > { %2946 = vmatmul.mubr.bf16.vlgmr.msra.gmra.mrb[16].mxu1 %v1712_v18  ;;  %v1667_v13 = vadd.f32 %v1616_v61, %v1546_v22  ;;  %v2920_v23 = vpop.f32.mrb[6].mxu1  ;;  %3715 = vrcp.f32 %v1541_v11  ;;  %v2583_v51 = vcombine.low %v6350_v34, %v6349_v44  ;;  %v3710_v22 = vpop.eup %3709  ;;  %v6351_v61 = vld [vmem:[#allocation134_spill] sm:$0xff] }
 0x707   : > { %2962 = vmatpush3.bf16.msra.mxu1 %v5630_v48  ;;  %v1701_v25 = vmul.f32 %v3696_v60, %v1669_v32  ;;  %v1670_v49 = vadd.f32 %v2920_v23, %v1549_v53  ;;  %v1619_v1 = vpop.f32.mrb[7].mxu1  ;;  %v1491_v48 = vmul.f32 %v5743_v14, %v6150_v52  ;;  %v6353_v60 = vld [vmem:[#allocation71_spill] sm:$0xff] }
 0x708   : > { %2963 = vmatprep.subr.bf16.mxu1 %v2580_v9  ;;  %v1699_v28 = vmul.f32 %v3698_v62, %v1667_v13  ;;  %v1668_v16 = vadd.f32 %v1619_v1, %v1547_v58  ;;  %v6352_v58 = vld [vmem:[#allocation72_spill] sm:$0xff]  ;;  %v6354_v13 = vld [vmem:[#allocation135_spill] sm:$0xff] }
 0x709   : > { %v1702_v41 = vmul.f32 %v3700_v37, %v1670_v49  ;;  %v1539_v42 = vadd.f32 %v1521_v36, %v1491_v48  ;;  %v6348_v36 = vld [vmem:[#allocation133_spill] sm:$0xff]  ;;  %v2584_v56 = vcombine.low %v6353_v60, %v6352_v58  ;;  %v1554_v23 = vmul.f32 %v5735_v31, %v6354_v13  ;;  %v6355_v49 = vld [vmem:[#allocation136_spill] sm:$0xff] }
 0x70a   : > { %v1700_v54 = vmul.f32 %v3702_v63, %v1668_v16  ;;  %v1551_v18 = vmul.f32 %v5714_v3, %v6348_v36  ;;  %v1556_v3 = vmul.f32 %v5737_v38, %v6351_v61  ;;  %v1557_v1 = vmul.f32 %v5747_v2, %v6355_v49  ;;  %v3712_v40 = vpop.eup %3711  ;;  %v6356_v38 = vld [vmem:[#allocation137_spill] sm:$0xff]  ;;  %v6357_v31 = vld [vmem:[#allocation74_spill] sm:$0xff]  ;;  %v6358_v63 = vld [vmem:[#allocation73_spill] sm:$0xff] }
 0x70b   : > { %2964 = vmatpush3.bf16.msra.mxu1 %v2580_v9  ;;  %v1714_v6 = vpack.c.bf16 %v1702_v41, %v1701_v25  ;;  %3717 = vrcp.f32 %v1539_v42  ;;  %v1555_v37 = vmul.f32 %v5743_v14, %v6356_v38  ;;  %v2585_v0 = vcombine.low %v6358_v63, %v6357_v31  ;;  %v6359_v14 = vld [vmem:[#allocation76_spill] sm:$0xff] }
 0x70c   : > { %2965 = vmatprep.subr.bf16.mxu1 %v2581_v20  ;;  %v2923_v55 = vpop.f32.mrb[8].mxu1  ;;  %v1713_v19 = vpack.c.bf16 %v1700_v54, %v1699_v28  ;;  %v3714_v7 = vpop.eup %3713 }
 0x70d   : > { %v1673_v52 = vadd.f32 %v2923_v55, %v1552_v5  ;;  %v1632_v29 = vpop.f32.mrb[9].mxu1 }
 0x70e   : > { %v1671_v35 = vadd.f32 %v1632_v29, %v1550_v30  ;;  %v2924_v33 = vpop.f32.mrb[10].mxu1  ;;  %2949 = vmatprep.mubr.bf16.mxu1 %v1713_v19  ;;  %v6364_v30 = vld [vmem:[#allocation22_spill] sm:$0xff]  ;;  %v6367_v29 = vld [vmem:[#allocation25_spill] sm:$0xff] }
 0x70f   : > { %2966 = vmatpush3.bf16.msra.mxu1 %v2581_v20  ;;  %v1705_v27 = vmul.f32 %v3704_v57, %v1673_v52  ;;  %v1674_v50 = vadd.f32 %v2924_v33, %v1553_v45  ;;  %v1635_v8 = vpop.f32.mrb[11].mxu1  ;;  %v6365_v19 = vunpack.c.l.s8.bf16 %v6364_v30  ;;  %v6366_v52 = vunpack.c.h.s8.bf16 %v6364_v30  ;;  %v6370_v57 = vld [vmem:[#allocation28_spill] sm:$0xff] }
 0x710   : > { %2950 = vmatmul.mubr.bf16.gmra.mrb[20].mxu1 %v1714_v6  ;;  %2967 = vmatprep.subr.bf16.mxu1 %v2582_v24  ;;  %v1703_v9 = vmul.f32 %v3706_v46, %v1671_v35  ;;  %v1672_v12 = vadd.f32 %v1635_v8, %v1551_v18  ;;  %v3716_v48 = vpop.eup %3715  ;;  %v6360_v6 = vld [vmem:[#allocation75_spill] sm:$0xff]  ;;  %v6368_v17 = vunpack.c.l.s8.bf16 %v6367_v29  ;;  %v6369_v45 = vunpack.c.h.s8.bf16 %v6367_v29 }
 0x711   : > { %v1706_v26 = vmul.f32 %v3708_v4, %v1674_v50  ;;  %v2586_v10 = vcombine.low %v6360_v6, %v6359_v14  ;;  %v6371_v35 = vunpack.c.l.s8.bf16 %v6370_v57  ;;  %v6372_v33 = vunpack.c.h.s8.bf16 %v6370_v57 }
 0x712   : > { %v1704_v32 = vmul.f32 %v3710_v22, %v1672_v12 }
 0x713   : > { %2968 = vmatpush3.bf16.msra.mxu1 %v2582_v24  ;;  %v1716_v53 = vpack.c.bf16 %v1706_v26, %v1705_v27  ;;  %v6361_v24 = vld [vmem:[#allocation19_spill] sm:$0xff] }
 0x714   : > { %2969 = vmatprep.subr.bf16.mxu1 %v2583_v51  ;;  %v2927_v15 = vpop.f32.mrb[12].mxu1  ;;  %v1715_v62 = vpack.c.bf16 %v1704_v32, %v1703_v9  ;;  %v6362_v55 = vunpack.c.l.s8.bf16 %v6361_v24  ;;  %v6363_v43 = vunpack.c.h.s8.bf16 %v6361_v24 }
 0x715   : > { %v1677_v21 = vadd.f32 %v2927_v15, %v1556_v3  ;;  %v1648_v25 = vpop.f32.mrb[13].mxu1  ;;  %v3718_v11 = vpop.eup %3717 }
 0x716   : > { %v1675_v59 = vadd.f32 %v1648_v25, %v1554_v23  ;;  %v2928_v20 = vpop.f32.mrb[14].mxu1  ;;  %2953 = vmatprep.mubr.bf16.mxu1 %v1715_v62 }
 0x717   : > { %2970 = vmatpush3.bf16.msra.mxu1 %v2583_v51  ;;  %v1709_v39 = vmul.f32 %v3712_v40, %v1677_v21  ;;  %v1678_v28 = vadd.f32 %v2928_v20, %v1557_v1  ;;  %v1651_v16 = vpop.f32.mrb[15].mxu1 }
 0x718   : > { %2954 = vmatmul.mubr.bf16.gmra.mrb[24].mxu1 %v1716_v53  ;;  %2971 = vmatprep.subr.bf16.mxu1 %v2584_v56  ;;  %v1707_v41 = vmul.f32 %v3714_v7, %v1675_v59  ;;  %v1676_v2 = vadd.f32 %v1651_v16, %v1555_v37 }
 0x719   : > { %v1710_v54 = vmul.f32 %v3716_v48, %v1678_v28 }
 0x71a   : > { %v1708_v42 = vmul.f32 %v3718_v11, %v1676_v2 }
 0x71b   : > { %2972 = vmatpush3.bf16.msra.mxu1 %v2584_v56  ;;  %v1718_v5 = vpack.c.bf16 %v1710_v54, %v1709_v39 }
 0x71c   : > { %2973 = vmatprep.subr.bf16.mxu1 %v2585_v0  ;;  %v1717_v47 = vpack.c.bf16 %v1708_v42, %v1707_v41 }
 0x71e   : > { %2957 = vmatprep.mubr.bf16.mxu1 %v1717_v47 }
 0x71f   : > { %2974 = vmatpush3.bf16.msra.mxu1 %v2585_v0 }
 0x720   : > { %2958 = vmatmul.mubr.bf16.gmra.mrb[28].mxu1 %v1718_v5  ;;  %2975 = vmatprep.subr.bf16.mxu1 %v2586_v10 }
 0x721   : > { %2977 = vmatprep.mubr.bf16.mxu1 %v6362_v55 }
 0x723   : > { %2976 = vmatpush3.bf16.msra.mxu1 %v2586_v10 }
 0x728   : > { %2978 = vmatmul.mubr.bf16.vlgmr.msra.gmra.mrb[16].mxu1 %v6363_v43 }
 0x729   : > { %2981 = vmatprep.mubr.bf16.mxu1 %v6365_v19 }
 0x730   : > { %2982 = vmatmul.mubr.bf16.gmra.mrb[20].mxu1 %v6366_v52  ;;  %v2705_v36 = vpop.f32.mrb[16].mxu0 }
 0x731   : > { %2985 = vmatprep.mubr.bf16.mxu1 %v6368_v17  ;;  %v2706_v18 = vpop.f32.mrb[17].mxu0 }
 0x732   : > { %v2707_v46 = vadd.f32 %v2706_v18, %v2705_v36  ;;  %v2708_v27 = vpop.f32.mrb[18].mxu0 }
 0x733   : > { %v2709_v50 = vpop.f32.mrb[19].mxu0 }
 0x734   : > { %v2710_v8 = vadd.f32 %v2709_v50, %v2708_v27 }
 0x738   : > { %2986 = vmatmul.mubr.bf16.gmra.mrb[24].mxu1 %v6369_v45  ;;  %v2711_v44 = vpop.f32.mrb[20].mxu0 }
 0x739   : > { %2989 = vmatprep.mubr.bf16.mxu1 %v6371_v35  ;;  %v2712_v34 = vpop.f32.mrb[21].mxu0 }
 0x73a   : > { %v2713_v51 = vadd.f32 %v2712_v34, %v2711_v44  ;;  %v2714_v4 = vpop.f32.mrb[22].mxu0 }
 0x73b   : > { %v2715_v9 = vpop.f32.mrb[23].mxu0 }
 0x73c   : > { %v2716_v12 = vadd.f32 %v2715_v9, %v2714_v4 }
 0x740   : > { %2990 = vmatmul.mubr.bf16.gmra.mrb[28].mxu1 %v6372_v33  ;;  %v2717_v22 = vpop.f32.mrb[24].mxu0 }
 0x741   : > { %v2718_v26 = vpop.f32.mrb[25].mxu0 }
 0x742   : > { %v2719_v32 = vadd.f32 %v2718_v26, %v2717_v22  ;;  %v2720_v61 = vpop.f32.mrb[26].mxu0 }
 0x743   : > { %v2721_v3 = vpop.f32.mrb[27].mxu0 }
 0x744   : > { %v2722_v53 = vadd.f32 %v2721_v3, %v2720_v61 }
 0x748   : > { %v2723_v58 = vpop.f32.mrb[28].mxu0 }
 0x749   : > { %v2724_v60 = vpop.f32.mrb[29].mxu0 }
 0x74a   : > { %v2725_v56 = vadd.f32 %v2724_v60, %v2723_v58  ;;  %v2726_v15 = vpop.f32.mrb[30].mxu0 }
 0x74b   : > { %v2727_v13 = vpop.f32.mrb[31].mxu0 }
 0x74c   : > { %v2728_v23 = vadd.f32 %v2727_v13, %v2726_v15 }
 0x750   : > { %v2729_v62 = vpop.f32.mrb[32].mxu0 }
 0x751   : > { %v2730_v21 = vpop.f32.mrb[33].mxu0 }
 0x752   : > { %v2731_v25 = vadd.f32 %v2730_v21, %v2729_v62  ;;  %v2732_v49 = vpop.f32.mrb[34].mxu0 }
 0x753   : > { %v2733_v1 = vpop.f32.mrb[35].mxu0 }
 0x754   : > { %v2734_v40 = vadd.f32 %v2733_v1, %v2732_v49 }
 0x758   : > { %v2735_v59 = vpop.f32.mrb[36].mxu0 }
 0x759   : > { %v2736_v20 = vpop.f32.mrb[37].mxu0 }
 0x75a   : > { %v2737_v38 = vadd.f32 %v2736_v20, %v2735_v59  ;;  %v2738_v37 = vpop.f32.mrb[38].mxu0 }
 0x75b   : > { %v2739_v7 = vpop.f32.mrb[39].mxu0 }
 0x75c   : > { %v2740_v39 = vadd.f32 %v2739_v7, %v2738_v37 }
 0x760   : > { %v2741_v28 = vpop.f32.mrb[40].mxu0 }
 0x761   : > { %v2742_v16 = vpop.f32.mrb[41].mxu0 }
 0x762   : > { %v2743_v31 = vadd.f32 %v2742_v16, %v2741_v28  ;;  %v2744_v63 = vpop.f32.mrb[42].mxu0 }
 0x763   : > { %v2745_v0 = vpop.f32.mrb[43].mxu0 }
 0x764   : > { %v2746_v48 = vadd.f32 %v2745_v0, %v2744_v63 }
 0x768   : > { %v2747_v41 = vpop.f32.mrb[44].mxu0 }
 0x769   : > { %v2748_v2 = vpop.f32.mrb[45].mxu0 }
 0x76a   : > { %v2749_v11 = vadd.f32 %v2748_v2, %v2747_v41  ;;  %v2750_v54 = vpop.f32.mrb[46].mxu0 }
 0x76b   : > { %v2751_v42 = vpop.f32.mrb[47].mxu0 }
 0x76c   : > { %v2752_v5 = vadd.f32 %v2751_v42, %v2750_v54 }
 0x7fb   : > { %v2979_v14 = vpop.f32.mrb[16].mxu1 }
 0x7fc   : > { %v3009_v6 = vadd.f32 %v2979_v14, %v2713_v51  ;;  %v2155_v10 = vpop.f32.mrb[17].mxu1 }
 0x7fd   : > { %v3010_v47 = vadd.f32 %v2707_v46, %v2155_v10  ;;  %v2980_v24 = vpop.f32.mrb[18].mxu1 }
 0x7fe   : > { %2220 = vst [vmem:[%s4729_s20 + $0x10] sm:$0xff] %v3009_v6  ;;  %v3011_v55 = vadd.f32 %v2980_v24, %v2716_v12  ;;  %v2158_v43 = vpop.f32.mrb[19].mxu1 }
 0x7ff   : > { %2218 = vst [vmem:[%s4729_s20] sm:$0xff] %v3010_v47  ;;  %v3012_v30 = vadd.f32 %v2710_v8, %v2158_v43 }
 0x800   : > { %2221 = vst [vmem:[%s4729_s20 + $0x18] sm:$0xff] %v3011_v55 }
 0x801   : > { %2219 = vst [vmem:[%s4729_s20 + $0x8] sm:$0xff] %v3012_v30 }
 0x803   : > { %v2983_v19 = vpop.f32.mrb[20].mxu1 }
 0x804   : > { %v3013_v52 = vadd.f32 %v2983_v19, %v2725_v56  ;;  %v2171_v29 = vpop.f32.mrb[21].mxu1 }
 0x805   : > { %v3014_v17 = vadd.f32 %v2719_v32, %v2171_v29  ;;  %v2984_v45 = vpop.f32.mrb[22].mxu1 }
 0x806   : > { %2224 = vst [vmem:[%s4729_s20 + $0x30] sm:$0xff] %v3013_v52  ;;  %v3015_v57 = vadd.f32 %v2984_v45, %v2728_v23  ;;  %v2174_v35 = vpop.f32.mrb[23].mxu1 }
 0x807   : > { %2222 = vst [vmem:[%s4729_s20 + $0x20] sm:$0xff] %v3014_v17  ;;  %v3016_v33 = vadd.f32 %v2722_v53, %v2174_v35 }
 0x808   : > { %2225 = vst [vmem:[%s4729_s20 + $0x38] sm:$0xff] %v3015_v57 }
 0x809   : > { %2223 = vst [vmem:[%s4729_s20 + $0x28] sm:$0xff] %v3016_v33 }
 0x80b   : > { %v2987_v36 = vpop.f32.mrb[24].mxu1 }
 0x80c   : > { %v3017_v18 = vadd.f32 %v2987_v36, %v2737_v38  ;;  %v2187_v46 = vpop.f32.mrb[25].mxu1 }
 0x80d   : > { %v3018_v27 = vadd.f32 %v2731_v25, %v2187_v46  ;;  %v2988_v50 = vpop.f32.mrb[26].mxu1 }
 0x80e   : > { %2228 = vst [vmem:[%s4729_s20 + $0x50] sm:$0xff] %v3017_v18  ;;  %v3019_v8 = vadd.f32 %v2988_v50, %v2740_v39  ;;  %v2190_v44 = vpop.f32.mrb[27].mxu1 }
 0x80f   : > { %2226 = vst [vmem:[%s4729_s20 + $0x40] sm:$0xff] %v3018_v27  ;;  %v3020_v34 = vadd.f32 %v2734_v40, %v2190_v44 }
 0x810   : > { %2229 = vst [vmem:[%s4729_s20 + $0x58] sm:$0xff] %v3019_v8 }
 0x811   : > { %2227 = vst [vmem:[%s4729_s20 + $0x48] sm:$0xff] %v3020_v34 }
 0x813   : > { %v2991_v51 = vpop.f32.mrb[28].mxu1 }
 0x814   : > { %v3021_v4 = vadd.f32 %v2991_v51, %v2749_v11  ;;  %v2203_v9 = vpop.f32.mrb[29].mxu1 }
 0x815   : > { %v3022_v12 = vadd.f32 %v2743_v31, %v2203_v9  ;;  %v2992_v22 = vpop.f32.mrb[30].mxu1 }
 0x816   : > { %2232 = vst [vmem:[%s4729_s20 + $0x70] sm:$0xff] %v3021_v4  ;;  %v3023_v26 = vadd.f32 %v2992_v22, %v2752_v5  ;;  %v2206_v32 = vpop.f32.mrb[31].mxu1 }
 0x817   : > { %2230 = vst [vmem:[%s4729_s20 + $0x60] sm:$0xff] %v3022_v12  ;;  %v3024_v61 = vadd.f32 %v2746_v48, %v2206_v32 }
 0x818   : > { %2233 = vst [vmem:[%s4729_s20 + $0x78] sm:$0xff] %v3023_v26 }
 0x819   : > { %2231 = vst [vmem:[%s4729_s20 + $0x68] sm:$0xff] %v3024_v61 }
 0x81a   : > { %3846 = shalt.err (!%p3843_p13)
}
 0x81b   : > { %s3847_s10 = scalar_lea.hbm %s5824_s11, 2048  ;;  %s3851_s24 = scalar_lea.hbm %s5876_s4, 6144 }
 0x81c   : > { %p3848_p7 = scmp.ne.s32.totalorder %s5824_s11, %s3847_s10  ;;  %p3852_p10 = scmp.lt.u32.totalorder %s5824_s11, %s5876_s4 }
 0x81d   : > { %p3853_p1 = scmp.lt.u32.totalorder %s3851_s24, %s3847_s10  ;;  %p3855_p0 = scmp.lt.u32.totalorder %s3847_s10, %s5824_s11 }
 0x81e   : > { %p3849_p8 = pnand %p3848_p7, %p6373_p2 }
 0x81f   : > { %p3854_p4 = por %p3853_p1, %p3852_p10 }
 0x820   : > { %p3850_p9 = pneg %p3849_p8 }
 0x821   : > { %p3856_p5 = por %p3855_p0, %p3854_p4 }
 0x823   : > { %p3857_p11 = pnand %p3856_p5, %p3850_p9 }
 0x825   : > { %3860 = shalt.err (!%p3857_p11)
}
 0x826   : > { %s4314_s12 = smov 128   ;;  %s4315_s13 = smov 8  }
 0x827   : > { %3058 = dma.vmem_to_hbm [thread:$0]  (%p6373_p2), %s5826_s6, 2048, %s5824_s11, %s2235_s19, %s4314_s12, %s4314_s12, %s4315_s13  }
 0x828 PF: > { %p3085_p12 = scmp.ge.s32.totalorder %s4107_s18, 2  ;;  %s2263_s23 = sand.u32 1, %s4095_s15  }
 0x829   : > { %p6374_p3 = scmp.ne.s32.totalorder %s5958_s28, 0  ;;  %s2264_s9 = scalar_lea.sflag [#allocation4], %s2263_s23 }
 0x82b   : > { %p3075_p6 = pnand %p3085_p12, %p6374_p3 }
 0x82d   : > { %4090 = dma.done.wait (!%p3075_p6), %s2264_s9, 2048  }
 0x82e   : > { %4092 = vsyncadd (!%p3075_p6), %s2264_s9, 4294965248  ;;  %s6375_s30 = sld [smem:[#allocation16_spill]]  ;;  %p19_p13 = scmp.ge.s32.totalorder %s4366_s21, 5  }
 0x82f   : > { %s6376_s15 = smov %s4099_s16  ;;  %s6377_s16 = smov %s4103_s17 }
 0x830   : > { %s6379_s18 = smov %s4366_s21  ;;  %21 = sbr.rel (!%p19_p13) target bundleno = 9 (0x9), region = 115 }
 0x834   : > { %s6378_s17 = smov %s6375_s30 }
 0x837   :  { %2269 = vsyncpa [#allocation3], 1 }
 0x838   :  { %2271 = vsyncpa [#allocation3 + $0x1], 1 }
 0x839   :  { %2272 = vsyncpa [#allocation6], 1 }
 0x83a   :  { %2274 = vsyncpa [#allocation6 + $0x1], 1 }
 0x83b   :  { %2275 = vsyncpa [#allocation9], 1 }
 0x83c   :  { %2276 = vsyncpa [#allocation4], 1 }
 0x83d   :  { %2278 = vsyncpa [#allocation4 + $0x1], 1 }

// kernel: tpu_custom_call.1
= control target key start
LH: loop header
LB: loop body
LE: loop exit
PB: predicated region body
PF: predicated region fallthrough
CT: control target
= control target key end

     0   :  { %s5872_s0 = inlined_call_operand.hbm [shape: bf16[384,128], index: 0, kind: input, shape index: {}]   ;;  %s5873_s1 = inlined_call_operand.hbm [shape: s8[384,384], index: 1, kind: input, shape index: {}]   ;;  %s5874_s2 = inlined_call_operand.hbm [shape: bf16[128,128], index: 2, kind: input, shape index: {}]   ;;  %s5875_s3 = inlined_call_operand.hbm [shape: bf16[128,128], index: 3, kind: input, shape index: {}]   ;;  %s5876_s4 = inlined_call_operand.hbm [shape: f32[384,128], index: 4, kind: output, shape index: {}]  }
   0x1   :  { %5953 = sst [smem:[#allocation138_spill]] %s5874_s2 }
   0x2   :  { %9 = vsyncpa [#allocation3], 0 }
   0x3   :  { %10 = vsyncpa [#allocation6], 0 }
   0x4   :  { %12 = vsyncpa [#allocation6 + $0x1], 0 }
   0x5   :  { %13 = vsyncpa [#allocation9], 0 }
   0x6   :  { %14 = vsyncpa [#allocation4], 0 }
   0x7   :  { %16 = vsyncpa [#allocation4 + $0x1], 0  ;;  %s4341_s15 = smov 0   ;;  %s4343_s16 = smov 0  }
   0x8   :  { %s4345_s17 = smov 0   ;;  %s4347_s18 = smov 0  }
   0x9 LB: > { %s4362_s19 = sadd.s32 4294967295, %s4107_s18   ;;  %s2505_s20 = sadd.s32 4294967294, %s4107_s18   ;;  %s4107_s18 = sphi %s4347_s18, %s6379_s18   ;;  %s4103_s17 = sphi %s4345_s17, %s6378_s17   ;;  %s4099_s16 = sphi %s4343_s16, %s6377_s16   ;;  %s4095_s15 = sphi %s4341_s15, %s6376_s15  }
   0xa   : > { %s4366_s21 = sadd.s32 1, %s4107_s18   ;;  %s50_s22 = sadd.s32 1, %s4103_s17 }
   0xb   : > { %s47_s23 = ssub.s32 %s4107_s18, %s4366_s21  ;;  %p57_p0 = scmp.ne.s32.totalorder %s4103_s17, %s4099_s16 }
   0xc   : > { %p48_p1 = scmp.eq.s32.totalorder %s47_s23, 0  ;;  %p58_p2 = scmp.eq.s32.totalorder %s4107_s18, 0 }
   0xd   : > { %p63_p3 = scmp.ne.s32.totalorder %s4099_s16, %s4095_s15  ;;  %p5877_p4 = scmp.eq.s32.totalorder %s4362_s19, 0 }
   0xe   : > { %s4378_s24 = scalar_select %p48_p1, %s4103_s17, %s50_s22  }
   0xf   : > { %p4380_p5 = por %p58_p2, %p57_p0  ;;  %p4386_p6 = por %p5877_p4, %p63_p3 }
  0x10   : > { %5954 = sst [smem:[#allocation16_spill]] %s4378_s24  ;;  %p129_p7 = scmp.eq.s32.totalorder %s4362_s19, 2 }
  0x11   : > { %s5955_s25 = scalar_select %p4380_p5, 1, 0 }
  0x12   : > { %s5956_s26 = scalar_select %p4386_p6, 1, 0 }
  0x13   : > { %p135_p8 = scmp.eq.s32.totalorder %s2505_s20, 2  ;;  %p2506_p9 = scmp.ge.s32.totalorder %s4107_s18, 1 }
  0x14   : > { %p142_p10 = scmp.lt.s32.totalorder %s4107_s18, 4  ;;  %p4393_p11 = por %p129_p7, %p57_p0 }
  0x15   : > { %p4397_p12 = por %p135_p8, %p63_p3  ;;  %s4305_s30 = smov [#allocation7]  }
  0x16   : > { %s5957_s27 = scalar_select %p4393_p11, 1, 0 }
  0x17   : > { %s5958_s28 = scalar_select %p4397_p12, 1, 0 }
  0x18   : > { %p4401_p13 = pnand %p2506_p9, %p142_p10  ;;  %s167_s5 = sshll.u32 %s4305_s30, 4  ;;  %s168_s5 = int_to_ptr.vmem [resolvable:$true] %s167_s5 }
  0x19   : > { %s4306_s7 = smov [#allocation2]   ;;  %s5961_s2 = sld [smem:[#allocation138_spill]] }
  0x1a   : > { %s5959_s29 = scalar_select %p4401_p13, 1, 0 }
  0x1b   : > { %p3060_p1 = pneg %p4401_p13  ;;  %s154_s8 = sshll.u32 %s4306_s7, 4  ;;  %s155_s8 = int_to_ptr.vmem [resolvable:$true] %s154_s8 }
  0x1d   : > { %p4409_p2 = pnand %p3060_p1, %p5877_p4 }
  0x1f   : > { %s3719_s11 = scalar_lea.hbm %s5961_s2, 1024  ;;  %p4422_p7 = pneg %p4409_p2 }
  0x20   : > { %p3720_p3 = scmp.ne.s32.totalorder %s5961_s2, %s3719_s11  ;;  %p3726_p10 = scmp.lt.u32.totalorder %s3719_s11, %s5961_s2 }
  0x22   : > { %p3722_p8 = pnand %p4422_p7, %p3720_p3 }
  0x24   : > { %p3723_p9 = pneg %p3722_p8 }
  0x26   : > { %p3728_p1 = pnand %p3726_p10, %p3723_p9 }
  0x28   : > { %3731 = shalt.err (!%p3728_p1)
}
  0x29   : > { %s3732_s23 = scalar_lea.vmem %s168_s5, 1024  ;;  %p3740_p11 = scmp.lt.s32.totalorder %s168_s5, %s168_s5 }
  0x2a   : > { %p3733_p4 = scmp.ne.s32.totalorder %s168_s5, %s3732_s23  ;;  %p3741_p6 = scmp.lt.s32.totalorder %s3732_s23, %s3732_s23 }
  0x2c   : > { %p3735_p0 = pnand %p3733_p4, %p4422_p7  ;;  %p3742_p13 = por %p3741_p6, %p3740_p11 }
  0x2e   : > { %p3736_p12 = pneg %p3735_p0 }
  0x30   : > { %p3743_p5 = pnand %p3742_p13, %p3736_p12 }
  0x32   : > { %3746 = shalt.err (!%p3743_p5)
}
  0x33   : > { %s4307_s30 = smov 64   ;;  %s4308_s7 = smov 4  }
  0x34   : > { %3066 = dma.hbm_to_vmem [thread:$0]  (!%p4409_p2), %s5961_s2, 1024, %s168_s5, [#allocation6], %s4307_s30, %s4307_s30, %s4308_s7  }
  0x35   : > { %p5963_p4 = scmp.ne.s32.totalorder %s5955_s25, 0  ;;  %p5964_p0 = scmp.lt.s32.totalorder %s4107_s18, 3 }
  0x36   : > { %s3747_s20 = scalar_lea.hbm %s5872_s0, 3072 }
  0x37   : > { %p4445_p3 = pnand %p5964_p0, %p5963_p4  ;;  %p3748_p5 = scmp.ne.s32.totalorder %s5872_s0, %s3747_s20 }
  0x38   : > { %p3754_p12 = scmp.lt.u32.totalorder %s3747_s20, %s5872_s0 }
  0x39   : > { %s5965_s11 = scalar_select %p4445_p3, 1, 0 }
  0x3a   : > { %p3750_p6 = pnand %p3748_p5, %p4422_p7 }
  0x3c   : > { %p3751_p11 = pneg %p3750_p6 }
  0x3e   : > { %p3756_p13 = pnand %p3754_p12, %p3751_p11 }
  0x40   : > { %3759 = shalt.err (!%p3756_p13)
}
  0x41   : > { %s3760_s25 = scalar_lea.vmem %s155_s8, 3072  ;;  %p3768_p1 = scmp.lt.s32.totalorder %s155_s8, %s155_s8 }
  0x42   : > { %p3761_p8 = scmp.ne.s32.totalorder %s155_s8, %s3760_s25  ;;  %p3769_p4 = scmp.lt.s32.totalorder %s3760_s25, %s3760_s25 }
  0x44   : > { %p3763_p9 = pnand %p3761_p8, %p4422_p7  ;;  %p3770_p0 = por %p3769_p4, %p3768_p1 }
  0x46   : > { %p3764_p10 = pneg %p3763_p9 }
  0x48   : > { %p3771_p3 = pnand %p3770_p0, %p3764_p10 }
  0x4a   : > { %3774 = shalt.err (!%p3771_p3)
}
  0x4b   : > { %3063 = dma.hbm_to_vmem [thread:$0]  (!%p4409_p2), %s5872_s0, 3072, %s155_s8, [#allocation3], %s4307_s30, %s4307_s30, %s4308_s7  }
  0x4c   : > { %s4309_s13 = smov [#allocation8]   ;;  %s194_s22 = sand.u32 1, %s4107_s18  }
  0x4d   : > { %s180_s20 = sshll.u32 %s4309_s13, 4  ;;  %s3775_s5 = scalar_lea.hbm %s5875_s3, 1024  ;;  %s181_s20 = int_to_ptr.vmem [resolvable:$true] %s180_s20 }
  0x4e   : > { %p3776_p3 = scmp.ne.s32.totalorder %s5875_s3, %s3775_s5  ;;  %p3782_p11 = scmp.lt.u32.totalorder %s3775_s5, %s5875_s3 }
  0x50   : > { %p3778_p5 = pnand %p3776_p3, %p4422_p7 }
  0x52   : > { %p3779_p6 = pneg %p3778_p5 }
  0x54   : > { %p3784_p12 = pnand %p3782_p11, %p3779_p6 }
  0x56   : > { %3787 = shalt.err (!%p3784_p12)
}
  0x57   : > { %s3788_s8 = scalar_lea.vmem %s181_s20, 1024  ;;  %p3796_p10 = scmp.lt.s32.totalorder %s181_s20, %s181_s20 }
  0x58   : > { %p3789_p13 = scmp.ne.s32.totalorder %s181_s20, %s3788_s8  ;;  %p3797_p1 = scmp.lt.s32.totalorder %s3788_s8, %s3788_s8 }
  0x5a   : > { %p3791_p8 = pnand %p3789_p13, %p4422_p7  ;;  %p3798_p4 = por %p3797_p1, %p3796_p10 }
  0x5c   : > { %p3792_p9 = pneg %p3791_p8 }
  0x5e   : > { %p3799_p0 = pnand %p3798_p4, %p3792_p9 }
  0x60   : > { %3802 = shalt.err (!%p3799_p0)
}
  0x61   : > { %3069 = dma.hbm_to_vmem [thread:$0]  (!%p4409_p2), %s5875_s3, 1024, %s181_s20, [#allocation9], %s4307_s30, %s4307_s30, %s4308_s7  }
  0x62   : > { %s196_s14 = sand.u32 1, %s4103_s17   ;;  %s3042_s12 = smul.u32 1536, %s4107_s18 }
  0x63   : > { %s3041_s13 = smul.u32 96, %s196_s14  ;;  %s4501_s10 = scalar_lea.sflag [#allocation6], %s194_s22 }
  0x64   : > { %s4497_s5 = scalar_lea.hbm %s5873_s1, %s3042_s12  ;;  %p5966_p7 = scmp.ne.s32.totalorder %s5965_s11, 0 }
  0x65   : > { %s198_s6 = scalar_lea.vmem [#allocation5], %s3041_s13  ;;  %s3803_s8 = scalar_lea.hbm %s4497_s5, 1536 }
  0x66   : > { %s206_s25 = sshll.u32 %s198_s6, 4  ;;  %p3804_p2 = scmp.ne.s32.totalorder %s4497_s5, %s3803_s8  ;;  %s4499_s25 = int_to_ptr.vmem [resolvable:$true] %s206_s25 }
  0x67   : > { %p3805_p3 = pneg %p5966_p7  ;;  %s3808_s20 = scalar_lea.hbm %s5873_s1, 4608 }
  0x68   : > { %p3809_p11 = scmp.lt.u32.totalorder %s4497_s5, %s5873_s1  ;;  %p3810_p12 = scmp.lt.u32.totalorder %s3808_s20, %s3803_s8 }
  0x69   : > { %p3806_p5 = pnand %p3805_p3, %p3804_p2  ;;  %p3812_p8 = scmp.lt.u32.totalorder %s3803_s8, %s4497_s5 }
  0x6a   : > { %p3811_p13 = por %p3810_p12, %p3809_p11 }
  0x6b   : > { %p3807_p6 = pneg %p3806_p5 }
  0x6c   : > { %p3813_p9 = por %p3812_p8, %p3811_p13 }
  0x6e   : > { %p3814_p10 = pnand %p3813_p9, %p3807_p6 }
  0x70   : > { %3817 = shalt.err (!%p3814_p10)
}
  0x71   : > { %s3818_s22 = scalar_lea.vmem %s4499_s25, 1536  ;;  %s4310_s14 = smov [#allocation5]  }
  0x72   : > { %p3819_p1 = scmp.ne.s32.totalorder %s4499_s25, %s3818_s22  ;;  %s3823_s12 = sshll.u32 %s4310_s14, 4  ;;  %s3824_s12 = int_to_ptr.vmem [resolvable:$false] %s3823_s12 }
  0x73   : > { %s3825_s13 = scalar_lea.vmem %s3824_s12, 3072  ;;  %p3826_p2 = scmp.lt.s32.totalorder %s4499_s25, %s3824_s12 }
  0x74   : > { %p3821_p4 = pnand %p3819_p1, %p3805_p3  ;;  %p3827_p5 = scmp.lt.s32.totalorder %s3825_s13, %s3818_s22 }
  0x76   : > { %p3822_p0 = pneg %p3821_p4  ;;  %p3828_p11 = por %p3827_p5, %p3826_p2 }
  0x78   : > { %p3829_p12 = pnand %p3828_p11, %p3822_p0 }
  0x7a   : > { %3832 = shalt.err (!%p3829_p12)
}
  0x7b   : > { %s4311_s23 = smov 384   ;;  %s4312_s9 = smov 24  }
  0x7c   : > { %3073 = dma.hbm_to_vmem [thread:$0]  (!%p5966_p7), %s4497_s5, 1536, %s4499_s25, %s4501_s10, %s4311_s23, %s4311_s23, %s4312_s9  }
  0x7d   : > { %p5967_p3 = scmp.ne.s32.totalorder %s5959_s29, 0 }
  0x7f   : > { %218 = sbr.rel (%p5967_p3) target bundleno = 2088 (0x828), region = 36 }
  0x86   : > { %p5968_p6 = scmp.eq.s32.totalorder %s4362_s19, 0 }
  0x88   : > { %4074 = dma.done.wait (%p5968_p6), [#allocation3], 3072   ;;  %p5969_p13 = pmov %p5968_p6 }
  0x89   : > { %s224_s6 = sand.u32 1, %s4362_s19   ;;  %s4537_s8 = sand.u32 1, %s4099_s16  }
  0x8a   : > { %4076 = vsyncadd (%p5969_p13), [#allocation3], 4294964224  ;;  %s3043_s30 = smul.u32 96, %s4537_s8  ;;  %s225_s7 = scalar_lea.sflag [#allocation6], %s224_s6 }
  0x8b   : > { %p5970_p7 = scmp.ne.s32.totalorder %s5956_s26, 0 }
  0x8c   : > { %s228_s11 = scalar_lea.vmem [#allocation5], %s3043_s30 }
  0x8d   : > { %4078 = dma.done.wait (%p5970_p7), %s225_s7, 1536  }
  0x8e   : > { %4080 = vsyncadd (%p5970_p7), %s225_s7, 4294965760  ;;  %p5971_p8 = pmov %p5968_p6 }
  0x8f   : > { %p5972_p9 = pmov %p5968_p6 }
  0x90   : > { %4082 = dma.done.wait (%p5971_p8), [#allocation6], 1024  }
  0x91   : > { %4084 = vsyncadd (%p5972_p9), [#allocation6], 4294966272  ;;  %p5973_p10 = pmov %p5968_p6 }
  0x92   : > { %p5974_p1 = pmov %p5968_p6 }
  0x93   : > { %4086 = dma.done.wait (%p5973_p10), [#allocation9], 1024  }
  0x94   : > { %4088 = vsyncadd (%p5974_p1), [#allocation9], 4294966272  ;;  %s2518_s29 = sshll.u32 %s4537_s8, 7  ;;  %v4553_v0 = vld [vmem:[%s228_s11] sm:$0xff]  ;;  %v4555_v1 = vld [vmem:[%s228_s11 + $0x8] sm:$0xff]  ;;  %s2519_s26 = sshll.u32 %s4362_s19, 7 }
  0x95   : > { %5975 = vst [vmem:[#allocation17_spill] sm:$0xff] %v4553_v0  ;;  %5976 = vst [vmem:[#allocation18_spill] sm:$0xff] %v4555_v1  ;;  %v4557_v2 = vld [vmem:[%s228_s11 + $0x10] sm:$0xff]  ;;  %v4560_v3 = vld [vmem:[%s228_s11 + $0x18] sm:$0xff]  ;;  %s4590_s5 = sshra.s32 %s2519_s26, 3  ;;  %s4729_s20 = scalar_lea.vmem [#allocation10], %s2518_s29 }
  0x96   : > { %5977 = vst [vmem:[#allocation19_spill] sm:$0xff] %v4557_v2  ;;  %5978 = vst [vmem:[#allocation20_spill] sm:$0xff] %v4560_v3  ;;  %v4562_v4 = vld [vmem:[%s228_s11 + $0x20] sm:$0xff]  ;;  %v4564_v5 = vld [vmem:[%s228_s11 + $0x28] sm:$0xff]  ;;  %s2520_s25 = sshll.u32 %s4590_s5, 2  ;;  %v4767_v3 = vmov 0.0  }
  0x97   : > { %5979 = vst [vmem:[#allocation21_spill] sm:$0xff] %v4562_v4  ;;  %5980 = vst [vmem:[#allocation22_spill] sm:$0xff] %v4564_v5  ;;  %v4570_v10 = vld [vmem:[%s228_s11 + $0x30] sm:$0xff]  ;;  %v4572_v11 = vld [vmem:[%s228_s11 + $0x38] sm:$0xff]  ;;  %s4701_s10 = scalar_lea.vmem [#allocation2], %s2520_s25  ;;  %v4769_v4 = vmov 0.0  }
  0x98   : > { %5981 = vst [vmem:[#allocation23_spill] sm:$0xff] %v4570_v10  ;;  %5982 = vst [vmem:[#allocation24_spill] sm:$0xff] %v4572_v11  ;;  %v4574_v12 = vld [vmem:[%s228_s11 + $0x40] sm:$0xff]  ;;  %v4580_v17 = vld [vmem:[%s228_s11 + $0x48] sm:$0xff]  ;;  %v4763_v10 = vmov 0.0   ;;  %v4765_v11 = vmov 0.0  }
  0x99   : > { %5983 = vst [vmem:[#allocation25_spill] sm:$0xff] %v4574_v12  ;;  %5984 = vst [vmem:[#allocation26_spill] sm:$0xff] %v4580_v17  ;;  %v4582_v18 = vld [vmem:[%s228_s11 + $0x50] sm:$0xff]  ;;  %v4584_v19 = vld [vmem:[%s228_s11 + $0x58] sm:$0xff]  ;;  %v4759_v17 = vmov 0.0   ;;  %v4775_v0 = vmov 0.0  }
  0x9a   : > { %5985 = vst [vmem:[#allocation27_spill] sm:$0xff] %v4582_v18  ;;  %5986 = vst [vmem:[#allocation28_spill] sm:$0xff] %v4584_v19  ;;  %v4596_v28 = vld [vmem:[#allocation2] sm:$0xf]  ;;  %v4598_v29 = vld [vmem:[#allocation2 + $0x4] sm:$0xf] }
  0x9b   : > { %5987 = vst [vmem:[#allocation29_spill] sm:$0xff] %v4596_v28  ;;  %5988 = vst [vmem:[#allocation30_spill] sm:$0xff] %v4598_v29  ;;  %v4600_v30 = vld [vmem:[#allocation2 + $0x8] sm:$0xf]  ;;  %v4606_v35 = vld [vmem:[#allocation2 + $0xc] sm:$0xf] }
  0x9c   : > { %5989 = vst [vmem:[#allocation31_spill] sm:$0xff] %v4600_v30  ;;  %5990 = vst [vmem:[#allocation32_spill] sm:$0xff] %v4606_v35  ;;  %v4608_v36 = vld [vmem:[#allocation2 + $0x10] sm:$0xf]  ;;  %v4610_v37 = vld [vmem:[#allocation2 + $0x14] sm:$0xf] }
  0x9d   : > { %5991 = vst [vmem:[#allocation33_spill] sm:$0xff] %v4608_v36  ;;  %5992 = vst [vmem:[#allocation34_spill] sm:$0xff] %v4610_v37  ;;  %v4616_v42 = vld [vmem:[#allocation2 + $0x18] sm:$0xf]  ;;  %v4618_v43 = vld [vmem:[#allocation2 + $0x1c] sm:$0xf] }
  0x9e   : > { %5993 = vst [vmem:[#allocation35_spill] sm:$0xff] %v4616_v42  ;;  %5994 = vst [vmem:[#allocation36_spill] sm:$0xff] %v4618_v43  ;;  %v4620_v44 = vld [vmem:[#allocation2 + $0x20] sm:$0xf]  ;;  %v4622_v45 = vld [vmem:[#allocation2 + $0x24] sm:$0xf] }
  0x9f   : > { %5995 = vst [vmem:[#allocation37_spill] sm:$0xff] %v4620_v44  ;;  %5996 = vst [vmem:[#allocation38_spill] sm:$0xff] %v4622_v45  ;;  %v4624_v46 = vld [vmem:[#allocation2 + $0x28] sm:$0xf]  ;;  %v4626_v47 = vld [vmem:[#allocation2 + $0x2c] sm:$0xf] }
  0xa0   : > { %5997 = vst [vmem:[#allocation39_spill] sm:$0xff] %v4624_v46  ;;  %5998 = vst [vmem:[#allocation40_spill] sm:$0xff] %v4626_v47  ;;  %v4628_v48 = vld [vmem:[#allocation2 + $0x30] sm:$0xf]  ;;  %v4630_v49 = vld [vmem:[#allocation2 + $0x34] sm:$0xf] }
  0xa1   : > { %5999 = vst [vmem:[#allocation41_spill] sm:$0xff] %v4628_v48  ;;  %6000 = vst [vmem:[#allocation42_spill] sm:$0xff] %v4630_v49  ;;  %v4632_v50 = vld [vmem:[#allocation2 + $0x38] sm:$0xf]  ;;  %v4634_v51 = vld [vmem:[#allocation2 + $0x3c] sm:$0xf] }
  0xa2   : > { %6001 = vst [vmem:[#allocation43_spill] sm:$0xff] %v4632_v50  ;;  %6002 = vst [vmem:[#allocation44_spill] sm:$0xff] %v4634_v51  ;;  %v4636_v52 = vld [vmem:[#allocation2 + $0x40] sm:$0xf]  ;;  %v4638_v53 = vld [vmem:[#allocation2 + $0x44] sm:$0xf] }
  0xa3   : > { %6003 = vst [vmem:[#allocation45_spill] sm:$0xff] %v4636_v52  ;;  %6004 = vst [vmem:[#allocation46_spill] sm:$0xff] %v4638_v53  ;;  %v4640_v54 = vld [vmem:[#allocation2 + $0x48] sm:$0xf]  ;;  %v4642_v55 = vld [vmem:[#allocation2 + $0x4c] sm:$0xf] }
  0xa4   : > { %6005 = vst [vmem:[#allocation47_spill] sm:$0xff] %v4640_v54  ;;  %6006 = vst [vmem:[#allocation48_spill] sm:$0xff] %v4642_v55  ;;  %v4644_v56 = vld [vmem:[#allocation2 + $0x50] sm:$0xf]  ;;  %v4646_v57 = vld [vmem:[#allocation2 + $0x54] sm:$0xf] }
  0xa5   : > { %6007 = vst [vmem:[#allocation49_spill] sm:$0xff] %v4644_v56  ;;  %6008 = vst [vmem:[#allocation50_spill] sm:$0xff] %v4646_v57  ;;  %v4648_v58 = vld [vmem:[#allocation2 + $0x58] sm:$0xf]  ;;  %v4650_v59 = vld [vmem:[#allocation2 + $0x5c] sm:$0xf] }
  0xa6   : > { %6009 = vst [vmem:[#allocation51_spill] sm:$0xff] %v4648_v58  ;;  %6010 = vst [vmem:[#allocation52_spill] sm:$0xff] %v4650_v59  ;;  %v4652_v60 = vld [vmem:[#allocation2 + $0x60] sm:$0xf]  ;;  %v4654_v61 = vld [vmem:[#allocation2 + $0x64] sm:$0xf] }
  0xa7   : > { %6011 = vst [vmem:[#allocation53_spill] sm:$0xff] %v4652_v60  ;;  %6012 = vst [vmem:[#allocation54_spill] sm:$0xff] %v4654_v61  ;;  %v4656_v62 = vld [vmem:[#allocation2 + $0x68] sm:$0xf]  ;;  %v4658_v63 = vld [vmem:[#allocation2 + $0x6c] sm:$0xf] }
  0xa8   : > { %6013 = vst [vmem:[#allocation55_spill] sm:$0xff] %v4656_v62  ;;  %6014 = vst [vmem:[#allocation56_spill] sm:$0xff] %v4658_v63  ;;  %v4660_v41 = vld [vmem:[#allocation2 + $0x70] sm:$0xf]  ;;  %v4662_v38 = vld [vmem:[#allocation2 + $0x74] sm:$0xf] }
  0xa9   : > { %6015 = vst [vmem:[#allocation57_spill] sm:$0xff] %v4660_v41  ;;  %6016 = vst [vmem:[#allocation58_spill] sm:$0xff] %v4662_v38  ;;  %v4664_v32 = vld [vmem:[#allocation2 + $0x78] sm:$0xf]  ;;  %v4666_v26 = vld [vmem:[#allocation2 + $0x7c] sm:$0xf] }
  0xaa   : > { %6017 = vst [vmem:[#allocation59_spill] sm:$0xff] %v4664_v32  ;;  %6018 = vst [vmem:[#allocation60_spill] sm:$0xff] %v4666_v26  ;;  %v4668_v23 = vld [vmem:[#allocation2 + $0x80] sm:$0xf]  ;;  %v4670_v20 = vld [vmem:[#allocation2 + $0x84] sm:$0xf] }
  0xab   : > { %6019 = vst [vmem:[#allocation61_spill] sm:$0xff] %v4668_v23  ;;  %6020 = vst [vmem:[#allocation62_spill] sm:$0xff] %v4670_v20  ;;  %v4672_v14 = vld [vmem:[#allocation2 + $0x88] sm:$0xf]  ;;  %v4674_v8 = vld [vmem:[#allocation2 + $0x8c] sm:$0xf] }
  0xac   : > { %6021 = vst [vmem:[#allocation63_spill] sm:$0xff] %v4672_v14  ;;  %6022 = vst [vmem:[#allocation64_spill] sm:$0xff] %v4674_v8  ;;  %v4676_v39 = vld [vmem:[#allocation2 + $0x90] sm:$0xf]  ;;  %v4678_v40 = vld [vmem:[#allocation2 + $0x94] sm:$0xf] }
  0xad   : > { %6023 = vst [vmem:[#allocation65_spill] sm:$0xff] %v4676_v39  ;;  %6024 = vst [vmem:[#allocation66_spill] sm:$0xff] %v4678_v40  ;;  %v4680_v33 = vld [vmem:[#allocation2 + $0x98] sm:$0xf]  ;;  %v4682_v34 = vld [vmem:[#allocation2 + $0x9c] sm:$0xf] }
  0xae   : > { %6025 = vst [vmem:[#allocation67_spill] sm:$0xff] %v4680_v33  ;;  %6026 = vst [vmem:[#allocation68_spill] sm:$0xff] %v4682_v34  ;;  %v4684_v27 = vld [vmem:[#allocation2 + $0xa0] sm:$0xf]  ;;  %v4686_v31 = vld [vmem:[#allocation2 + $0xa4] sm:$0xf] }
  0xaf   : > { %6027 = vst [vmem:[#allocation69_spill] sm:$0xff] %v4684_v27  ;;  %6028 = vst [vmem:[#allocation70_spill] sm:$0xff] %v4686_v31  ;;  %v4688_v24 = vld [vmem:[#allocation2 + $0xa8] sm:$0xf]  ;;  %v4690_v25 = vld [vmem:[#allocation2 + $0xac] sm:$0xf] }
  0xb0   : > { %6029 = vst [vmem:[#allocation71_spill] sm:$0xff] %v4688_v24  ;;  %6030 = vst [vmem:[#allocation72_spill] sm:$0xff] %v4690_v25  ;;  %v4692_v21 = vld [vmem:[#allocation2 + $0xb0] sm:$0xf]  ;;  %v4694_v22 = vld [vmem:[#allocation2 + $0xb4] sm:$0xf] }
  0xb1   : > { %6031 = vst [vmem:[#allocation73_spill] sm:$0xff] %v4692_v21  ;;  %6032 = vst [vmem:[#allocation74_spill] sm:$0xff] %v4694_v22  ;;  %v4696_v15 = vld [vmem:[#allocation2 + $0xb8] sm:$0xf]  ;;  %v4698_v16 = vld [vmem:[#allocation2 + $0xbc] sm:$0xf] }
  0xb2   : > { %6033 = vst [vmem:[#allocation75_spill] sm:$0xff] %v4696_v15  ;;  %6034 = vst [vmem:[#allocation76_spill] sm:$0xff] %v4698_v16  ;;  %v3519_v9 = vld [vmem:[#allocation7] sm:$0xff]   ;;  %v3520_v13 = vld [vmem:[#allocation7 + $0x8] sm:$0xff]   ;;  %v4755_v14 = vmov 0.0   ;;  %v4757_v8 = vmov 0.0  }
  0xb3   : > { %2769 = vmatprep.subr.bf16.mxu0 %v3519_v9  ;;  %2993 = vmatprep.subr.bf16.mxu1 %v3519_v9  ;;  %v3521_v6 = vld [vmem:[#allocation7 + $0x10] sm:$0xff]   ;;  %v3522_v7 = vld [vmem:[#allocation7 + $0x18] sm:$0xff]   ;;  %v3527_v19 = vld [vmem:[%s4701_s10] sm:$0xff]   ;;  %v4761_v18 = vmov 0.0   ;;  %v4771_v23 = vmov 0.0   ;;  %v4773_v20 = vmov 0.0  }
  0xb4   : > { %2770 = vmatpush3.bf16.msra.mxu0 %v3519_v9  ;;  %3001 = vmatpush3.bf16.msra.mxu1 %v3519_v9  ;;  %v3528_v12 = vld [vmem:[%s4701_s10 + $0x20] sm:$0xff]   ;;  %v3532_v5 = vld [vmem:[%s4701_s10 + $0x30] sm:$0xff]   ;;  %v3534_v2 = vld [vmem:[%s4701_s10 + $0x38] sm:$0xff]   ;;  %v4777_v50 = vmov 0.0   ;;  %v4779_v51 = vmov 0.0   ;;  %v4781_v32 = vmov 0.0  }
  0xb5   : > { %2771 = vmatprep.subr.bf16.mxu0 %v3520_v13  ;;  %2994 = vmatprep.subr.bf16.mxu1 %v3520_v13  ;;  %v3523_v9 = vld [vmem:[#allocation7 + $0x20] sm:$0xff]   ;;  %v4783_v26 = vmov 0.0   ;;  %v4785_v48 = vmov 0.0   ;;  %v4787_v49 = vmov 0.0   ;;  %v4789_v41 = vmov 0.0   ;;  %s4827_s2 = smov 0  }
  0xb6   : > { %2785 = vmatprep.mubr.bf16.mxu0 %v3527_v19  ;;  %2793 = vmatprep.mubr.bf16.mxu1 %v3528_v12  ;;  %v3525_v19 = vld [vmem:[#allocation7 + $0x30] sm:$0xff]   ;;  %v3530_v12 = vld [vmem:[%s4701_s10 + $0x28] sm:$0xff]   ;;  %v4791_v38 = vmov 0.0   ;;  %v4793_v46 = vmov 0.0   ;;  %v4795_v47 = vmov -inf   ;;  %v4797_v62 = vmov -inf  }
  0xb7   : > { %v4799_v63 = vmov -inf   ;;  %v4801_v44 = vmov -inf   ;;  %v4803_v45 = vmov -inf   ;;  %v4805_v60 = vmov -inf  }
  0xb8   : > { %2772 = vmatpush3.bf16.msra.mxu0 %v3520_v13  ;;  %3002 = vmatpush3.bf16.msra.mxu1 %v3520_v13  ;;  %v3524_v13 = vld [vmem:[#allocation7 + $0x28] sm:$0xff]   ;;  %v4807_v61 = vmov -inf   ;;  %v4809_v42 = vmov -inf   ;;  %v4811_v43 = vmov -inf   ;;  %v4813_v58 = vmov -inf  }
  0xb9   : > { %2773 = vmatprep.subr.bf16.mxu0 %v3521_v6  ;;  %2995 = vmatprep.subr.bf16.mxu1 %v3521_v6  ;;  %v4815_v59 = vmov -inf   ;;  %v4817_v36 = vmov -inf   ;;  %v4819_v37 = vmov -inf   ;;  %v4821_v56 = vmov -inf  }
  0xba   : > { %v4823_v57 = vmov -inf   ;;  %v4825_v30 = vmov -inf  }
  0xbc   : > { %2774 = vmatpush3.bf16.msra.mxu0 %v3521_v6  ;;  %3003 = vmatpush3.bf16.msra.mxu1 %v3521_v6  ;;  %v3526_v6 = vld [vmem:[#allocation7 + $0x38] sm:$0xff]  }
  0xbd   : > { %2775 = vmatprep.subr.bf16.mxu0 %v3522_v7  ;;  %2996 = vmatprep.subr.bf16.mxu1 %v3522_v7 }
  0xc0   : > { %2776 = vmatpush3.bf16.msra.mxu0 %v3522_v7  ;;  %3004 = vmatpush3.bf16.msra.mxu1 %v3522_v7  ;;  %v3529_v7 = vld [vmem:[%s4701_s10 + $0x8] sm:$0xff]  }
  0xc1   : > { %2777 = vmatprep.subr.bf16.mxu0 %v3523_v9  ;;  %2997 = vmatprep.subr.bf16.mxu1 %v3523_v9 }
  0xc4   : > { %2778 = vmatpush3.bf16.msra.mxu0 %v3523_v9  ;;  %3005 = vmatpush3.bf16.msra.mxu1 %v3523_v9  ;;  %v3531_v9 = vld [vmem:[%s4701_s10 + $0x10] sm:$0xff]  }
  0xc5   : > { %2779 = vmatprep.subr.bf16.mxu0 %v3524_v13  ;;  %2998 = vmatprep.subr.bf16.mxu1 %v3524_v13 }
  0xc8   : > { %2780 = vmatpush3.bf16.msra.mxu0 %v3524_v13  ;;  %3006 = vmatpush3.bf16.msra.mxu1 %v3524_v13  ;;  %v3533_v13 = vld [vmem:[%s4701_s10 + $0x18] sm:$0xff]  }
  0xc9   : > { %2781 = vmatprep.subr.bf16.mxu0 %v3525_v19  ;;  %2999 = vmatprep.subr.bf16.mxu1 %v3525_v19 }
  0xcc   : > { %2782 = vmatpush3.bf16.msra.mxu0 %v3525_v19  ;;  %3007 = vmatpush3.bf16.msra.mxu1 %v3525_v19 }
  0xcd   : > { %2783 = vmatprep.subr.bf16.mxu0 %v3526_v6  ;;  %3000 = vmatprep.subr.bf16.mxu1 %v3526_v6 }
  0xd0   : > { %2784 = vmatpush3.bf16.msra.mxu0 %v3526_v6  ;;  %3008 = vmatpush3.bf16.msra.mxu1 %v3526_v6 }
  0xd3   : > { %2786 = vmatmul.mubr.bf16.vlgmr.msra.gmra.mrb[0].mxu0 %v3529_v7  ;;  %2794 = vmatmul.mubr.bf16.vlgmr.msra.gmra.mrb[0].mxu1 %v3530_v12 }
  0xd4   : > { %2789 = vmatprep.mubr.bf16.mxu0 %v3531_v9  ;;  %2797 = vmatprep.mubr.bf16.mxu1 %v3532_v5 }
  0xdb   : > { %2790 = vmatmul.mubr.bf16.gmra.mrb[4].mxu0 %v3533_v13  ;;  %2798 = vmatmul.mubr.bf16.gmra.mrb[4].mxu1 %v3534_v2 }
 0x1a6   : > { %v2787_v15 = vpop.f32.mrb[0].mxu0  ;;  %v2795_v16 = vpop.f32.mrb[0].mxu1 }
 0x1a7   : > { %v431_v21 = vpop.f32.mrb[1].mxu0  ;;  %v463_v19 = vpop.f32.mrb[1].mxu1 }
 0x1a8   : > { %v2788_v22 = vpop.f32.mrb[2].mxu0  ;;  %v2796_v24 = vpop.f32.mrb[2].mxu1 }
 0x1a9   : > { %v4711_v25 = vpack.c.bf16 %v2788_v22, %v2787_v15  ;;  %v4713_v27 = vpack.c.bf16 %v2796_v24, %v2795_v16  ;;  %v434_v6 = vpop.f32.mrb[3].mxu0  ;;  %v466_v7 = vpop.f32.mrb[3].mxu1 }
 0x1aa   : > { %v4715_v12 = vpack.c.bf16 %v434_v6, %v431_v21  ;;  %v4717_v5 = vpack.c.bf16 %v466_v7, %v463_v19  ;;  %v4731_v21 = vmov 0.0   ;;  %v4733_v19 = vmov 0.0  }
 0x1ab   : > { %6035 = vst [vmem:[#allocation77_spill] sm:$0xff] %v4711_v25  ;;  %6036 = vst [vmem:[#allocation78_spill] sm:$0xff] %v4713_v27  ;;  %v4735_v6 = vmov 0.0   ;;  %v4737_v7 = vmov 0.0  }
 0x1ac   : > { %6037 = vst [vmem:[#allocation79_spill] sm:$0xff] %v4715_v12  ;;  %6038 = vst [vmem:[#allocation80_spill] sm:$0xff] %v4717_v5 }
 0x1ad   : > { %6043 = vst [vmem:[#allocation85_spill] sm:$0xff] %v4737_v7 }
 0x1ae   : > { %v2791_v9 = vpop.f32.mrb[4].mxu0  ;;  %v2799_v13 = vpop.f32.mrb[4].mxu1 }
 0x1af   : > { %v447_v2 = vpop.f32.mrb[5].mxu0  ;;  %v479_v31 = vpop.f32.mrb[5].mxu1 }
 0x1b0   : > { %v2792_v33 = vpop.f32.mrb[6].mxu0  ;;  %v2800_v34 = vpop.f32.mrb[6].mxu1 }
 0x1b1   : > { %v4719_v39 = vpack.c.bf16 %v2792_v33, %v2791_v9  ;;  %v4721_v40 = vpack.c.bf16 %v2800_v34, %v2799_v13  ;;  %v450_v15 = vpop.f32.mrb[7].mxu0  ;;  %v482_v16 = vpop.f32.mrb[7].mxu1  ;;  %v4739_v33 = vmov 0.0   ;;  %v4741_v34 = vmov 0.0  }
 0x1b2   : > { %v4723_v22 = vpack.c.bf16 %v450_v15, %v447_v2  ;;  %v4725_v24 = vpack.c.bf16 %v482_v16, %v479_v31  ;;  %v4743_v9 = vmov 0.0   ;;  %v4745_v13 = vmov 0.0  }
 0x1b3   : > { %6039 = vst [vmem:[#allocation81_spill] sm:$0xff] %v4719_v39  ;;  %6040 = vst [vmem:[#allocation82_spill] sm:$0xff] %v4721_v40  ;;  %v4747_v31 = vmov 0.0   ;;  %v4749_v2 = vmov 0.0   ;;  %v4751_v15 = vmov 0.0   ;;  %v4753_v16 = vmov 0.0  }
 0x1b4   : > { %6041 = vst [vmem:[#allocation83_spill] sm:$0xff] %v4723_v22  ;;  %6042 = vst [vmem:[#allocation84_spill] sm:$0xff] %v4725_v24 }
 0x1b5   : > { %6044 = vst [vmem:[#allocation86_spill] sm:$0xff] %v4745_v13  ;;  %6045 = vst [vmem:[#allocation87_spill] sm:$0xff] %v4751_v15 }
 0x1b6   : > { %6046 = vst [vmem:[#allocation88_spill] sm:$0xff] %v4753_v16 }
 0x1b7 LB: >> { %6051 = vst [vmem:[#allocation89_spill] sm:$0xff] %v4111_v21  ;;  %6052 = vst [vmem:[#allocation90_spill] sm:$0xff] %v4115_v19  ;;  %v6054_v7 = vld [vmem:[#allocation85_spill] sm:$0xff]  ;;  %v6069_v12 = vld [vmem:[#allocation79_spill] sm:$0xff]  ;;  %s2537_s24 = sshll.u32 %s4303_s2, 7  ;;  %s591_s13 = sadd.s32 1, %s4303_s2   ;;  %s4303_s2 = sphi %s4827_s2, %s6245_s2   ;;  %v4299_v30 = vphi %v4825_v30, %v6244_v30   ;;  %v4295_v57 = vphi %v4823_v57, %v6243_v57   ;;  %v4291_v56 = vphi %v4821_v56, %v6242_v56   ;;  %v4287_v37 = vphi %v4819_v37, %v6241_v37   ;;  %v4283_v36 = vphi %v4817_v36, %v6240_v36   ;;  %v4279_v59 = vphi %v4815_v59, %v6239_v59   ;;  %v4275_v58 = vphi %v4813_v58, %v6238_v58   ;;  %v4271_v43 = vphi %v4811_v43, %v6237_v43   ;;  %v4267_v42 = vphi %v4809_v42, %v6236_v42   ;;  %v4263_v61 = vphi %v4807_v61, %v6235_v61   ;;  %v4259_v60 = vphi %v4805_v60, %v6234_v60   ;;  %v4255_v45 = vphi %v4803_v45, %v6233_v45   ;;  %v4251_v44 = vphi %v4801_v44, %v6232_v44   ;;  %v4247_v63 = vphi %v4799_v63, %v6231_v63   ;;  %v4243_v62 = vphi %v4797_v62, %v6230_v62   ;;  %v4239_v47 = vphi %v4795_v47, %v6229_v47   ;;  %v4235_v46 = vphi %v4793_v46, %v6228_v46   ;;  %v4231_v38 = vphi %v4791_v38, %v6227_v38   ;;  %v4227_v41 = vphi %v4789_v41, %v6226_v41   ;;  %v4223_v49 = vphi %v4787_v49, %v6225_v49   ;;  %v4219_v48 = vphi %v4785_v48, %v6224_v48   ;;  %v4215_v26 = vphi %v4783_v26, %v6223_v26   ;;  %v4211_v32 = vphi %v4781_v32, %v6222_v32   ;;  %v4207_v51 = vphi %v4779_v51, %v6221_v51   ;;  %v4203_v50 = vphi %v4777_v50, %v6220_v50   ;;  %v4199_v0 = vphi %v4775_v0, %v6219_v0   ;;  %v4195_v20 = vphi %v4773_v20, %v6218_v20   ;;  %v4191_v23 = vphi %v4771_v23, %v6217_v23   ;;  %v4187_v4 = vphi %v4769_v4, %v6216_v4   ;;  %v4183_v3 = vphi %v4767_v3, %v6215_v3   ;;  %v4179_v11 = vphi %v4765_v11, %v6214_v11   ;;  %v4175_v10 = vphi %v4763_v10, %v6213_v10   ;;  %v4171_v18 = vphi %v4761_v18, %v6212_v18   ;;  %v4167_v17 = vphi %v4759_v17, %v6211_v17   ;;  %v4163_v8 = vphi %v4757_v8, %v6210_v8   ;;  %v4159_v14 = vphi %v4755_v14, %v6209_v14   ;;  %v4147_v2 = vphi %v4749_v2, %v6206_v2   ;;  %v4143_v31 = vphi %v4747_v31, %v6205_v31   ;;  %v4135_v9 = vphi %v4743_v9, %v6202_v9   ;;  %v4131_v34 = vphi %v4741_v34, %v6200_v34   ;;  %v4127_v33 = vphi %v4739_v33, %v6199_v33   ;;  %v4119_v6 = vphi %v4735_v6, %v6196_v6   ;;  %v4115_v19 = vphi %v4733_v19, %v6194_v19   ;;  %v4111_v21 = vphi %v4731_v21, %v6192_v21  }
 0x1b8   : >> { %6053 = vst [vmem:[#allocation91_spill] sm:$0xff] %v4119_v6  ;;  %6055 = vst [vmem:[#allocation85_spill] sm:$0xff] %v6054_v7  ;;  %2817 = vmatprep.mubr.bf16.mxu0 %v6069_v12  ;;  %s641_s22 = sshra.s32 %s2537_s24, 3  ;;  %v6070_v25 = vld [vmem:[#allocation77_spill] sm:$0xff]  ;;  %v6073_v5 = vld [vmem:[#allocation80_spill] sm:$0xff]  ;;  %p5308_p4 = scmp.ge.s32.totalorder %s591_s13, 2  }
 0x1b9   : >> { %6056 = vst [vmem:[#allocation92_spill] sm:$0xff] %v4127_v33  ;;  %6057 = vst [vmem:[#allocation93_spill] sm:$0xff] %v4131_v34  ;;  %s2538_s14 = sshll.u32 %s641_s22, 2  ;;  %v6074_v27 = vld [vmem:[#allocation78_spill] sm:$0xff]  ;;  %s6245_s2 = smov %s591_s13 }
 0x1ba   : >> { %6058 = vst [vmem:[#allocation94_spill] sm:$0xff] %v4135_v9  ;;  %6061 = vst [vmem:[#allocation95_spill] sm:$0xff] %v4143_v31  ;;  %s644_s12 = scalar_lea.vmem [#allocation2], %s2538_s14  ;;  %v6072_v39 = vld [vmem:[#allocation81_spill] sm:$0xff]  ;;  %v6076_v40 = vld [vmem:[#allocation82_spill] sm:$0xff]  ;;  %s2592_s9 = sshll.u32 (%p5308_p4), %s4362_s19, 11 }
 0x1bb   : >> { %6062 = vst [vmem:[#allocation96_spill] sm:$0xff] %v4147_v2  ;;  %6067 = vst [vmem:[#allocation97_spill] sm:$0xff] %v4159_v14  ;;  %v3535_v35 = vld [vmem:[%s644_s12] sm:$0xff]   ;;  %v3536_v54 = vld [vmem:[%s644_s12 + $0x8] sm:$0xff]   ;;  %s2248_s6 = sshll.u32 (%p5308_p4), %s4729_s20, 4  ;;  %s5824_s11 = scalar_lea.hbm (%p5308_p4), %s5876_s4, %s2592_s9  ;;  %s5826_s6 = int_to_ptr.vmem [resolvable:$true] %s2248_s6 }
 0x1bc   : >> { %v6059_v13 = vld [vmem:[#allocation86_spill] sm:$0xff]  ;;  %v6063_v15 = vld [vmem:[#allocation87_spill] sm:$0xff]  ;;  %6068 = vst [vmem:[#allocation98_spill] sm:$0xff] %v4167_v17  ;;  %2801 = vmatprep.subr.bf16.mxu0 %v3535_v35  ;;  %2833 = vmatprep.subr.bf16.mxu1 %v3535_v35  ;;  %v3538_v28 = vld [vmem:[%s644_s12 + $0x18] sm:$0xff]   ;;  %s2235_s19 = scalar_lea.sflag (%p5308_p4), [#allocation4], %s4537_s8  ;;  %s3833_s29 = scalar_lea.vmem (%p5308_p4), %s5826_s6, 2048 }
 0x1bd   : >> { %6060 = vst [vmem:[#allocation86_spill] sm:$0xff] %v6059_v13  ;;  %6064 = vst [vmem:[#allocation87_spill] sm:$0xff] %v6063_v15  ;;  %v6065_v16 = vld [vmem:[#allocation88_spill] sm:$0xff]  ;;  %2802 = vmatpush3.bf16.xpose.msra.mxu0 %v3535_v35  ;;  %2834 = vmatpush3.bf16.msra.mxu1 %v3535_v35  ;;  %v3537_v55 = vld [vmem:[%s644_s12 + $0x10] sm:$0xff]   ;;  %p3834_p0 = scmp.ne.s32.totalorder (%p5308_p4), %s5826_s6, %s3833_s29  ;;  %p6373_p2 = scmp.ne.s32.totalorder (%p5308_p4), %s5957_s27, 0 }
 0x1be   : >> { %6066 = vst [vmem:[#allocation88_spill] sm:$0xff] %v6065_v16  ;;  %2803 = vmatprep.subr.bf16.mxu0 %v3536_v54  ;;  %2835 = vmatprep.subr.bf16.mxu1 %v3536_v54  ;;  %v3539_v29 = vld [vmem:[%s644_s12 + $0x20] sm:$0xff]   ;;  %v3540_v52 = vld [vmem:[%s644_s12 + $0x28] sm:$0xff]   ;;  %v3541_v53 = vld [vmem:[%s644_s12 + $0x30] sm:$0xff]   ;;  %s4313_s26 = smov (%p5308_p4), [#allocation10]  }
 0x1bf   : >> { %v3542_v35 = vld [vmem:[%s644_s12 + $0x38] sm:$0xff]   ;;  %v6071_v22 = vld [vmem:[#allocation83_spill] sm:$0xff]  ;;  %p3835_p5 = pnand (%p5308_p4), %p3834_p0, %p6373_p2  ;;  %s3837_s5 = sshll.u32 (%p5308_p4), %s4313_s26, 4  ;;  %s3838_s5 = int_to_ptr.vmem [resolvable:$false] %s3837_s5 }
 0x1c0   : >> { %v6075_v24 = vld [vmem:[#allocation84_spill] sm:$0xff]  ;;  %s3839_s25 = scalar_lea.vmem (%p5308_p4), %s3838_s5, 4096  ;;  %p3840_p12 = scmp.lt.s32.totalorder (%p5308_p4), %s5826_s6, %s3838_s5 }
 0x1c1   : >> { %2836 = vmatpush3.bf16.msra.mxu1 %v3536_v54  ;;  %p3836_p11 = pneg (%p5308_p4), %p3835_p5  ;;  %p3841_p3 = scmp.lt.s32.totalorder (%p5308_p4), %s3839_s25, %s3833_s29 }
 0x1c2   : >> { %2837 = vmatprep.subr.bf16.mxu1 %v3537_v55 }
 0x1c3   : > { %p3842_p6 = por (%p5308_p4), %p3841_p3, %p3840_p12 }
 0x1c5   : >> { %2804 = vmatpush3.bf16.xpose.msra.mxu0 %v3536_v54  ;;  %2838 = vmatpush3.bf16.msra.mxu1 %v3537_v55  ;;  %p3843_p13 = pnand (%p5308_p4), %p3842_p6, %p3836_p11 }
 0x1c6   : >> { %2805 = vmatprep.subr.bf16.mxu0 %v3537_v55  ;;  %2839 = vmatprep.subr.bf16.mxu1 %v3538_v28 }
 0x1c9   : >> { %2840 = vmatpush3.bf16.msra.mxu1 %v3538_v28 }
 0x1ca   : >> { %2841 = vmatprep.subr.bf16.mxu1 %v3539_v29 }
 0x1cd   : >> { %2806 = vmatpush3.bf16.xpose.msra.mxu0 %v3537_v55  ;;  %2842 = vmatpush3.bf16.msra.mxu1 %v3539_v29 }
 0x1ce   : >> { %2807 = vmatprep.subr.bf16.mxu0 %v3538_v28  ;;  %2843 = vmatprep.subr.bf16.mxu1 %v3540_v52 }
 0x1d1   : >> { %2844 = vmatpush3.bf16.msra.mxu1 %v3540_v52 }
 0x1d2   : >> { %2845 = vmatprep.subr.bf16.mxu1 %v3541_v53 }
 0x1d5   : >> { %2808 = vmatpush3.bf16.xpose.msra.mxu0 %v3538_v28  ;;  %2846 = vmatpush3.bf16.msra.mxu1 %v3541_v53 }
 0x1d6   : >> { %2809 = vmatprep.subr.bf16.mxu0 %v3539_v29  ;;  %2847 = vmatprep.subr.bf16.mxu1 %v3542_v35 }
 0x1d9   : >> { %2848 = vmatpush3.bf16.msra.mxu1 %v3542_v35 }
 0x1dd   : >> { %2810 = vmatpush3.bf16.xpose.msra.mxu0 %v3539_v29 }
 0x1de   : >> { %2811 = vmatprep.subr.bf16.mxu0 %v3540_v52 }
 0x1e5   : >> { %2812 = vmatpush3.bf16.xpose.msra.mxu0 %v3540_v52 }
 0x1e6   : >> { %2813 = vmatprep.subr.bf16.mxu0 %v3541_v53 }
 0x1ed   : >> { %2814 = vmatpush3.bf16.xpose.msra.mxu0 %v3541_v53 }
 0x1ee   : >> { %2815 = vmatprep.subr.bf16.mxu0 %v3542_v35 }
 0x1f5   : >> { %2816 = vmatpush3.bf16.xpose.msra.mxu0 %v3542_v35 }
 0x1fc   : >> { %2818 = vmatmul.mubr.bf16.vlgmr.msra.gmra.mrb[0].mxu0 %v6070_v25 }
 0x1fd   : >> { %2821 = vmatprep.mubr.bf16.mxu0 %v6071_v22 }
 0x204   : >> { %2822 = vmatmul.mubr.bf16.gmra.mrb[4].mxu0 %v6072_v39 }
 0x205   : >> { %2825 = vmatprep.mubr.bf16.mxu0 %v6073_v5 }
 0x20c   : >> { %2826 = vmatmul.mubr.bf16.gmra.mrb[8].mxu0 %v6074_v27 }
 0x20d   : >> { %2829 = vmatprep.mubr.bf16.mxu0 %v6075_v24 }
 0x214   : >> { %2830 = vmatmul.mubr.bf16.gmra.mrb[12].mxu0 %v6076_v40 }
 0x2cf   : >> { %v2819_v28 = vpop.f32.mrb[0].mxu0 }
 0x2d0   : >> { %810 = vmax.xlane.f32.xlu1 %v2819_v28  ;;  %v743_v29 = vpop.f32.mrb[1].mxu0 }
 0x2d1   : >> { %806 = vmax.xlane.f32.xlu0 %v743_v29  ;;  %v2820_v52 = vpop.f32.mrb[2].mxu0 }
 0x2d2   : >> { %v746_v53 = vpop.f32.mrb[3].mxu0 }
 0x2d4   : >> { %812 = vmax.xlane.f32.xlu1 %v2820_v52 }
 0x2d5   : >> { %808 = vmax.xlane.f32.xlu0 %v746_v53 }
 0x2d7   : >> { %v4985_v54 = vpop.f32.mrb[4].mxu0 }
 0x2d8   : >> { %v759_v55 = vpop.f32.mrb[5].mxu0 }
 0x2d9   : >> { %814 = vmax.xlane.f32.xlu0 %v759_v55  ;;  %v4987_v35 = vpop.f32.mrb[6].mxu0 }
 0x2da   : >> { %v762_v1 = vpop.f32.mrb[7].mxu0 }
 0x2db   : >> { %816 = vmax.xlane.f32.xlu1 %v762_v1 }
 0x2dd   : >> { %818 = vmax.xlane.f32.xlu0 %v4985_v54 }
 0x2df   : >> { %820 = vmax.xlane.f32.xlu1 %v4987_v35  ;;  %v4991_v40 = vpop.f32.mrb[8].mxu0 }
 0x2e0   : >> { %6077 = vst [vmem:[#allocation99_spill] sm:$0xff] %v4991_v40  ;;  %v4993_v24 = vpop.f32.mrb[9].mxu0 }
 0x2e1   : >> { %822 = vmax.xlane.f32.xlu0 %v4993_v24  ;;  %v4996_v27 = vpop.f32.mrb[10].mxu0 }
 0x2e2   : >> { %6078 = vst [vmem:[#allocation100_spill] sm:$0xff] %v4996_v27  ;;  %v4998_v5 = vpop.f32.mrb[11].mxu0 }
 0x2e3   : >> { %824 = vmax.xlane.f32.xlu1 %v4998_v5 }
 0x2e5   : >> { %826 = vmax.xlane.f32.xlu0 %v4991_v40 }
 0x2e7   : >> { %828 = vmax.xlane.f32.xlu1 %v4996_v27  ;;  %v5003_v39 = vpop.f32.mrb[12].mxu0 }
 0x2e8   : >> { %6079 = vst [vmem:[#allocation101_spill] sm:$0xff] %v5003_v39  ;;  %v5005_v22 = vpop.f32.mrb[13].mxu0 }
 0x2e9   : >> { %830 = vmax.xlane.f32.xlu0 %v5005_v22  ;;  %v5008_v25 = vpop.f32.mrb[14].mxu0 }
 0x2ea   : >> { %6080 = vst [vmem:[#allocation102_spill] sm:$0xff] %v5008_v25  ;;  %v5010_v12 = vpop.f32.mrb[15].mxu0 }
 0x2eb   : >> { %832 = vmax.xlane.f32.xlu1 %v5010_v12 }
 0x2ed   : >> { %834 = vmax.xlane.f32.xlu0 %v5003_v39 }
 0x2ef   : >> { %836 = vmax.xlane.f32.xlu1 %v5008_v25 }
 0x35d   : >> { %v811_v6 = vpop.xlane.xlu1 %810 }
 0x35e   : >> { %v5016_v21 = vmax.f32 %v4291_v56, %v811_v6   ;;  %v807_v7 = vpop.xlane.xlu0 %806 }
 0x35f   : >> { %v5019_v19 = vmax.f32 %v4299_v30, %v807_v7  }
 0x360   : >> { %6081 = vst [vmem:[#allocation103_spill] sm:$0xff] %v5016_v21  ;;  %v6082_v27 = vmov %v5016_v21 }
 0x361   : >> { %6083 = vst [vmem:[#allocation104_spill] sm:$0xff] %v5019_v19  ;;  %v6084_v40 = vmov %v5019_v19  ;;  %v904_v33 = vsub.f32 %v2819_v28, %v6082_v27  ;;  %v813_v15 = vpop.xlane.xlu1 %812 }
 0x362   : >> { %v902_v34 = vsub.f32 %v743_v29, %v6084_v40  ;;  %v5028_v16 = vmax.f32 %v4287_v37, %v813_v15   ;;  %v809_v21 = vpop.xlane.xlu0 %808 }
 0x363   : >> { %v922_v31 = vmul.f32 1.442695, %v904_v33  ;;  %v5031_v6 = vmax.f32 %v4295_v57, %v809_v21  }
 0x364   : >> { %6085 = vst [vmem:[#allocation105_spill] sm:$0xff] %v5028_v16  ;;  %v6086_v25 = vmov %v5028_v16  ;;  %v918_v19 = vmul.f32 1.442695, %v902_v34 }
 0x365   : >> { %6087 = vst [vmem:[#allocation106_spill] sm:$0xff] %v5031_v6  ;;  %v6088_v39 = vmov %v5031_v6  ;;  %v905_v28 = vsub.f32 %v2820_v52, %v6086_v25  ;;  %3543 = vpow2.f32 %v922_v31 }
 0x366   : >> { %v903_v29 = vsub.f32 %v746_v53, %v6088_v39  ;;  %v815_v9 = vpop.xlane.xlu0 %814  ;;  %3545 = vpow2.f32 %v918_v19 }
 0x367   : >> { %v924_v33 = vmul.f32 1.442695, %v905_v28  ;;  %v5040_v16 = vmax.f32 %v4283_v36, %v815_v9  }
 0x368   : >> { %v920_v15 = vmul.f32 1.442695, %v903_v29  ;;  %v817_v21 = vpop.xlane.xlu1 %816 }
 0x369   : >> { %6089 = vst [vmem:[#allocation107_spill] sm:$0xff] %v5040_v16  ;;  %v6090_v40 = vmov %v5040_v16  ;;  %3547 = vpow2.f32 %v924_v33  ;;  %v5046_v31 = vmax.f32 %v4279_v59, %v817_v21  }
 0x36a   : >> { %v906_v52 = vsub.f32 %v759_v55, %v6090_v40  ;;  %v819_v6 = vpop.xlane.xlu0 %818  ;;  %3549 = vpow2.f32 %v920_v15 }
 0x36b   : >> { %6091 = vst [vmem:[#allocation108_spill] sm:$0xff] %v5046_v31  ;;  %v6092_v7 = vmov %v5046_v31  ;;  %v5052_v9 = vmax.f32 %v4275_v58, %v819_v6  }
 0x36c   : >> { %v907_v28 = vsub.f32 %v762_v1, %v6092_v7  ;;  %v821_v19 = vpop.xlane.xlu1 %820  ;;  %v926_v33 = vmul.f32 1.442695, %v906_v52 }
 0x36d   : >> { %6093 = vst [vmem:[#allocation109_spill] sm:$0xff] %v5052_v9  ;;  %v6094_v29 = vmov %v5052_v9  ;;  %v5055_v16 = vmax.f32 %v4271_v43, %v821_v19  }
 0x36e   : >> { %v928_v34 = vmul.f32 1.442695, %v907_v28  ;;  %v908_v15 = vsub.f32 %v4985_v54, %v6094_v29  ;;  %v823_v21 = vpop.xlane.xlu0 %822 }
 0x36f   : >> { %6095 = vst [vmem:[#allocation110_spill] sm:$0xff] %v5055_v16  ;;  %v6096_v13 = vmov %v5055_v16  ;;  %v3544_v31 = vpop.eup %3543  ;;  %v5066_v52 = vmax.f32 %v4267_v42, %v823_v21  }
 0x370   : >> { %v909_v6 = vsub.f32 %v4987_v35, %v6096_v13  ;;  %3551 = vpow2.f32 %v928_v34  ;;  %v930_v9 = vmul.f32 1.442695, %v908_v15  ;;  %970 = vadd.xlane.f32.xlu0 %v3544_v31  ;;  %v825_v28 = vpop.xlane.xlu1 %824  ;;  %v3546_v53 = vpop.eup %3545 }
 0x371   : >> { %6097 = vst [vmem:[#allocation111_spill] sm:$0xff] %v5066_v52  ;;  %3553 = vpow2.f32 %v926_v33  ;;  %v910_v16 = vsub.f32 %v4993_v24, %v5066_v52  ;;  %v5073_v1 = vmax.f32 %v4263_v61, %v825_v28  }
 0x372   : >> { %v932_v19 = vmul.f32 1.442695, %v909_v6  ;;  %v827_v35 = vpop.xlane.xlu0 %826  ;;  %3555 = vpow2.f32 %v930_v9  ;;  %v6101_v9 = vld [vmem:[#allocation99_spill] sm:$0xff] }
 0x373   : >> { %6098 = vst [vmem:[#allocation112_spill] sm:$0xff] %v5073_v1  ;;  %v3548_v55 = vpop.eup %3547  ;;  %v5076_v34 = vmax.f32 %v4259_v60, %v827_v35   ;;  %v934_v15 = vmul.f32 1.442695, %v910_v16  ;;  %v911_v21 = vsub.f32 %v4998_v5, %v5073_v1 }
 0x374   : >> { %966 = vadd.xlane.f32.xlu0 %v3546_v53  ;;  %972 = vadd.xlane.f32.xlu1 %v3548_v55  ;;  %v829_v24 = vpop.xlane.xlu1 %828  ;;  %v1031_v6 = vpack.c.bf16 %v3548_v55, %v3544_v31  ;;  %v3550_v54 = vpop.eup %3549  ;;  %3557 = vpow2.f32 %v932_v19  ;;  %v6104_v55 = vld [vmem:[#allocation100_spill] sm:$0xff] }
 0x375   : >> { %6099 = vst [vmem:[#allocation113_spill] sm:$0xff] %v5076_v34  ;;  %v6100_v7 = vmov %v5076_v34  ;;  %v5087_v16 = vmax.f32 %v4255_v45, %v829_v24   ;;  %v936_v34 = vmul.f32 1.442695, %v911_v21  ;;  %v1030_v2 = vpack.c.bf16 %v3550_v54, %v3546_v53 }
 0x376   : >> { %v912_v35 = vsub.f32 %v6101_v9, %v6100_v7  ;;  %v831_v33 = vpop.xlane.xlu0 %830  ;;  %3559 = vpow2.f32 %v934_v15 }
 0x377   : >> { %6102 = vst [vmem:[#allocation114_spill] sm:$0xff] %v5087_v16  ;;  %v6103_v52 = vmov %v5087_v16  ;;  %v5094_v19 = vmax.f32 %v4251_v44, %v831_v33   ;;  %2849 = vmatprep.mubr.bf16.mxu1 %v1030_v2  ;;  %3561 = vpow2.f32 %v936_v34 }
 0x378   : >> { %v938_v17 = vmul.f32 1.442695, %v912_v35  ;;  %v913_v31 = vsub.f32 %v6104_v55, %v6103_v52  ;;  %968 = vadd.xlane.f32.xlu1 %v3550_v54  ;;  %v833_v9 = vpop.xlane.xlu1 %832  ;;  %2850 = vmatmul.mubr.bf16.vlgmr.msra.gmra.mrb[0].mxu1 %v1031_v6 }
 0x379   : >> { %6105 = vst [vmem:[#allocation115_spill] sm:$0xff] %v5094_v19  ;;  %v6106_v28 = vmov %v5094_v19  ;;  %v5097_v21 = vmax.f32 %v4247_v63, %v833_v9  }
 0x37a   : >> { %v3552_v53 = vpop.eup %3551  ;;  %v940_v35 = vmul.f32 1.442695, %v913_v31  ;;  %v914_v15 = vsub.f32 %v5005_v22, %v6106_v28  ;;  %v835_v55 = vpop.xlane.xlu0 %834  ;;  %3563 = vpow2.f32 %v938_v17  ;;  %v6111_v17 = vld [vmem:[#allocation101_spill] sm:$0xff] }
 0x37b   : >> { %6107 = vst [vmem:[#allocation116_spill] sm:$0xff] %v5097_v21  ;;  %v6108_v24 = vmov %v5097_v21  ;;  %v3554_v5 = vpop.eup %3553  ;;  %v5108_v33 = vmax.f32 %v4243_v62, %v835_v55  }
 0x37c   : >> { %v915_v54 = vsub.f32 %v5010_v12, %v6108_v24  ;;  %v942_v6 = vmul.f32 1.442695, %v914_v15  ;;  %v837_v34 = vpop.xlane.xlu1 %836  ;;  %v1032_v31 = vpack.c.bf16 %v3552_v53, %v3554_v5  ;;  %v3556_v19 = vpop.eup %3555  ;;  %3565 = vpow2.f32 %v940_v35  ;;  %v6114_v35 = vld [vmem:[#allocation102_spill] sm:$0xff] }
 0x37d   : >> { %6109 = vst [vmem:[#allocation117_spill] sm:$0xff] %v5108_v33  ;;  %v6110_v1 = vmov %v5108_v33  ;;  %v5115_v2 = vmax.f32 %v4239_v47, %v837_v34   ;;  %978 = vadd.xlane.f32.xlu0 %v3556_v19 }
 0x37e   : >> { %v944_v9 = vmul.f32 1.442695, %v915_v54  ;;  %v916_v21 = vsub.f32 %v6111_v17, %v6110_v1  ;;  %2853 = vmatprep.mubr.bf16.mxu1 %v1032_v31  ;;  %v3558_v12 = vpop.eup %3557  ;;  %3567 = vpow2.f32 %v942_v6 }
 0x37f   : >> { %6112 = vst [vmem:[#allocation118_spill] sm:$0xff] %v5115_v2  ;;  %v6113_v16 = vmov %v5115_v2  ;;  %980 = vadd.xlane.f32.xlu1 %v3558_v12  ;;  %v1033_v33 = vpack.c.bf16 %v3558_v12, %v3556_v19 }
 0x380   : >> { %v946_v55 = vmul.f32 1.442695, %v916_v21  ;;  %v917_v54 = vsub.f32 %v6114_v35, %v6113_v16  ;;  %3569 = vpow2.f32 %v944_v9  ;;  %v3560_v22 = vpop.eup %3559 }
 0x381   : >> { %974 = vadd.xlane.f32.xlu0 %v3554_v5  ;;  %v3562_v17 = vpop.eup %3561  ;;  %2854 = vmatmul.mubr.bf16.gmra.mrb[4].mxu1 %v1033_v33  ;;  %v6118_v33 = vsub.f32 %v4287_v37, %v6086_v25 }
 0x382   : >> { %v948_v14 = vmul.f32 1.442695, %v917_v54  ;;  %3571 = vpow2.f32 %v946_v55  ;;  %v1034_v2 = vpack.c.bf16 %v3562_v17, %v3560_v22  ;;  %v6116_v55 = vld [vmem:[#allocation104_spill] sm:$0xff] }
 0x383   : >> { %976 = vadd.xlane.f32.xlu1 %v3552_v53 }
 0x384   : >> { %v3564_v34 = vpop.eup %3563  ;;  %3573 = vpow2.f32 %v948_v14  ;;  %2857 = vmatprep.mubr.bf16.mxu1 %v1034_v2  ;;  %v6115_v14 = vsub.f32 %v4291_v56, %v6082_v27  ;;  %v6119_v2 = vsub.f32 %v4295_v57, %v6088_v39  ;;  %v6120_v56 = vsub.f32 %v4275_v58, %v6094_v29  ;;  %v6124_v58 = vld [vmem:[#allocation108_spill] sm:$0xff] }
 0x385   : >> { %986 = vadd.xlane.f32.xlu0 %v3564_v34  ;;  %v6122_v57 = vsub.f32 %v4283_v36, %v6090_v40  ;;  %v6126_v36 = vsub.f32 %v4259_v60, %v6100_v7 }
 0x386   : >> { %v3566_v6 = vpop.eup %3565  ;;  %v874_v12 = vmul.f32 1.442695, %v6115_v14  ;;  %v6125_v14 = vsub.f32 %v4279_v59, %v6124_v58  ;;  %v6129_v59 = vsub.f32 %v4255_v45, %v6103_v52 }
 0x387   : >> { %988 = vadd.xlane.f32.xlu1 %v3566_v6  ;;  %v1035_v31 = vpack.c.bf16 %v3566_v6, %v3564_v34  ;;  %v872_v34 = vmul.f32 1.442695, %v6119_v2 }
 0x388   : >> { %v3568_v21 = vpop.eup %3567  ;;  %3575 = vpow2.f32 %v874_v12 }
 0x389   : >> { %982 = vadd.xlane.f32.xlu0 %v3560_v22  ;;  %2858 = vmatmul.mubr.bf16.gmra.mrb[8].mxu1 %v1035_v31  ;;  %v6117_v22 = vsub.f32 %v4299_v30, %v6116_v55  ;;  %v882_v31 = vmul.f32 1.442695, %v6120_v56  ;;  %v6121_v30 = vsub.f32 %v4271_v43, %v6096_v13  ;;  %v880_v43 = vmul.f32 1.442695, %v6125_v14 }
 0x38a   : >> { %v3570_v35 = vpop.eup %3569  ;;  %v6137_v14 = vsub.f32 %v4251_v44, %v6106_v28  ;;  %v6140_v44 = vsub.f32 %v4243_v62, %v6110_v1 }
 0x38b   : >> { %984 = vadd.xlane.f32.xlu1 %v3562_v17  ;;  %v1036_v19 = vpack.c.bf16 %v3570_v35, %v3568_v21  ;;  %v870_v54 = vmul.f32 1.442695, %v6117_v22  ;;  %v876_v17 = vmul.f32 1.442695, %v6118_v33 }
 0x38c   : >> { %v3572_v9 = vpop.eup %3571 }
 0x38d   : >> { %990 = vadd.xlane.f32.xlu0 %v3568_v21  ;;  %2861 = vmatprep.mubr.bf16.mxu1 %v1036_v19  ;;  %3577 = vpow2.f32 %v870_v54  ;;  %v884_v21 = vmul.f32 1.442695, %v6121_v30 }
 0x38e   : >> { %v3574_v5 = vpop.eup %3573  ;;  %3579 = vpow2.f32 %v876_v17  ;;  %v890_v17 = vmul.f32 1.442695, %v6126_v36 }
 0x38f   : >> { %992 = vadd.xlane.f32.xlu1 %v3570_v35  ;;  %v1037_v53 = vpack.c.bf16 %v3574_v5, %v3572_v9  ;;  %3581 = vpow2.f32 %v872_v34  ;;  %v892_v34 = vmul.f32 1.442695, %v6129_v59 }
 0x390   : >> { %3583 = vpow2.f32 %v882_v31  ;;  %v6130_v31 = vld [vmem:[#allocation111_spill] sm:$0xff] }
 0x391   : >> { %994 = vadd.xlane.f32.xlu0 %v3572_v9  ;;  %2862 = vmatmul.mubr.bf16.gmra.mrb[12].mxu1 %v1037_v53  ;;  %v878_v9 = vmul.f32 1.442695, %v6122_v57  ;;  %3585 = vpow2.f32 %v884_v21  ;;  %v6131_v30 = vmov %v6130_v31  ;;  %v6132_v21 = vsub.f32 %v4267_v42, %v6130_v31 }
 0x392   : >> { %v5133_v6 = vpop.eup %3575 }
 0x393   : >> { %996 = vadd.xlane.f32.xlu1 %v3574_v5  ;;  %v952_v37 = vmul.f32 %v4227_v41, %v5133_v6  ;;  %3587 = vpow2.f32 %v878_v9 }
 0x394   : >> { %3589 = vpow2.f32 %v880_v43  ;;  %v894_v43 = vmul.f32 1.442695, %v6137_v14 }
 0x395   : >> { %3591 = vpow2.f32 %v890_v17 }
 0x396   : >> { %3593 = vpow2.f32 %v892_v34 }
 0x397   : >> { %v5141_v35 = vpop.eup %3577 }
 0x398   : >> { %v5145_v19 = vpop.eup %3579  ;;  %v950_v22 = vmul.f32 %v4235_v46, %v5141_v35 }
 0x399   : >> { %v953_v54 = vmul.f32 %v4223_v49, %v5145_v19  ;;  %v5159_v33 = vpop.eup %3581 }
 0x39a   : >> { %v951_v56 = vmul.f32 %v4231_v38, %v5159_v33  ;;  %v5178_v57 = vpop.eup %3583 }
 0x39b   : >> { %v5183_v45 = vpop.eup %3585  ;;  %v956_v42 = vmul.f32 %v4211_v32, %v5178_v57 }
 0x39c   : >> { %v957_v36 = vmul.f32 %v4207_v51, %v5183_v45 }
 0x3fd   : >> { %v971_v5 = vpop.xlane.xlu0 %970 }
 0x3fe   : >> { %v5150_v41 = vadd.f32 %v971_v5, %v952_v37   ;;  %v886_v37 = vmul.f32 1.442695, %v6132_v21 }
 0x400   : >> { %6123 = vst [vmem:[#allocation119_spill] sm:$0xff] %v5150_v41  ;;  %3595 = vpow2.f32 %v886_v37 }
 0x401   : >> { %v967_v2 = vpop.xlane.xlu0 %966  ;;  %v973_v41 = vpop.xlane.xlu1 %972 }
 0x402   : >> { %v5164_v46 = vadd.f32 %v967_v2, %v950_v22   ;;  %v5166_v49 = vadd.f32 %v973_v41, %v953_v54   ;;  %v5190_v22 = vpop.eup %3587  ;;  %v898_v2 = vmul.f32 1.442695, %v6140_v44 }
 0x403   : >> { %v5199_v17 = vpop.eup %3589 }
 0x404   : >> { %6127 = vst [vmem:[#allocation120_spill] sm:$0xff] %v5164_v46  ;;  %6128 = vst [vmem:[#allocation121_spill] sm:$0xff] %v5166_v49  ;;  %v6134_v46 = vld [vmem:[#allocation112_spill] sm:$0xff]  ;;  %v5208_v59 = vpop.eup %3591  ;;  %v955_v62 = vmul.f32 %v4215_v26, %v5199_v17 }
 0x405   : >> { %v969_v60 = vpop.xlane.xlu1 %968  ;;  %v6135_v58 = vmov %v6134_v46  ;;  %v6136_v49 = vsub.f32 %v4263_v61, %v6134_v46  ;;  %v5217_v31 = vpop.eup %3593  ;;  %v960_v21 = vmul.f32 %v4195_v20, %v5208_v59 }
 0x406   : >> { %v5176_v38 = vadd.f32 %v969_v60, %v951_v56  }
 0x407   : >> { %v888_v9 = vmul.f32 1.442695, %v6136_v49 }
 0x408   : >> { %6133 = vst [vmem:[#allocation122_spill] sm:$0xff] %v5176_v38  ;;  %v6138_v38 = vsub.f32 %v4247_v63, %v6108_v24  ;;  %v954_v63 = vmul.f32 %v4219_v48, %v5190_v22 }
 0x409   : >> { %3597 = vpow2.f32 %v888_v9 }
 0x40a   : >> { %v896_v54 = vmul.f32 1.442695, %v6138_v38  ;;  %v979_v61 = vpop.xlane.xlu0 %978  ;;  %3599 = vpow2.f32 %v894_v43  ;;  %v3596_v37 = vpop.eup %3595 }
 0x40b   : >> { %v5195_v32 = vadd.f32 %v979_v61, %v956_v42   ;;  %v958_v49 = vmul.f32 %v4203_v50, %v3596_v37 }
 0x40c   : >> { %v981_v41 = vpop.xlane.xlu1 %980  ;;  %3601 = vpow2.f32 %v896_v54 }
 0x40d   : >> { %6139 = vst [vmem:[#allocation123_spill] sm:$0xff] %v5195_v32  ;;  %v5204_v51 = vadd.f32 %v981_v41, %v957_v36   ;;  %v6142_v32 = vsub.f32 %v4239_v47, %v6113_v16  ;;  %3603 = vpow2.f32 %v898_v2  ;;  %v961_v47 = vmul.f32 %v4191_v23, %v5217_v31 }
 0x40e   : >> { %v975_v56 = vpop.xlane.xlu0 %974 }
 0x40f   : >> { %6141 = vst [vmem:[#allocation124_spill] sm:$0xff] %v5204_v51  ;;  %v900_v34 = vmul.f32 1.442695, %v6142_v32  ;;  %v5213_v48 = vadd.f32 %v975_v56, %v954_v63   ;;  %v1016_v63 = vmul.f32 %v4163_v8, %v5133_v6  ;;  %v1014_v32 = vmul.f32 %v4171_v18, %v5141_v35 }
 0x410   : >> { %v977_v51 = vpop.xlane.xlu1 %976 }
 0x411   : >> { %6143 = vst [vmem:[#allocation125_spill] sm:$0xff] %v5213_v48  ;;  %v5219_v26 = vadd.f32 %v977_v51, %v955_v62   ;;  %3605 = vpow2.f32 %v900_v34  ;;  %v6154_v34 = vld [vmem:[#allocation97_spill] sm:$0xff]  ;;  %v6156_v62 = vld [vmem:[#allocation98_spill] sm:$0xff] }
 0x412   : >> { %v987_v60 = vpop.xlane.xlu0 %986  ;;  %v1017_v56 = vmul.f32 %v6154_v34, %v5145_v19  ;;  %v1015_v51 = vmul.f32 %v6156_v62, %v5159_v33 }
 0x413   : >> { %6144 = vst [vmem:[#allocation126_spill] sm:$0xff] %v5219_v26  ;;  %v5223_v20 = vadd.f32 %v987_v60, %v960_v21   ;;  %v3598_v48 = vpop.eup %3597  ;;  %v6159_v21 = vld [vmem:[#allocation96_spill] sm:$0xff] }
 0x414   : >> { %v989_v46 = vpop.xlane.xlu1 %988  ;;  %v3600_v9 = vpop.eup %3599  ;;  %v959_v26 = vmul.f32 %v4199_v0, %v3598_v48  ;;  %v1020_v35 = vmul.f32 %v6159_v21, %v5178_v57  ;;  %v6185_v21 = vld [vmem:[#allocation91_spill] sm:$0xff] }
 0x415   : >> { %6145 = vst [vmem:[#allocation127_spill] sm:$0xff] %v5223_v20  ;;  %v5227_v23 = vadd.f32 %v989_v46, %v961_v47   ;;  %v962_v20 = vmul.f32 %v4187_v4, %v3600_v9 }
 0x416   : >> { %v983_v14 = vpop.xlane.xlu0 %982  ;;  %v3602_v43 = vpop.eup %3601 }
 0x417   : >> { %6146 = vst [vmem:[#allocation128_spill] sm:$0xff] %v5227_v23  ;;  %v5230_v50 = vadd.f32 %v983_v14, %v958_v49   ;;  %v3604_v38 = vpop.eup %3603  ;;  %v963_v23 = vmul.f32 %v4183_v3, %v3602_v43 }
 0x418   : >> { %v985_v42 = vpop.xlane.xlu1 %984 }
 0x419   : >> { %6147 = vst [vmem:[#allocation129_spill] sm:$0xff] %v5230_v50  ;;  %v5233_v0 = vadd.f32 %v985_v42, %v959_v26   ;;  %v964_v50 = vmul.f32 %v4179_v11, %v3604_v38 }
 0x41a   : >> { %v991_v61 = vpop.xlane.xlu0 %990 }
 0x41b   : >> { %6148 = vst [vmem:[#allocation130_spill] sm:$0xff] %v5233_v0  ;;  %v5236_v4 = vadd.f32 %v991_v61, %v962_v20   ;;  %v3606_v36 = vpop.eup %3605  ;;  %v6167_v61 = vld [vmem:[#allocation93_spill] sm:$0xff] }
 0x41c   : >> { %v993_v44 = vpop.xlane.xlu1 %992  ;;  %v965_v41 = vmul.f32 %v4175_v10, %v3606_v36 }
 0x41d   : >> { %v6149_v7 = vmov %v5236_v4  ;;  %v5239_v3 = vadd.f32 %v993_v44, %v963_v23   ;;  %v6168_v44 = vld [vmem:[#allocation86_spill] sm:$0xff] }
 0x41e   : >> { %v995_v2 = vpop.xlane.xlu0 %994 }
 0x41f   : >> { %v6150_v52 = vmov %v5239_v3  ;;  %v5242_v11 = vadd.f32 %v995_v2, %v964_v50   ;;  %v1022_v50 = vmul.f32 %v6168_v44, %v3596_v37  ;;  %v6179_v37 = vld [vmem:[#allocation85_spill] sm:$0xff] }
 0x420   : >> { %v997_v0 = vpop.xlane.xlu1 %996  ;;  %v1026_v62 = vmul.f32 %v6179_v37, %v3600_v9  ;;  %v6232_v44 = vld [vmem:[#allocation115_spill] sm:$0xff]  ;;  %v6241_v37 = vld [vmem:[#allocation105_spill] sm:$0xff] }
 0x421   : >> { %v6151_v28 = vmov %v5242_v11  ;;  %v5245_v10 = vadd.f32 %v997_v0, %v965_v41  }
 0x423   : >> { %v6152_v24 = vmov %v5245_v10 }
 0x44b   : >> { %v2851_v4 = vpop.f32.mrb[0].mxu1 }
 0x44c   : >> { %v5251_v8 = vadd.f32 %v2851_v4, %v1016_v63   ;;  %v1072_v3 = vpop.f32.mrb[1].mxu1  ;;  %v6173_v63 = vld [vmem:[#allocation94_spill] sm:$0xff] }
 0x44d   : >> { %v5255_v18 = vadd.f32 %v1072_v3, %v1014_v32   ;;  %v2852_v11 = vpop.f32.mrb[2].mxu1  ;;  %v1023_v4 = vmul.f32 %v6173_v63, %v3598_v48  ;;  %v1027_v48 = vmul.f32 %v6185_v21, %v3602_v43  ;;  %v6231_v63 = vld [vmem:[#allocation116_spill] sm:$0xff]  ;;  %v6237_v43 = vld [vmem:[#allocation110_spill] sm:$0xff] }
 0x44e   : >> { %v6153_v1 = vmov %v5251_v8  ;;  %v5259_v14 = vadd.f32 %v2852_v11, %v1017_v56   ;;  %v1075_v10 = vpop.f32.mrb[3].mxu1  ;;  %v6160_v8 = vld [vmem:[#allocation88_spill] sm:$0xff]  ;;  %v6249_v43 = vld [vmem:[#allocation81_spill] sm:$0xff] (%p5308_p4) }
 0x44f   : >> { %v6155_v16 = vmov %v5255_v18  ;;  %v5261_v6 = vadd.f32 %v1075_v10, %v1015_v51   ;;  %v1018_v47 = vmul.f32 %v6160_v8, %v5190_v22  ;;  %v6162_v18 = vld [vmem:[#allocation95_spill] sm:$0xff]  ;;  %v1024_v22 = vmul.f32 %v6167_v61, %v5208_v59  ;;  %v6178_v59 = vld [vmem:[#allocation90_spill] sm:$0xff]  ;;  %v6182_v51 = vld [vmem:[#allocation89_spill] sm:$0xff] }
 0x450   : >> { %v6157_v5 = vmov %v5259_v14  ;;  %v1021_v46 = vmul.f32 %v6162_v18, %v5183_v45  ;;  %v6164_v14 = vld [vmem:[#allocation87_spill] sm:$0xff]  ;;  %v1028_v56 = vmul.f32 %v6178_v59, %v3604_v38  ;;  %v6210_v8 = vmov %v6153_v1  ;;  %v6227_v38 = vld [vmem:[#allocation122_spill] sm:$0xff]  ;;  %v6239_v59 = vld [vmem:[#allocation108_spill] sm:$0xff] }
 0x451   : >> { %v6158_v55 = vmov %v5261_v6  ;;  %v1019_v26 = vmul.f32 %v6164_v14, %v5199_v17  ;;  %v6209_v14 = vmov %v6157_v5  ;;  %v6212_v18 = vmov %v6155_v16  ;;  %v6250_v38 = vld [vmem:[#allocation80_spill] sm:$0xff] (%p5308_p4)  ;;  %v6253_v8 = vld [vmem:[#allocation82_spill] sm:$0xff] (%p5308_p4) }
 0x452   : >> { %v6235_v61 = vmov %v6135_v58  ;;  %v6238_v58 = vld [vmem:[#allocation109_spill] sm:$0xff]  ;;  %v1313_v18 = vlaneseq (%p5308_p4) }
 0x453   : > { %v3612_v58 = vld [vmem:[#allocation2 + $0xa8] sm:$0xff] (%p5308_p4)  }
 0x454   : >> { %v2855_v60 = vpop.f32.mrb[4].mxu1 }
 0x455   : >> { %v5267_v2 = vadd.f32 %v2855_v60, %v1020_v35   ;;  %v1088_v19 = vpop.f32.mrb[5].mxu1 }
 0x456   : >> { %v5271_v49 = vadd.f32 %v1088_v19, %v1018_v47   ;;  %v2856_v33 = vpop.f32.mrb[6].mxu1  ;;  %v6229_v47 = vld [vmem:[#allocation118_spill] sm:$0xff] }
 0x457   : >> { %v6161_v53 = vmov %v5267_v2  ;;  %v5275_v42 = vadd.f32 %v2856_v33, %v1021_v46   ;;  %v1091_v20 = vpop.f32.mrb[7].mxu1  ;;  %v6170_v2 = vld [vmem:[#allocation92_spill] sm:$0xff]  ;;  %v6228_v46 = vld [vmem:[#allocation120_spill] sm:$0xff] }
 0x458   : >> { %v6163_v15 = vmov %v5271_v49  ;;  %v5277_v57 = vadd.f32 %v1091_v20, %v1019_v26   ;;  %v1025_v41 = vmul.f32 %v6170_v2, %v5217_v31  ;;  %v1029_v31 = vmul.f32 %v6182_v51, %v3606_v36  ;;  %v6218_v20 = vld [vmem:[#allocation127_spill] sm:$0xff]  ;;  %v6221_v51 = vld [vmem:[#allocation124_spill] sm:$0xff]  ;;  %v6223_v26 = vld [vmem:[#allocation126_spill] sm:$0xff] }
 0x459   : >> { %v6165_v25 = vmov %v5275_v42  ;;  %v6206_v2 = vmov %v6161_v53  ;;  %6208 = vst [vmem:[#allocation88_spill] sm:$0xff] %v6163_v15  ;;  %v6225_v49 = vld [vmem:[#allocation121_spill] sm:$0xff]  ;;  %v6236_v42 = vmov %v6131_v30  ;;  %v6240_v36 = vld [vmem:[#allocation107_spill] sm:$0xff]  ;;  %v6244_v30 = vld [vmem:[#allocation104_spill] sm:$0xff]  ;;  %v1314_v46 = vand.u32 (%p5308_p4), 127, %v1313_v18 }
 0x45a   : >> { %v6166_v40 = vmov %v5277_v57  ;;  %v6243_v57 = vld [vmem:[#allocation106_spill] sm:$0xff]  ;;  %v3611_v30 = vld [vmem:[#allocation2 + $0xa0] sm:$0xff] (%p5308_p4)   ;;  %v6254_v47 = vld [vmem:[#allocation18_spill] sm:$0xff] (%p5308_p4) }
 0x45b   : >> { %6207 = vst [vmem:[#allocation87_spill] sm:$0xff] %v6166_v40  ;;  %v6252_v36 = vld [vmem:[#allocation84_spill] sm:$0xff] (%p5308_p4)  ;;  %v1316_v49 = vadd.s32 (%p5308_p4), 256, %v1314_v46 }
 0x45c   : >> { %v2859_v23 = vpop.f32.mrb[8].mxu1  ;;  %v6259_v18 = vld [vmem:[#allocation106_spill] sm:$0xff] (%p5308_p4) }
 0x45d   : >> { %v5282_v34 = vadd.f32 %v2859_v23, %v1024_v22   ;;  %v1104_v45 = vpop.f32.mrb[9].mxu1  ;;  %v6217_v23 = vld [vmem:[#allocation128_spill] sm:$0xff]  ;;  %vm1317_vm0 = vcmp.lt.s32.totalorder (%p5308_p4), %v1316_v49, 300 }
 0x45e   : >> { %v5286_v0 = vadd.f32 %v1104_v45, %v1022_v50   ;;  %v2860_v17 = vpop.f32.mrb[10].mxu1  ;;  %v6220_v50 = vld [vmem:[#allocation129_spill] sm:$0xff]  ;;  %v6233_v45 = vld [vmem:[#allocation114_spill] sm:$0xff] }
 0x45f   : >> { %v6169_v35 = vmov %v5282_v34  ;;  %v5289_v33 = vadd.f32 %v2860_v17, %v1025_v41   ;;  %v1107_v32 = vpop.f32.mrb[11].mxu1  ;;  %v6211_v17 = vmov %v6158_v55  ;;  %v6226_v41 = vld [vmem:[#allocation119_spill] sm:$0xff] }
 0x460   : >> { %6171 = vst [vmem:[#allocation131_spill] sm:$0xff] %v5286_v0  ;;  %v5291_v3 = vadd.f32 %v1107_v32, %v1023_v4   ;;  %v6203_v39 = vmov %v5286_v0  ;;  %v6216_v4 = vmov %v6149_v7  ;;  %v6219_v0 = vld [vmem:[#allocation130_spill] sm:$0xff]  ;;  %v6222_v32 = vld [vmem:[#allocation123_spill] sm:$0xff] }
 0x461   : >> { %6174 = vst [vmem:[#allocation132_spill] sm:$0xff] %v5289_v33  ;;  %v6175_v27 = vmov %v5289_v33  ;;  %6204 = vst [vmem:[#allocation86_spill] sm:$0xff] %v6203_v39 }
 0x462   : >> { %6176 = vst [vmem:[#allocation133_spill] sm:$0xff] %v5291_v3  ;;  %v6199_v33 = vmov %v6175_v27  ;;  %v6201_v29 = vmov %v5291_v3  ;;  %v6215_v3 = vmov %v6150_v52  ;;  %v6277_v27 = vld [vmem:[#allocation47_spill] sm:$0xff] (%p5308_p4) }
 0x463   : >> { %v6202_v9 = vmov %v6201_v29  ;;  %v3610_v29 = vld [vmem:[#allocation2 + $0x98] sm:$0xff] (%p5308_p4)  }
 0x464   : >> { %v2863_v11 = vpop.f32.mrb[12].mxu1  ;;  %v6248_v9 = vld [vmem:[#allocation83_spill] sm:$0xff] (%p5308_p4) }
 0x465   : >> { %v5295_v19 = vadd.f32 %v2863_v11, %v1028_v56   ;;  %v1120_v34 = vpop.f32.mrb[13].mxu1  ;;  %v6214_v11 = vmov %v6151_v28  ;;  %v6242_v56 = vld [vmem:[#allocation103_spill] sm:$0xff]  ;;  %590 = sbr.rel (!%p5308_p4) target bundleno = 439 (0x1b7), region = 104 }
 0x466   : >> { %v5298_v10 = vadd.f32 %v1120_v34, %v1026_v62   ;;  %v2864_v6 = vpop.f32.mrb[14].mxu1  ;;  %v6200_v34 = vmov %v6169_v35  ;;  %v6230_v62 = vld [vmem:[#allocation117_spill] sm:$0xff] }
 0x467   : >> { %6180 = vst [vmem:[#allocation134_spill] sm:$0xff] %v5295_v19  ;;  %v5301_v21 = vadd.f32 %v2864_v6, %v1029_v31   ;;  %v1123_v60 = vpop.f32.mrb[15].mxu1  ;;  %v6193_v22 = vmov %v5295_v19  ;;  %v6205_v31 = vmov %v6165_v25 }
 0x468   : >> { %6183 = vst [vmem:[#allocation135_spill] sm:$0xff] %v5298_v10  ;;  %v5303_v6 = vadd.f32 %v1123_v60, %v1027_v48   ;;  %v6194_v19 = vmov %v6193_v22  ;;  %v6197_v13 = vmov %v5298_v10  ;;  %v6213_v10 = vmov %v6152_v24  ;;  %v6224_v48 = vld [vmem:[#allocation125_spill] sm:$0xff] }
 0x469   : >> { %6186 = vst [vmem:[#allocation136_spill] sm:$0xff] %v5301_v21  ;;  %v6191_v54 = vmov %v5301_v21  ;;  %6198 = vst [vmem:[#allocation85_spill] sm:$0xff] %v6197_v13  ;;  %v6234_v60 = vld [vmem:[#allocation113_spill] sm:$0xff]  ;;  %v3608_v13 = vld [vmem:[#allocation2 + $0x88] sm:$0xff] (%p5308_p4)   ;;  %v6255_v19 = vunpack.c.l.s8.bf16 (%p5308_p4), %v6254_v47 }
 0x46a   : >> { %6188 = vst [vmem:[#allocation137_spill] sm:$0xff] %v5303_v6  ;;  %v6192_v21 = vmov %v6191_v54  ;;  %v6195_v12 = vmov %v5303_v6  ;;  %v6246_v54 = vld [vmem:[#allocation79_spill] sm:$0xff] (%p5308_p4) }
 0x46b   : >> { %v6196_v6 = vmov %v6195_v12  ;;  %v3607_v12 = vld [vmem:[#allocation2 + $0x80] sm:$0xff] (%p5308_p4)   ;;  %2881 = vmatprep.mubr.bf16.mxu0 (%p5308_p4), %v6246_v54  ;;  %v3609_v22 = vld [vmem:[#allocation2 + $0x90] sm:$0xff] (%p5308_p4)  }
 0x46c   : > { %2865 = vmatprep.subr.bf16.mxu0 %v3607_v12  ;;  %2897 = vmatprep.subr.bf16.mxu1 %v3607_v12  ;;  %v3613_v54 = vld [vmem:[#allocation2 + $0xb0] sm:$0xff]  }
 0x46d   : > { %2866 = vmatpush3.bf16.xpose.msra.mxu0 %v3607_v12  ;;  %2898 = vmatpush3.bf16.msra.mxu1 %v3607_v12  ;;  %v3614_v12 = vld [vmem:[#allocation2 + $0xb8] sm:$0xff]  }
 0x46e   : > { %2867 = vmatprep.subr.bf16.mxu0 %v3608_v13  ;;  %2899 = vmatprep.subr.bf16.mxu1 %v3608_v13 }
 0x471   : > { %2900 = vmatpush3.bf16.msra.mxu1 %v3608_v13 }
 0x472   : > { %2901 = vmatprep.subr.bf16.mxu1 %v3609_v22 }
 0x475   : > { %2868 = vmatpush3.bf16.xpose.msra.mxu0 %v3608_v13  ;;  %2902 = vmatpush3.bf16.msra.mxu1 %v3609_v22  ;;  %v6247_v13 = vld [vmem:[#allocation77_spill] sm:$0xff] }
 0x476   : > { %2869 = vmatprep.subr.bf16.mxu0 %v3609_v22  ;;  %2903 = vmatprep.subr.bf16.mxu1 %v3610_v29 }
 0x479   : > { %2904 = vmatpush3.bf16.msra.mxu1 %v3610_v29 }
 0x47a   : > { %2905 = vmatprep.subr.bf16.mxu1 %v3611_v30 }
 0x47d   : > { %2870 = vmatpush3.bf16.xpose.msra.mxu0 %v3609_v22  ;;  %2906 = vmatpush3.bf16.msra.mxu1 %v3611_v30 }
 0x47e   : > { %2871 = vmatprep.subr.bf16.mxu0 %v3610_v29  ;;  %2907 = vmatprep.subr.bf16.mxu1 %v3612_v58 }
 0x481   : > { %2908 = vmatpush3.bf16.msra.mxu1 %v3612_v58 }
 0x482   : > { %2909 = vmatprep.subr.bf16.mxu1 %v3613_v54 }
 0x485   : > { %2872 = vmatpush3.bf16.xpose.msra.mxu0 %v3610_v29  ;;  %2910 = vmatpush3.bf16.msra.mxu1 %v3613_v54  ;;  %v6251_v29 = vld [vmem:[#allocation78_spill] sm:$0xff] }
 0x486   : > { %2873 = vmatprep.subr.bf16.mxu0 %v3611_v30  ;;  %2911 = vmatprep.subr.bf16.mxu1 %v3614_v12 }
 0x489   : > { %2912 = vmatpush3.bf16.msra.mxu1 %v3614_v12 }
 0x48d   : > { %2874 = vmatpush3.bf16.xpose.msra.mxu0 %v3611_v30  ;;  %v6256_v30 = vld [vmem:[#allocation103_spill] sm:$0xff] }
 0x48e   : > { %2875 = vmatprep.subr.bf16.mxu0 %v3612_v58 }
 0x495   : > { %2876 = vmatpush3.bf16.xpose.msra.mxu0 %v3612_v58 }
 0x496   : > { %2877 = vmatprep.subr.bf16.mxu0 %v3613_v54 }
 0x49d   : > { %2878 = vmatpush3.bf16.xpose.msra.mxu0 %v3613_v54 }
 0x49e   : > { %2879 = vmatprep.subr.bf16.mxu0 %v3614_v12 }
 0x4a5   : > { %2880 = vmatpush3.bf16.xpose.msra.mxu0 %v3614_v12  ;;  %v6257_v12 = vld [vmem:[#allocation104_spill] sm:$0xff] }
 0x4ac   : > { %2882 = vmatmul.mubr.bf16.vlgmr.msra.gmra.mrb[0].mxu0 %v6247_v13 }
 0x4ad   : > { %2885 = vmatprep.mubr.bf16.mxu0 %v6248_v9 }
 0x4b4   : > { %2886 = vmatmul.mubr.bf16.gmra.mrb[4].mxu0 %v6249_v43 }
 0x4b5   : > { %2889 = vmatprep.mubr.bf16.mxu0 %v6250_v38 }
 0x4bc   : > { %2890 = vmatmul.mubr.bf16.gmra.mrb[8].mxu0 %v6251_v29  ;;  %v6258_v29 = vld [vmem:[#allocation105_spill] sm:$0xff] }
 0x4bd   : > { %2893 = vmatprep.mubr.bf16.mxu0 %v6252_v36 }
 0x4c4   : > { %2894 = vmatmul.mubr.bf16.gmra.mrb[12].mxu0 %v6253_v8 }
 0x4c5   : > { %2056 = vmatprep.mubr.bf16.mxu0 %v6255_v19 }
 0x57f   : > { %v2883_v33 = vpop.f32.mrb[0].mxu0 }
 0x580   : > { %v1250_v14 = vpop.f32.mrb[1].mxu0  ;;  %v1320_v26 = vsel %vm1317_vm0, %v2883_v33, -1e+30 }
 0x581   : > { %1338 = vmax.xlane.f32.xlu1 %v1320_v26  ;;  %v2884_v42 = vpop.f32.mrb[2].mxu0  ;;  %v1318_v20 = vsel %vm1317_vm0, %v1250_v14, -1e+30 }
 0x582   : > { %1334 = vmax.xlane.f32.xlu0 %v1318_v20  ;;  %v1253_v57 = vpop.f32.mrb[3].mxu0  ;;  %v1321_v61 = vsel %vm1317_vm0, %v2884_v42, -1e+30 }
 0x583   : > { %v1319_v23 = vsel %vm1317_vm0, %v1253_v57, -1e+30 }
 0x585   : > { %1340 = vmax.xlane.f32.xlu1 %v1321_v61 }
 0x586   : > { %1336 = vmax.xlane.f32.xlu0 %v1319_v23 }
 0x587   : > { %v2887_v44 = vpop.f32.mrb[4].mxu0 }
 0x588   : > { %v1266_v50 = vpop.f32.mrb[5].mxu0  ;;  %v5479_v17 = vsel %vm1317_vm0, %v2887_v44, -1e+30  ;;  %v6260_v44 = vld [vmem:[#allocation107_spill] sm:$0xff] }
 0x589   : > { %v2888_v45 = vpop.f32.mrb[6].mxu0  ;;  %v1322_v2 = vsel %vm1317_vm0, %v1266_v50, -1e+30 }
 0x58a   : > { %1342 = vmax.xlane.f32.xlu0 %v1322_v2  ;;  %v1269_v41 = vpop.f32.mrb[7].mxu0  ;;  %v5483_v4 = vsel %vm1317_vm0, %v2888_v45, -1e+30 }
 0x58b   : > { %v1323_v0 = vsel %vm1317_vm0, %v1269_v41, -1e+30  ;;  %v6261_v41 = vld [vmem:[#allocation108_spill] sm:$0xff] }
 0x58c   : > { %1344 = vmax.xlane.f32.xlu1 %v1323_v0 }
 0x58e   : > { %1346 = vmax.xlane.f32.xlu0 %v5479_v17 }
 0x58f   : > { %v2891_v63 = vpop.f32.mrb[8].mxu0 }
 0x590   : > { %1348 = vmax.xlane.f32.xlu1 %v5483_v4  ;;  %v1282_v32 = vpop.f32.mrb[9].mxu0  ;;  %v5495_v37 = vsel %vm1317_vm0, %v2891_v63, -1e+30 }
 0x591   : > { %v2892_v3 = vpop.f32.mrb[10].mxu0  ;;  %v5487_v59 = vsel %vm1317_vm0, %v1282_v32, -1e+30 }
 0x592   : > { %1350 = vmax.xlane.f32.xlu0 %v5487_v59  ;;  %v1285_v56 = vpop.f32.mrb[11].mxu0  ;;  %v5499_v22 = vsel %vm1317_vm0, %v2892_v3, -1e+30  ;;  %v6262_v3 = vld [vmem:[#allocation109_spill] sm:$0xff] }
 0x593   : > { %v5491_v11 = vsel %vm1317_vm0, %v1285_v56, -1e+30 }
 0x594   : > { %1352 = vmax.xlane.f32.xlu1 %v5491_v11 }
 0x596   : > { %1354 = vmax.xlane.f32.xlu0 %v5495_v37 }
 0x597   : > { %v2895_v62 = vpop.f32.mrb[12].mxu0 }
 0x598   : > { %1356 = vmax.xlane.f32.xlu1 %v5499_v22  ;;  %v1298_v34 = vpop.f32.mrb[13].mxu0  ;;  %v5511_v21 = vsel %vm1317_vm0, %v2895_v62, -1e+30 }
 0x599   : > { %v2896_v51 = vpop.f32.mrb[14].mxu0  ;;  %v5503_v31 = vsel %vm1317_vm0, %v1298_v34, -1e+30  ;;  %v6263_v34 = vld [vmem:[#allocation110_spill] sm:$0xff] }
 0x59a   : > { %1358 = vmax.xlane.f32.xlu0 %v5503_v31  ;;  %v1301_v10 = vpop.f32.mrb[15].mxu0  ;;  %v5515_v48 = vsel %vm1317_vm0, %v2896_v51, -1e+30 }
 0x59b   : > { %v5507_v6 = vsel %vm1317_vm0, %v1301_v10, -1e+30 }
 0x59c   : > { %1360 = vmax.xlane.f32.xlu1 %v5507_v6 }
 0x59e   : > { %1362 = vmax.xlane.f32.xlu0 %v5511_v21 }
 0x5a0   : > { %1364 = vmax.xlane.f32.xlu1 %v5515_v48 }
 0x60e   : > { %v1339_v60 = vpop.xlane.xlu1 %1338 }
 0x60f   : > { %v5519_v58 = vmax.f32 %v6256_v30, %v1339_v60  ;;  %v1335_v54 = vpop.xlane.xlu0 %1334 }
 0x610   : > { %v5522_v13 = vmax.f32 %v6257_v12, %v1335_v54 }
 0x611   : > { %v1432_v9 = vsub.f32 %v1320_v26, %v5519_v58 }
 0x612   : > { %v1430_v43 = vsub.f32 %v1318_v20, %v5522_v13  ;;  %v1341_v38 = vpop.xlane.xlu1 %1340 }
 0x613   : > { %v5527_v36 = vmax.f32 %v6258_v29, %v1341_v38  ;;  %v1337_v8 = vpop.xlane.xlu0 %1336  ;;  %v1450_v33 = vmul.f32 1.442695, %v1432_v9  ;;  %v6264_v9 = vld [vmem:[#allocation111_spill] sm:$0xff] }
 0x614   : > { %v1446_v19 = vmul.f32 1.442695, %v1430_v43  ;;  %v5530_v46 = vmax.f32 %v6259_v18, %v1337_v8 }
 0x615   : > { %v1433_v49 = vsub.f32 %v1321_v61, %v5527_v36 }
 0x616   : > { %v1431_v14 = vsub.f32 %v1319_v23, %v5530_v46  ;;  %3623 = vpow2.f32 %v1446_v19 }
 0x617   : > { %v1452_v42 = vmul.f32 1.442695, %v1433_v49  ;;  %v1343_v57 = vpop.xlane.xlu0 %1342  ;;  %3625 = vpow2.f32 %v1450_v33  ;;  %v6265_v33 = vld [vmem:[#allocation112_spill] sm:$0xff] }
 0x618   : > { %v1448_v26 = vmul.f32 1.442695, %v1431_v14  ;;  %v5535_v20 = vmax.f32 %v6260_v44, %v1343_v57 }
 0x619   : > { %v1345_v50 = vpop.xlane.xlu1 %1344  ;;  %3627 = vpow2.f32 %v1452_v42 }
 0x61a   : > { %v1434_v45 = vsub.f32 %v1322_v2, %v5535_v20  ;;  %v5539_v63 = vmax.f32 %v6261_v41, %v1345_v50  ;;  %3629 = vpow2.f32 %v1448_v26 }
 0x61b   : > { %v1347_v32 = vpop.xlane.xlu0 %1346 }
 0x61c   : > { %v1454_v61 = vmul.f32 1.442695, %v1434_v45  ;;  %v1435_v23 = vsub.f32 %v1323_v0, %v5539_v63  ;;  %v5543_v56 = vmax.f32 %v6262_v3, %v1347_v32 }
 0x61d   : > { %v1349_v62 = vpop.xlane.xlu1 %1348 }
 0x61e   : > { %v5546_v51 = vmax.f32 %v6263_v34, %v1349_v62  ;;  %3631 = vpow2.f32 %v1454_v61  ;;  %v1456_v10 = vmul.f32 1.442695, %v1435_v23  ;;  %v1436_v2 = vsub.f32 %v5479_v17, %v5543_v56  ;;  %v6267_v23 = vld [vmem:[#allocation114_spill] sm:$0xff] }
 0x61f   : > { %v1351_v60 = vpop.xlane.xlu0 %1350 }
 0x620   : > { %v1437_v54 = vsub.f32 %v5483_v4, %v5546_v51  ;;  %v5553_v43 = vmax.f32 %v6264_v9, %v1351_v60  ;;  %3633 = vpow2.f32 %v1456_v10  ;;  %v1458_v0 = vmul.f32 1.442695, %v1436_v2  ;;  %v3624_v8 = vpop.eup %3623  ;;  %v6266_v4 = vld [vmem:[#allocation113_spill] sm:$0xff] }
 0x621   : > { %v1353_v38 = vpop.xlane.xlu1 %1352  ;;  %1494 = vadd.xlane.f32.xlu0 %v3624_v8  ;;  %v3626_v42 = vpop.eup %3625 }
 0x622   : > { %v1460_v19 = vmul.f32 1.442695, %v1437_v54  ;;  %v1438_v49 = vsub.f32 %v5487_v59, %v5553_v43  ;;  %v5558_v14 = vmax.f32 %v6265_v33, %v1353_v38  ;;  %3635 = vpow2.f32 %v1458_v0 }
 0x623   : > { %v1355_v17 = vpop.xlane.xlu0 %1354  ;;  %v3628_v50 = vpop.eup %3627 }
 0x624   : > { %v1462_v57 = vmul.f32 1.442695, %v1438_v49  ;;  %v5561_v26 = vmax.f32 %v6266_v4, %v1355_v17  ;;  %v1439_v45 = vsub.f32 %v5491_v11, %v5558_v14  ;;  %v3630_v61 = vpop.eup %3629  ;;  %3637 = vpow2.f32 %v1460_v19  ;;  %v6268_v19 = vld [vmem:[#allocation115_spill] sm:$0xff]  ;;  %v6269_v17 = vld [vmem:[#allocation116_spill] sm:$0xff] }
 0x625   : > { %v1357_v32 = vpop.xlane.xlu1 %1356  ;;  %1498 = vadd.xlane.f32.xlu0 %v3626_v42  ;;  %1496 = vadd.xlane.f32.xlu1 %v3630_v61  ;;  %v1558_v2 = vpack.c.bf16 %v3630_v61, %v3624_v8  ;;  %v1559_v0 = vpack.c.bf16 %v3628_v50, %v3626_v42  ;;  %v6270_v61 = vld [vmem:[#allocation117_spill] sm:$0xff] }
 0x626   : > { %v1440_v59 = vsub.f32 %v5495_v37, %v5561_v26  ;;  %v5568_v62 = vmax.f32 %v6267_v23, %v1357_v32  ;;  %v1464_v10 = vmul.f32 1.442695, %v1439_v45  ;;  %3639 = vpow2.f32 %v1462_v57 }
 0x627   : > { %v1359_v60 = vpop.xlane.xlu0 %1358  ;;  %2913 = vmatprep.mubr.bf16.mxu1 %v1558_v2 }
 0x628   : > { %v1466_v54 = vmul.f32 1.442695, %v1440_v59  ;;  %v3632_v38 = vpop.eup %3631  ;;  %v1441_v11 = vsub.f32 %v5499_v22, %v5568_v62  ;;  %v5573_v49 = vmax.f32 %v6268_v19, %v1359_v60  ;;  %3641 = vpow2.f32 %v1464_v10  ;;  %2914 = vmatmul.mubr.bf16.vlgmr.msra.gmra.mrb[0].mxu1 %v1559_v0 }
 0x629   : > { %v1361_v37 = vpop.xlane.xlu1 %1360  ;;  %1502 = vadd.xlane.f32.xlu0 %v3632_v38  ;;  %1500 = vadd.xlane.f32.xlu1 %v3628_v50 }
 0x62a   : > { %v5576_v45 = vmax.f32 %v6269_v17, %v1361_v37  ;;  %v3634_v32 = vpop.eup %3633  ;;  %v1468_v8 = vmul.f32 1.442695, %v1441_v11  ;;  %v1442_v57 = vsub.f32 %v5503_v31, %v5573_v49  ;;  %3643 = vpow2.f32 %v1466_v54  ;;  %v6271_v31 = vld [vmem:[#allocation118_spill] sm:$0xff] }
 0x62b   : > { %v1363_v42 = vpop.xlane.xlu0 %1362  ;;  %v1560_v2 = vpack.c.bf16 %v3634_v32, %v3632_v38 }
 0x62c   : > { %v1443_v22 = vsub.f32 %v5507_v6, %v5576_v45  ;;  %v5583_v59 = vmax.f32 %v6270_v61, %v1363_v42  ;;  %v1470_v10 = vmul.f32 1.442695, %v1442_v57  ;;  %v3636_v0 = vpop.eup %3635  ;;  %3645 = vpow2.f32 %v1468_v8 }
 0x62d   : > { %v1365_v60 = vpop.xlane.xlu1 %1364  ;;  %2917 = vmatprep.mubr.bf16.mxu1 %v1560_v2  ;;  %1506 = vadd.xlane.f32.xlu0 %v3636_v0 }
 0x62e   : > { %v1472_v37 = vmul.f32 1.442695, %v1443_v22  ;;  %v1444_v11 = vsub.f32 %v5511_v21, %v5583_v59  ;;  %v5588_v50 = vmax.f32 %v6271_v31, %v1365_v60  ;;  %v3638_v54 = vpop.eup %3637  ;;  %3647 = vpow2.f32 %v1470_v10  ;;  %1504 = vadd.xlane.f32.xlu1 %v3634_v32 }
 0x62f   : > { %v1561_v42 = vpack.c.bf16 %v3638_v54, %v3636_v0 }
 0x630   : > { %v1474_v6 = vmul.f32 1.442695, %v1444_v11  ;;  %v1445_v57 = vsub.f32 %v5515_v48, %v5588_v50  ;;  %v3640_v38 = vpop.eup %3639  ;;  %3649 = vpow2.f32 %v1472_v37 }
 0x631   : > { %1510 = vadd.xlane.f32.xlu0 %v3640_v38  ;;  %2918 = vmatmul.mubr.bf16.gmra.mrb[4].mxu1 %v1561_v42  ;;  %v6274_v42 = vld [vmem:[#allocation30_spill] sm:$0xff] }
 0x632   : > { %v1476_v8 = vmul.f32 1.442695, %v1445_v57  ;;  %v3642_v22 = vpop.eup %3641  ;;  %3651 = vpow2.f32 %v1474_v6  ;;  %1508 = vadd.xlane.f32.xlu1 %v3638_v54  ;;  %v6272_v6 = vld [vmem:[#allocation46_spill] sm:$0xff]  ;;  %v6273_v57 = vld [vmem:[#allocation45_spill] sm:$0xff] }
 0x633   : > { %v1562_v21 = vpack.c.bf16 %v3642_v22, %v3640_v38  ;;  %v2571_v38 = vcombine.low %v6273_v57, %v6272_v6  ;;  %v3617_v6 = vld [vmem:[#allocation8 + $0x10] sm:$0xff]   ;;  %v6282_v57 = vld [vmem:[#allocation34_spill] sm:$0xff] }
 0x634   : > { %v3644_v2 = vpop.eup %3643  ;;  %3653 = vpow2.f32 %v1476_v8  ;;  %v6275_v8 = vld [vmem:[#allocation29_spill] sm:$0xff] }
 0x635   : > { %2921 = vmatprep.mubr.bf16.mxu1 %v1562_v21  ;;  %1514 = vadd.xlane.f32.xlu0 %v3644_v2  ;;  %v3615_v21 = vld [vmem:[#allocation8] sm:$0xff]  }
 0x636   : > { %v3646_v10 = vpop.eup %3645  ;;  %1512 = vadd.xlane.f32.xlu1 %v3642_v22  ;;  %v2563_v22 = vcombine.low %v6275_v8, %v6274_v42  ;;  %2689 = vmatprep.subr.bf16.mxu0 %v2571_v38  ;;  %v6283_v42 = vld [vmem:[#allocation33_spill] sm:$0xff]  ;;  %v6285_v38 = vld [vmem:[#allocation51_spill] sm:$0xff] }
 0x637   : > { %v1563_v32 = vpack.c.bf16 %v3646_v10, %v3644_v2  ;;  %v6276_v2 = vld [vmem:[#allocation48_spill] sm:$0xff]  ;;  %2929 = vmatprep.subr.bf16.mxu1 %v3615_v21  ;;  %v2565_v8 = vcombine.low %v6283_v42, %v6282_v57 }
 0x638   : > { %v3648_v60 = vpop.eup %3647  ;;  %2690 = vmatpush3.bf16.msra.mxu0 %v2563_v22  ;;  %2930 = vmatpush3.bf16.msra.mxu1 %v3615_v21  ;;  %v3618_v21 = vld [vmem:[#allocation8 + $0x18] sm:$0xff]  }
 0x639   : > { %1518 = vadd.xlane.f32.xlu0 %v3648_v60  ;;  %2922 = vmatmul.mubr.bf16.gmra.mrb[8].mxu1 %v1563_v32  ;;  %v2572_v32 = vcombine.low %v6277_v27, %v6276_v2  ;;  %v6284_v27 = vld [vmem:[#allocation52_spill] sm:$0xff] }
 0x63a   : > { %v3650_v48 = vpop.eup %3649  ;;  %1516 = vadd.xlane.f32.xlu1 %v3646_v10  ;;  %v3616_v10 = vld [vmem:[#allocation8 + $0x8] sm:$0xff]   ;;  %v2574_v22 = vcombine.low %v6285_v38, %v6284_v27  ;;  %v6286_v2 = vld [vmem:[#allocation36_spill] sm:$0xff]  ;;  %v6293_v27 = vld [vmem:[#allocation55_spill] sm:$0xff] }
 0x63b   : > { %v1564_v0 = vpack.c.bf16 %v3650_v48, %v3648_v60  ;;  %v6278_v60 = vld [vmem:[#allocation32_spill] sm:$0xff]  ;;  %2691 = vmatprep.subr.bf16.mxu0 %v2572_v32  ;;  %2931 = vmatprep.subr.bf16.mxu1 %v3616_v10  ;;  %v6287_v32 = vld [vmem:[#allocation35_spill] sm:$0xff] }
 0x63c   : > { %v3652_v37 = vpop.eup %3651  ;;  %2932 = vmatpush3.bf16.msra.mxu1 %v3616_v10  ;;  %v3619_v10 = vld [vmem:[#allocation8 + $0x20] sm:$0xff]   ;;  %v6292_v42 = vld [vmem:[#allocation56_spill] sm:$0xff] }
 0x63d   : > { %1522 = vadd.xlane.f32.xlu0 %v3652_v37  ;;  %2925 = vmatprep.mubr.bf16.mxu1 %v1564_v0  ;;  %v6294_v38 = vld [vmem:[#allocation40_spill] sm:$0xff] }
 0x63e   : > { %v3654_v11 = vpop.eup %3653  ;;  %1520 = vadd.xlane.f32.xlu1 %v3650_v48  ;;  %v6279_v48 = vld [vmem:[#allocation31_spill] sm:$0xff]  ;;  %2933 = vmatprep.subr.bf16.mxu1 %v3617_v6 }
 0x63f   : > { %v1565_v54 = vpack.c.bf16 %v3654_v11, %v3652_v37  ;;  %v2564_v0 = vcombine.low %v6279_v48, %v6278_v60  ;;  %v6280_v37 = vld [vmem:[#allocation50_spill] sm:$0xff]  ;;  %v2566_v60 = vcombine.low %v6287_v32, %v6286_v2 }
 0x640   : > { %2934 = vmatpush3.bf16.msra.mxu1 %v3617_v6  ;;  %v6288_v48 = vld [vmem:[#allocation54_spill] sm:$0xff] }
 0x641   : > { %2926 = vmatmul.mubr.bf16.gmra.mrb[12].mxu1 %v1565_v54  ;;  %2692 = vmatpush3.bf16.msra.mxu0 %v2564_v0  ;;  %v3620_v6 = vld [vmem:[#allocation8 + $0x28] sm:$0xff]  }
 0x642   : > { %1524 = vadd.xlane.f32.xlu1 %v3654_v11  ;;  %v6281_v11 = vld [vmem:[#allocation49_spill] sm:$0xff]  ;;  %2935 = vmatprep.subr.bf16.mxu1 %v3618_v21  ;;  %v6296_v32 = vld [vmem:[#allocation58_spill] sm:$0xff] }
 0x643   : > { %v2573_v54 = vcombine.low %v6281_v11, %v6280_v37  ;;  %v6289_v37 = vld [vmem:[#allocation53_spill] sm:$0xff]  ;;  %v6290_v11 = vld [vmem:[#allocation38_spill] sm:$0xff] }
 0x644   : > { %v2575_v0 = vcombine.low %v6289_v37, %v6288_v48  ;;  %2936 = vmatpush3.bf16.msra.mxu1 %v3618_v21  ;;  %v6297_v48 = vld [vmem:[#allocation57_spill] sm:$0xff]  ;;  %v6298_v21 = vld [vmem:[#allocation42_spill] sm:$0xff] }
 0x645   : > { %2693 = vmatprep.subr.bf16.mxu0 %v2573_v54  ;;  %v6291_v54 = vld [vmem:[#allocation37_spill] sm:$0xff]  ;;  %2937 = vmatprep.subr.bf16.mxu1 %v3619_v10 }
 0x646   : > { %2694 = vmatpush3.bf16.msra.mxu0 %v2565_v8  ;;  %v2567_v57 = vcombine.low %v6291_v54, %v6290_v11  ;;  %v2576_v8 = vcombine.low %v6293_v27, %v6292_v42  ;;  %v6299_v37 = vld [vmem:[#allocation41_spill] sm:$0xff]  ;;  %v3621_v11 = vld [vmem:[#allocation8 + $0x30] sm:$0xff]   ;;  %v6300_v54 = vld [vmem:[#allocation60_spill] sm:$0xff] }
 0x647   : > { %2695 = vmatprep.subr.bf16.mxu0 %v2574_v22  ;;  %v6295_v22 = vld [vmem:[#allocation39_spill] sm:$0xff] }
 0x648   : > { %2938 = vmatpush3.bf16.msra.mxu1 %v3619_v10  ;;  %v2568_v2 = vcombine.low %v6295_v22, %v6294_v38  ;;  %v6301_v42 = vld [vmem:[#allocation59_spill] sm:$0xff]  ;;  %v6302_v10 = vld [vmem:[#allocation44_spill] sm:$0xff]  ;;  %v6306_v22 = vunpack.c.h.s8.bf16 %v6254_v47 }
 0x649   : > { %2939 = vmatprep.subr.bf16.mxu1 %v3620_v6  ;;  %v6303_v27 = vld [vmem:[#allocation43_spill] sm:$0xff]  ;;  %v3622_v38 = vld [vmem:[#allocation8 + $0x38] sm:$0xff]  }
 0x64a   : > { %2696 = vmatpush3.bf16.msra.mxu0 %v2566_v60  ;;  %v2577_v60 = vcombine.low %v6297_v48, %v6296_v32  ;;  %v2570_v39 = vcombine.low %v6303_v27, %v6302_v10  ;;  %v6308_v32 = vld [vmem:[#allocation61_spill] sm:$0xff] }
 0x64b   : > { %2697 = vmatprep.subr.bf16.mxu0 %v2575_v0  ;;  %v2569_v0 = vcombine.low %v6299_v37, %v6298_v21  ;;  %v6310_v21 = vld [vmem:[#allocation21_spill] sm:$0xff] }
 0x64c   : > { %2940 = vmatpush3.bf16.msra.mxu1 %v3620_v6  ;;  %v6311_v37 = vunpack.c.l.s8.bf16 %v6310_v21 }
 0x64d   : > { %2941 = vmatprep.subr.bf16.mxu1 %v3621_v11 }
 0x64e   : > { %2698 = vmatpush3.bf16.msra.mxu0 %v2567_v57  ;;  %v2578_v57 = vcombine.low %v6301_v42, %v6300_v54  ;;  %v6316_v54 = vld [vmem:[#allocation24_spill] sm:$0xff] }
 0x64f   : > { %2699 = vmatprep.subr.bf16.mxu0 %v2576_v8  ;;  %v6304_v8 = vld [vmem:[#allocation17_spill] sm:$0xff]  ;;  %v6317_v42 = vunpack.c.l.s8.bf16 %v6316_v54  ;;  %v6320_v27 = vunpack.c.h.s8.bf16 %v6316_v54 }
 0x650   : > { %2942 = vmatpush3.bf16.msra.mxu1 %v3621_v11  ;;  %v6305_v6 = vunpack.c.l.s8.bf16 %v6304_v8  ;;  %v6314_v11 = vunpack.c.h.s8.bf16 %v6310_v21  ;;  %v1384_v21 = vsub.f32 %v6256_v30, %v5519_v58  ;;  %v1388_v30 = vsub.f32 %v6262_v3, %v5543_v56 }
 0x651   : > { %2943 = vmatprep.subr.bf16.mxu1 %v3622_v38  ;;  %v1391_v3 = vsub.f32 %v6265_v33, %v5558_v14  ;;  %v6328_v14 = vld [vmem:[#allocation119_spill] sm:$0xff] }
 0x652   : > { %2700 = vmatpush3.bf16.msra.mxu0 %v2568_v2  ;;  %v6307_v2 = vld [vmem:[#allocation62_spill] sm:$0xff] }
 0x653   : > { %2701 = vmatprep.subr.bf16.mxu0 %v2577_v60  ;;  %v5630_v48 = vcombine.low %v6308_v32, %v6307_v2  ;;  %v6309_v60 = vunpack.c.h.s8.bf16 %v6304_v8  ;;  %v6322_v8 = vld [vmem:[#allocation27_spill] sm:$0xff] }
 0x654   : > { %2944 = vmatpush3.bf16.msra.mxu1 %v3622_v38  ;;  %v6326_v32 = vunpack.c.h.s8.bf16 %v6322_v8 }
 0x655   : > { %2961 = vmatprep.subr.bf16.mxu1 %v5630_v48 }
 0x656   : > { %2702 = vmatpush3.bf16.msra.mxu0 %v2569_v0 }
 0x657   : > { %2703 = vmatprep.subr.bf16.mxu0 %v2578_v57  ;;  %v6318_v57 = vld [vmem:[#allocation23_spill] sm:$0xff] }
 0x658   : > { %v6319_v10 = vunpack.c.l.s8.bf16 %v6318_v57  ;;  %v6321_v38 = vunpack.c.h.s8.bf16 %v6318_v57 }
 0x65a   : > { %2704 = vmatpush3.bf16.msra.mxu0 %v2570_v39  ;;  %v6312_v39 = vld [vmem:[#allocation20_spill] sm:$0xff] }
 0x65b   : > { %v6313_v0 = vunpack.c.l.s8.bf16 %v6312_v39  ;;  %v6315_v47 = vunpack.c.h.s8.bf16 %v6312_v39  ;;  %v1385_v39 = vsub.f32 %v6258_v29, %v5527_v36  ;;  %v1387_v36 = vsub.f32 %v6261_v41, %v5539_v63 }
 0x65d   : > { %2057 = vmatmul.mubr.bf16.vlgmr.msra.gmra.mrb[16].mxu0 %v6305_v6  ;;  %v6323_v6 = vunpack.c.l.s8.bf16 %v6322_v8  ;;  %v1408_v8 = vmul.f32 1.442695, %v1387_v36 }
 0x65e   : > { %2064 = vmatprep.mubr.bf16.mxu0 %v6306_v22  ;;  %v6324_v22 = vld [vmem:[#allocation26_spill] sm:$0xff] }
 0x65f   : > { %v6325_v2 = vunpack.c.l.s8.bf16 %v6324_v22 }
 0x665   : > { %2065 = vmatmul.mubr.bf16.gmra.mrb[20].mxu0 %v6309_v60  ;;  %v6327_v60 = vunpack.c.h.s8.bf16 %v6324_v22 }
 0x666   : > { %2072 = vmatprep.mubr.bf16.mxu0 %v6311_v37  ;;  %v1382_v37 = vsub.f32 %v6257_v12, %v5522_v13  ;;  %v1386_v12 = vsub.f32 %v6260_v44, %v5535_v20  ;;  %v1389_v13 = vsub.f32 %v6263_v34, %v5546_v51  ;;  %v1392_v44 = vsub.f32 %v6266_v4, %v5561_v26  ;;  %v6329_v4 = vld [vmem:[#allocation120_spill] sm:$0xff] }
 0x667   : > { %v1393_v34 = vsub.f32 %v6267_v23, %v5568_v62  ;;  %v6330_v23 = vld [vmem:[#allocation121_spill] sm:$0xff] }
 0x668   : > { %v1398_v54 = vmul.f32 1.442695, %v1382_v37  ;;  %v1418_v33 = vmul.f32 1.442695, %v1392_v44  ;;  %v6331_v37 = vld [vmem:[#allocation122_spill] sm:$0xff] }
 0x669   : > { %v6335_v44 = vld [vmem:[#allocation126_spill] sm:$0xff] }
 0x66d   : > { %2073 = vmatmul.mubr.bf16.gmra.mrb[24].mxu0 %v6313_v0  ;;  %v1383_v0 = vsub.f32 %v6259_v18, %v5530_v46  ;;  %v1410_v18 = vmul.f32 1.442695, %v1388_v30  ;;  %v1406_v46 = vmul.f32 1.442695, %v1386_v12  ;;  %v1395_v30 = vsub.f32 %v6269_v17, %v5576_v45  ;;  %v6332_v45 = vld [vmem:[#allocation123_spill] sm:$0xff] }
 0x66e   : > { %2080 = vmatprep.mubr.bf16.mxu0 %v6314_v11  ;;  %v1402_v11 = vmul.f32 1.442695, %v1384_v21 }
 0x66f   : > { %v1424_v17 = vmul.f32 1.442695, %v1395_v30 }
 0x670   : > { %3655 = vpow2.f32 %v1402_v11  ;;  %v1394_v11 = vsub.f32 %v6268_v19, %v5573_v49 }
 0x671   : > { %3657 = vpow2.f32 %v1398_v54 }
 0x672   : > { %v1422_v19 = vmul.f32 1.442695, %v1394_v11 }
 0x675   : > { %2081 = vmatmul.mubr.bf16.gmra.mrb[28].mxu0 %v6315_v47 }
 0x676   : > { %2088 = vmatprep.mubr.bf16.mxu0 %v6317_v42  ;;  %v1404_v42 = vmul.f32 1.442695, %v1385_v39 }
 0x678   : > { %3659 = vpow2.f32 %v1404_v42  ;;  %v1396_v42 = vsub.f32 %v6270_v61, %v5583_v59 }
 0x67a   : > { %v3656_v20 = vpop.eup %3655 }
 0x67b   : > { %v3658_v63 = vpop.eup %3657  ;;  %v1480_v22 = vmul.f32 %v3656_v20, %v6328_v14 }
 0x67c   : > { %v1478_v26 = vmul.f32 %v3658_v63, %v6329_v4 }
 0x67d   : > { %2089 = vmatmul.mubr.bf16.gmra.mrb[32].mxu0 %v6319_v10  ;;  %v1400_v10 = vmul.f32 1.442695, %v1383_v0 }
 0x67e   : > { %2096 = vmatprep.mubr.bf16.mxu0 %v6320_v27  ;;  %v1390_v27 = vsub.f32 %v6264_v9, %v5553_v43  ;;  %v1416_v9 = vmul.f32 1.442695, %v1391_v3 }
 0x67f   : > { %3661 = vpow2.f32 %v1400_v10 }
 0x680   : > { %3663 = vpow2.f32 %v1410_v18  ;;  %v1414_v51 = vmul.f32 1.442695, %v1390_v27  ;;  %v6333_v18 = vld [vmem:[#allocation125_spill] sm:$0xff]  ;;  %v6334_v27 = vld [vmem:[#allocation124_spill] sm:$0xff] }
 0x681   : > { %3665 = vpow2.f32 %v1406_v46 }
 0x685   : > { %2097 = vmatmul.mubr.bf16.gmra.mrb[36].mxu0 %v6321_v38  ;;  %v1412_v38 = vmul.f32 1.442695, %v1389_v13 }
 0x686   : > { %2104 = vmatprep.mubr.bf16.mxu0 %v6323_v6  ;;  %v3660_v6 = vpop.eup %3659 }
 0x687   : > { %3667 = vpow2.f32 %v1412_v38  ;;  %v1481_v62 = vmul.f32 %v3660_v6, %v6330_v23  ;;  %v1545_v23 = vmul.f32 %v3660_v6, %v6157_v5  ;;  %v6337_v6 = vld [vmem:[#allocation129_spill] sm:$0xff] }
 0x688   : > { %3669 = vpow2.f32 %v1408_v8 }
 0x689   : > { %v5683_v43 = vpop.eup %3661  ;;  %3671 = vpow2.f32 %v1414_v51 }
 0x68a   : > { %3673 = vpow2.f32 %v1416_v9  ;;  %v1479_v39 = vmul.f32 %v5683_v43, %v6331_v37  ;;  %v1544_v9 = vmul.f32 %v3656_v20, %v6153_v1  ;;  %v1543_v20 = vmul.f32 %v5683_v43, %v6158_v55  ;;  %v6338_v43 = vld [vmem:[#allocation128_spill] sm:$0xff] }
 0x68b   : > { %3675 = vpow2.f32 %v1418_v33 }
 0x68d   : > { %2105 = vmatmul.mubr.bf16.gmra.mrb[40].mxu0 %v6325_v2  ;;  %v1420_v2 = vmul.f32 1.442695, %v1393_v34 }
 0x68e   : > { %2112 = vmatprep.mubr.bf16.mxu0 %v6326_v32 }
 0x68f   : > { %3677 = vpow2.f32 %v1420_v2  ;;  %v1542_v2 = vmul.f32 %v3658_v63, %v6155_v16 }
 0x695   : > { %2113 = vmatmul.mubr.bf16.gmra.mrb[44].mxu0 %v6327_v60 }
 0x6ae   : > { %v1495_v47 = vpop.xlane.xlu0 %1494 }
 0x6af   : > { %v1526_v21 = vadd.f32 %v1495_v47, %v1478_v26  ;;  %v1397_v47 = vsub.f32 %v6271_v31, %v5588_v50 }
 0x6b1   : > { %v1428_v36 = vmul.f32 1.442695, %v1397_v47 }
 0x6b2   : > { %v1497_v57 = vpop.xlane.xlu1 %1496  ;;  %v1499_v58 = vpop.xlane.xlu0 %1498 }
 0x6b3   : > { %v1528_v60 = vadd.f32 %v1499_v58, %v1480_v22  ;;  %v1527_v10 = vadd.f32 %v1497_v57, %v1479_v39  ;;  %v5696_v58 = vpop.eup %3663 }
 0x6b4   : > { %v5700_v13 = vpop.eup %3665  ;;  %v1484_v57 = vmul.f32 %v5696_v58, %v6332_v45  ;;  %v6339_v45 = vld [vmem:[#allocation130_spill] sm:$0xff] }
 0x6b5   : > { %3679 = vrcp.f32 %v1528_v60  ;;  %v5702_v49 = vpop.eup %3667  ;;  %v1482_v31 = vmul.f32 %v5700_v13, %v6333_v18 }
 0x6b6   : > { %v1501_v29 = vpop.xlane.xlu1 %1500  ;;  %v1503_v56 = vpop.xlane.xlu0 %1502  ;;  %3681 = vrcp.f32 %v1526_v21  ;;  %v1485_v38 = vmul.f32 %v5702_v49, %v6334_v27 }
 0x6b7   : > { %v1529_v54 = vadd.f32 %v1501_v29, %v1481_v62  ;;  %v1426_v29 = vmul.f32 1.442695, %v1396_v42  ;;  %v5704_v59 = vpop.eup %3669  ;;  %v1530_v8 = vadd.f32 %v1503_v56, %v1482_v31 }
 0x6b8   : > { %v5710_v50 = vpop.eup %3671  ;;  %v1483_v34 = vmul.f32 %v5704_v59, %v6335_v44  ;;  %v1548_v44 = vmul.f32 %v5696_v58, %v6161_v53  ;;  %v1549_v53 = vmul.f32 %v5702_v49, %v6165_v25  ;;  %v1547_v58 = vmul.f32 %v5704_v59, %v6166_v40  ;;  %v6342_v40 = vld [vmem:[#allocation66_spill] sm:$0xff]  ;;  %v6343_v59 = vld [vmem:[#allocation65_spill] sm:$0xff] }
 0x6b9   : > { %3683 = vrcp.f32 %v1529_v54  ;;  %v5714_v3 = vpop.eup %3673 }
 0x6ba   : > { %v1507_v32 = vpop.xlane.xlu0 %1506  ;;  %3685 = vrcp.f32 %v1527_v10  ;;  %v5719_v33 = vpop.eup %3675  ;;  %v1486_v10 = vmul.f32 %v5710_v50, %v6337_v6 }
 0x6bb   : > { %v1505_v41 = vpop.xlane.xlu1 %1504  ;;  %3687 = vpow2.f32 %v1422_v19  ;;  %v1532_v46 = vadd.f32 %v1507_v32, %v1484_v57  ;;  %v5722_v4 = vpop.eup %3677  ;;  %v1487_v57 = vmul.f32 %v5714_v3, %v6339_v45 }
 0x6bc   : > { %3689 = vpow2.f32 %v1426_v29  ;;  %v1531_v26 = vadd.f32 %v1505_v41, %v1483_v34  ;;  %v6336_v41 = vld [vmem:[#allocation127_spill] sm:$0xff]  ;;  %v1489_v19 = vmul.f32 %v5722_v4, %v6338_v43  ;;  %v6340_v34 = vld [vmem:[#allocation64_spill] sm:$0xff] }
 0x6bd   : > { %3691 = vpow2.f32 %v1424_v17  ;;  %v1488_v11 = vmul.f32 %v5719_v33, %v6336_v41  ;;  %v6346_v43 = vld [vmem:[#allocation131_spill] sm:$0xff] }
 0x6be   : > { %v1511_v12 = vpop.xlane.xlu0 %1510  ;;  %3693 = vpow2.f32 %v1428_v36 }
 0x6bf   : > { %v1509_v0 = vpop.xlane.xlu1 %1508  ;;  %v3680_v62 = vpop.eup %3679  ;;  %3695 = vrcp.f32 %v1532_v46  ;;  %v1534_v17 = vadd.f32 %v1511_v12, %v1486_v10  ;;  %v6344_v10 = vld [vmem:[#allocation68_spill] sm:$0xff] }
 0x6c0   : > { %v1533_v14 = vadd.f32 %v1509_v0, %v1485_v38  ;;  %v3682_v37 = vpop.eup %3681  ;;  %3697 = vrcp.f32 %v1530_v8 }
 0x6c2   : > { %v1515_v51 = vpop.xlane.xlu0 %1514  ;;  %3699 = vrcp.f32 %v1533_v14 }
 0x6c3   : > { %v1513_v61 = vpop.xlane.xlu1 %1512  ;;  %v3684_v0 = vpop.eup %3683  ;;  %3701 = vrcp.f32 %v1531_v26  ;;  %v1536_v55 = vadd.f32 %v1515_v51, %v1488_v11  ;;  %v6341_v51 = vld [vmem:[#allocation63_spill] sm:$0xff] }
 0x6c4   : > { %v3686_v5 = vpop.eup %3685  ;;  %v1535_v8 = vadd.f32 %v1513_v61, %v1487_v57 }
 0x6c5   : > { %v5735_v31 = vpop.eup %3687  ;;  %3703 = vrcp.f32 %v1536_v55 }
 0x6c6   : > { %v1519_v30 = vpop.xlane.xlu0 %1518  ;;  %v5737_v38 = vpop.eup %3689  ;;  %3705 = vrcp.f32 %v1534_v17  ;;  %v6347_v17 = vld [vmem:[#allocation132_spill] sm:$0xff] }
 0x6c7   : > { %v1517_v32 = vpop.xlane.xlu1 %1516  ;;  %v5743_v14 = vpop.eup %3691  ;;  %v1553_v45 = vmul.f32 %v5722_v4, %v6347_v17 }
 0x6c8   : > { %v1537_v46 = vadd.f32 %v1517_v32, %v1489_v19 }
 0x6ca   : > { %v1523_v26 = vpop.xlane.xlu0 %1522  ;;  %3707 = vrcp.f32 %v1537_v46 }
 0x6cb   : > { %v1521_v36 = vpop.xlane.xlu1 %1520  ;;  %3709 = vrcp.f32 %v1535_v8 }
 0x6fb   : > { %v2915_v22 = vpop.f32.mrb[0].mxu1 }
 0x6fc   : > { %v1665_v60 = vadd.f32 %v2915_v22, %v1544_v9  ;;  %v1600_v56 = vpop.f32.mrb[1].mxu1  ;;  %v2580_v9 = vcombine.low %v6341_v51, %v6340_v34  ;;  %v1546_v22 = vmul.f32 %v5700_v13, %v6163_v15  ;;  %v1492_v15 = vmul.f32 %v5737_v38, %v6151_v28  ;;  %v6350_v34 = vld [vmem:[#allocation69_spill] sm:$0xff] }
 0x6fd   : > { %v1663_v21 = vadd.f32 %v1600_v56, %v1542_v2  ;;  %v2916_v1 = vpop.f32.mrb[2].mxu1  ;;  %v5747_v2 = vpop.eup %3693  ;;  %v1490_v56 = vmul.f32 %v5735_v31, %v6149_v7 }
 0x6fe   : > { %v1697_v39 = vmul.f32 %v3680_v62, %v1665_v60  ;;  %v1666_v16 = vadd.f32 %v2916_v1, %v1545_v23  ;;  %v1603_v63 = vpop.f32.mrb[3].mxu1  ;;  %v3696_v60 = vpop.eup %3695  ;;  %v1540_v7 = vadd.f32 %v1523_v26, %v1492_v15 }
 0x6ff   : > { %v1695_v54 = vmul.f32 %v3682_v37, %v1663_v21  ;;  %v1664_v42 = vadd.f32 %v1603_v63, %v1543_v20  ;;  %v3698_v62 = vpop.eup %3697  ;;  %v1525_v21 = vpop.xlane.xlu1 %1524  ;;  %v2581_v20 = vcombine.low %v6343_v59, %v6342_v40 }
 0x700   : > { %v1698_v47 = vmul.f32 %v3684_v0, %v1666_v16  ;;  %v3700_v37 = vpop.eup %3699  ;;  %v1538_v0 = vadd.f32 %v1519_v30, %v1490_v56  ;;  %3711 = vrcp.f32 %v1540_v7  ;;  %v1550_v30 = vmul.f32 %v5710_v50, %v6346_v43 }
 0x701   : > { %v1696_v29 = vmul.f32 %v3686_v5, %v1664_v42  ;;  %v3702_v63 = vpop.eup %3701  ;;  %v1552_v5 = vmul.f32 %v5719_v33, %v6169_v35 }
 0x702   : > { %v1712_v18 = vpack.c.bf16 %v1698_v47, %v1697_v39  ;;  %v1493_v39 = vmul.f32 %v5747_v2, %v6152_v24  ;;  %v6345_v47 = vld [vmem:[#allocation67_spill] sm:$0xff]  ;;  %3713 = vrcp.f32 %v1538_v0  ;;  %v3704_v57 = vpop.eup %3703 }
 0x703   : > { %v1711_v27 = vpack.c.bf16 %v1696_v29, %v1695_v54  ;;  %v2582_v24 = vcombine.low %v6345_v47, %v6344_v10  ;;  %v3706_v46 = vpop.eup %3705 }
 0x704   : > { %v2919_v12 = vpop.f32.mrb[4].mxu1  ;;  %v1541_v11 = vadd.f32 %v1525_v21, %v1493_v39  ;;  %v3708_v4 = vpop.eup %3707 }
 0x705   : > { %2945 = vmatprep.mubr.bf16.mxu1 %v1711_v27  ;;  %v1669_v32 = vadd.f32 %v2919_v12, %v1548_v44  ;;  %v1616_v61 = vpop.f32.mrb[5].mxu1  ;;  %v6349_v44 = vld [vmem:[#allocation70_spill] sm:$0xff] }
 0x706   : > { %2946 = vmatmul.mubr.bf16.vlgmr.msra.gmra.mrb[16].mxu1 %v1712_v18  ;;  %v1667_v13 = vadd.f32 %v1616_v61, %v1546_v22  ;;  %v2920_v23 = vpop.f32.mrb[6].mxu1  ;;  %3715 = vrcp.f32 %v1541_v11  ;;  %v2583_v51 = vcombine.low %v6350_v34, %v6349_v44  ;;  %v3710_v22 = vpop.eup %3709  ;;  %v6351_v61 = vld [vmem:[#allocation134_spill] sm:$0xff] }
 0x707   : > { %2962 = vmatpush3.bf16.msra.mxu1 %v5630_v48  ;;  %v1701_v25 = vmul.f32 %v3696_v60, %v1669_v32  ;;  %v1670_v49 = vadd.f32 %v2920_v23, %v1549_v53  ;;  %v1619_v1 = vpop.f32.mrb[7].mxu1  ;;  %v1491_v48 = vmul.f32 %v5743_v14, %v6150_v52  ;;  %v6353_v60 = vld [vmem:[#allocation71_spill] sm:$0xff] }
 0x708   : > { %2963 = vmatprep.subr.bf16.mxu1 %v2580_v9  ;;  %v1699_v28 = vmul.f32 %v3698_v62, %v1667_v13  ;;  %v1668_v16 = vadd.f32 %v1619_v1, %v1547_v58  ;;  %v6352_v58 = vld [vmem:[#allocation72_spill] sm:$0xff]  ;;  %v6354_v13 = vld [vmem:[#allocation135_spill] sm:$0xff] }
 0x709   : > { %v1702_v41 = vmul.f32 %v3700_v37, %v1670_v49  ;;  %v1539_v42 = vadd.f32 %v1521_v36, %v1491_v48  ;;  %v6348_v36 = vld [vmem:[#allocation133_spill] sm:$0xff]  ;;  %v2584_v56 = vcombine.low %v6353_v60, %v6352_v58  ;;  %v1554_v23 = vmul.f32 %v5735_v31, %v6354_v13  ;;  %v6355_v49 = vld [vmem:[#allocation136_spill] sm:$0xff] }
 0x70a   : > { %v1700_v54 = vmul.f32 %v3702_v63, %v1668_v16  ;;  %v1551_v18 = vmul.f32 %v5714_v3, %v6348_v36  ;;  %v1556_v3 = vmul.f32 %v5737_v38, %v6351_v61  ;;  %v1557_v1 = vmul.f32 %v5747_v2, %v6355_v49  ;;  %v3712_v40 = vpop.eup %3711  ;;  %v6356_v38 = vld [vmem:[#allocation137_spill] sm:$0xff]  ;;  %v6357_v31 = vld [vmem:[#allocation74_spill] sm:$0xff]  ;;  %v6358_v63 = vld [vmem:[#allocation73_spill] sm:$0xff] }
 0x70b   : > { %2964 = vmatpush3.bf16.msra.mxu1 %v2580_v9  ;;  %v1714_v6 = vpack.c.bf16 %v1702_v41, %v1701_v25  ;;  %3717 = vrcp.f32 %v1539_v42  ;;  %v1555_v37 = vmul.f32 %v5743_v14, %v6356_v38  ;;  %v2585_v0 = vcombine.low %v6358_v63, %v6357_v31  ;;  %v6359_v14 = vld [vmem:[#allocation76_spill] sm:$0xff] }
 0x70c   : > { %2965 = vmatprep.subr.bf16.mxu1 %v2581_v20  ;;  %v2923_v55 = vpop.f32.mrb[8].mxu1  ;;  %v1713_v19 = vpack.c.bf16 %v1700_v54, %v1699_v28  ;;  %v3714_v7 = vpop.eup %3713 }
 0x70d   : > { %v1673_v52 = vadd.f32 %v2923_v55, %v1552_v5  ;;  %v1632_v29 = vpop.f32.mrb[9].mxu1 }
 0x70e   : > { %v1671_v35 = vadd.f32 %v1632_v29, %v1550_v30  ;;  %v2924_v33 = vpop.f32.mrb[10].mxu1  ;;  %2949 = vmatprep.mubr.bf16.mxu1 %v1713_v19  ;;  %v6364_v30 = vld [vmem:[#allocation22_spill] sm:$0xff]  ;;  %v6367_v29 = vld [vmem:[#allocation25_spill] sm:$0xff] }
 0x70f   : > { %2966 = vmatpush3.bf16.msra.mxu1 %v2581_v20  ;;  %v1705_v27 = vmul.f32 %v3704_v57, %v1673_v52  ;;  %v1674_v50 = vadd.f32 %v2924_v33, %v1553_v45  ;;  %v1635_v8 = vpop.f32.mrb[11].mxu1  ;;  %v6365_v19 = vunpack.c.l.s8.bf16 %v6364_v30  ;;  %v6366_v52 = vunpack.c.h.s8.bf16 %v6364_v30  ;;  %v6370_v57 = vld [vmem:[#allocation28_spill] sm:$0xff] }
 0x710   : > { %2950 = vmatmul.mubr.bf16.gmra.mrb[20].mxu1 %v1714_v6  ;;  %2967 = vmatprep.subr.bf16.mxu1 %v2582_v24  ;;  %v1703_v9 = vmul.f32 %v3706_v46, %v1671_v35  ;;  %v1672_v12 = vadd.f32 %v1635_v8, %v1551_v18  ;;  %v3716_v48 = vpop.eup %3715  ;;  %v6360_v6 = vld [vmem:[#allocation75_spill] sm:$0xff]  ;;  %v6368_v17 = vunpack.c.l.s8.bf16 %v6367_v29  ;;  %v6369_v45 = vunpack.c.h.s8.bf16 %v6367_v29 }
 0x711   : > { %v1706_v26 = vmul.f32 %v3708_v4, %v1674_v50  ;;  %v2586_v10 = vcombine.low %v6360_v6, %v6359_v14  ;;  %v6371_v35 = vunpack.c.l.s8.bf16 %v6370_v57  ;;  %v6372_v33 = vunpack.c.h.s8.bf16 %v6370_v57 }
 0x712   : > { %v1704_v32 = vmul.f32 %v3710_v22, %v1672_v12 }
 0x713   : > { %2968 = vmatpush3.bf16.msra.mxu1 %v2582_v24  ;;  %v1716_v53 = vpack.c.bf16 %v1706_v26, %v1705_v27  ;;  %v6361_v24 = vld [vmem:[#allocation19_spill] sm:$0xff] }
 0x714   : > { %2969 = vmatprep.subr.bf16.mxu1 %v2583_v51  ;;  %v2927_v15 = vpop.f32.mrb[12].mxu1  ;;  %v1715_v62 = vpack.c.bf16 %v1704_v32, %v1703_v9  ;;  %v6362_v55 = vunpack.c.l.s8.bf16 %v6361_v24  ;;  %v6363_v43 = vunpack.c.h.s8.bf16 %v6361_v24 }
 0x715   : > { %v1677_v21 = vadd.f32 %v2927_v15, %v1556_v3  ;;  %v1648_v25 = vpop.f32.mrb[13].mxu1  ;;  %v3718_v11 = vpop.eup %3717 }
 0x716   : > { %v1675_v59 = vadd.f32 %v1648_v25, %v1554_v23  ;;  %v2928_v20 = vpop.f32.mrb[14].mxu1  ;;  %2953 = vmatprep.mubr.bf16.mxu1 %v1715_v62 }
 0x717   : > { %2970 = vmatpush3.bf16.msra.mxu1 %v2583_v51  ;;  %v1709_v39 = vmul.f32 %v3712_v40, %v1677_v21  ;;  %v1678_v28 = vadd.f32 %v2928_v20, %v1557_v1  ;;  %v1651_v16 = vpop.f32.mrb[15].mxu1 }
 0x718   : > { %2954 = vmatmul.mubr.bf16.gmra.mrb[24].mxu1 %v1716_v53  ;;  %2971 = vmatprep.subr.bf16.mxu1 %v2584_v56  ;;  %v1707_v41 = vmul.f32 %v3714_v7, %v1675_v59  ;;  %v1676_v2 = vadd.f32 %v1651_v16, %v1555_v37 }
 0x719   : > { %v1710_v54 = vmul.f32 %v3716_v48, %v1678_v28 }
 0x71a   : > { %v1708_v42 = vmul.f32 %v3718_v11, %v1676_v2 }
 0x71b   : > { %2972 = vmatpush3.bf16.msra.mxu1 %v2584_v56  ;;  %v1718_v5 = vpack.c.bf16 %v1710_v54, %v1709_v39 }
 0x71c   : > { %2973 = vmatprep.subr.bf16.mxu1 %v2585_v0  ;;  %v1717_v47 = vpack.c.bf16 %v1708_v42, %v1707_v41 }
 0x71e   : > { %2957 = vmatprep.mubr.bf16.mxu1 %v1717_v47 }
 0x71f   : > { %2974 = vmatpush3.bf16.msra.mxu1 %v2585_v0 }
 0x720   : > { %2958 = vmatmul.mubr.bf16.gmra.mrb[28].mxu1 %v1718_v5  ;;  %2975 = vmatprep.subr.bf16.mxu1 %v2586_v10 }
 0x721   : > { %2977 = vmatprep.mubr.bf16.mxu1 %v6362_v55 }
 0x723   : > { %2976 = vmatpush3.bf16.msra.mxu1 %v2586_v10 }
 0x728   : > { %2978 = vmatmul.mubr.bf16.vlgmr.msra.gmra.mrb[16].mxu1 %v6363_v43 }
 0x729   : > { %2981 = vmatprep.mubr.bf16.mxu1 %v6365_v19 }
 0x730   : > { %2982 = vmatmul.mubr.bf16.gmra.mrb[20].mxu1 %v6366_v52  ;;  %v2705_v36 = vpop.f32.mrb[16].mxu0 }
 0x731   : > { %2985 = vmatprep.mubr.bf16.mxu1 %v6368_v17  ;;  %v2706_v18 = vpop.f32.mrb[17].mxu0 }
 0x732   : > { %v2707_v46 = vadd.f32 %v2706_v18, %v2705_v36  ;;  %v2708_v27 = vpop.f32.mrb[18].mxu0 }
 0x733   : > { %v2709_v50 = vpop.f32.mrb[19].mxu0 }
 0x734   : > { %v2710_v8 = vadd.f32 %v2709_v50, %v2708_v27 }
 0x738   : > { %2986 = vmatmul.mubr.bf16.gmra.mrb[24].mxu1 %v6369_v45  ;;  %v2711_v44 = vpop.f32.mrb[20].mxu0 }
 0x739   : > { %2989 = vmatprep.mubr.bf16.mxu1 %v6371_v35  ;;  %v2712_v34 = vpop.f32.mrb[21].mxu0 }
 0x73a   : > { %v2713_v51 = vadd.f32 %v2712_v34, %v2711_v44  ;;  %v2714_v4 = vpop.f32.mrb[22].mxu0 }
 0x73b   : > { %v2715_v9 = vpop.f32.mrb[23].mxu0 }
 0x73c   : > { %v2716_v12 = vadd.f32 %v2715_v9, %v2714_v4 }
 0x740   : > { %2990 = vmatmul.mubr.bf16.gmra.mrb[28].mxu1 %v6372_v33  ;;  %v2717_v22 = vpop.f32.mrb[24].mxu0 }
 0x741   : > { %v2718_v26 = vpop.f32.mrb[25].mxu0 }
 0x742   : > { %v2719_v32 = vadd.f32 %v2718_v26, %v2717_v22  ;;  %v2720_v61 = vpop.f32.mrb[26].mxu0 }
 0x743   : > { %v2721_v3 = vpop.f32.mrb[27].mxu0 }
 0x744   : > { %v2722_v53 = vadd.f32 %v2721_v3, %v2720_v61 }
 0x748   : > { %v2723_v58 = vpop.f32.mrb[28].mxu0 }
 0x749   : > { %v2724_v60 = vpop.f32.mrb[29].mxu0 }
 0x74a   : > { %v2725_v56 = vadd.f32 %v2724_v60, %v2723_v58  ;;  %v2726_v15 = vpop.f32.mrb[30].mxu0 }
 0x74b   : > { %v2727_v13 = vpop.f32.mrb[31].mxu0 }
 0x74c   : > { %v2728_v23 = vadd.f32 %v2727_v13, %v2726_v15 }
 0x750   : > { %v2729_v62 = vpop.f32.mrb[32].mxu0 }
 0x751   : > { %v2730_v21 = vpop.f32.mrb[33].mxu0 }
 0x752   : > { %v2731_v25 = vadd.f32 %v2730_v21, %v2729_v62  ;;  %v2732_v49 = vpop.f32.mrb[34].mxu0 }
 0x753   : > { %v2733_v1 = vpop.f32.mrb[35].mxu0 }
 0x754   : > { %v2734_v40 = vadd.f32 %v2733_v1, %v2732_v49 }
 0x758   : > { %v2735_v59 = vpop.f32.mrb[36].mxu0 }
 0x759   : > { %v2736_v20 = vpop.f32.mrb[37].mxu0 }
 0x75a   : > { %v2737_v38 = vadd.f32 %v2736_v20, %v2735_v59  ;;  %v2738_v37 = vpop.f32.mrb[38].mxu0 }
 0x75b   : > { %v2739_v7 = vpop.f32.mrb[39].mxu0 }
 0x75c   : > { %v2740_v39 = vadd.f32 %v2739_v7, %v2738_v37 }
 0x760   : > { %v2741_v28 = vpop.f32.mrb[40].mxu0 }
 0x761   : > { %v2742_v16 = vpop.f32.mrb[41].mxu0 }
 0x762   : > { %v2743_v31 = vadd.f32 %v2742_v16, %v2741_v28  ;;  %v2744_v63 = vpop.f32.mrb[42].mxu0 }
 0x763   : > { %v2745_v0 = vpop.f32.mrb[43].mxu0 }
 0x764   : > { %v2746_v48 = vadd.f32 %v2745_v0, %v2744_v63 }
 0x768   : > { %v2747_v41 = vpop.f32.mrb[44].mxu0 }
 0x769   : > { %v2748_v2 = vpop.f32.mrb[45].mxu0 }
 0x76a   : > { %v2749_v11 = vadd.f32 %v2748_v2, %v2747_v41  ;;  %v2750_v54 = vpop.f32.mrb[46].mxu0 }
 0x76b   : > { %v2751_v42 = vpop.f32.mrb[47].mxu0 }
 0x76c   : > { %v2752_v5 = vadd.f32 %v2751_v42, %v2750_v54 }
 0x7fb   : > { %v2979_v14 = vpop.f32.mrb[16].mxu1 }
 0x7fc   : > { %v3009_v6 = vadd.f32 %v2979_v14, %v2713_v51  ;;  %v2155_v10 = vpop.f32.mrb[17].mxu1 }
 0x7fd   : > { %v3010_v47 = vadd.f32 %v2707_v46, %v2155_v10  ;;  %v2980_v24 = vpop.f32.mrb[18].mxu1 }
 0x7fe   : > { %2220 = vst [vmem:[%s4729_s20 + $0x10] sm:$0xff] %v3009_v6  ;;  %v3011_v55 = vadd.f32 %v2980_v24, %v2716_v12  ;;  %v2158_v43 = vpop.f32.mrb[19].mxu1 }
 0x7ff   : > { %2218 = vst [vmem:[%s4729_s20] sm:$0xff] %v3010_v47  ;;  %v3012_v30 = vadd.f32 %v2710_v8, %v2158_v43 }
 0x800   : > { %2221 = vst [vmem:[%s4729_s20 + $0x18] sm:$0xff] %v3011_v55 }
 0x801   : > { %2219 = vst [vmem:[%s4729_s20 + $0x8] sm:$0xff] %v3012_v30 }
 0x803   : > { %v2983_v19 = vpop.f32.mrb[20].mxu1 }
 0x804   : > { %v3013_v52 = vadd.f32 %v2983_v19, %v2725_v56  ;;  %v2171_v29 = vpop.f32.mrb[21].mxu1 }
 0x805   : > { %v3014_v17 = vadd.f32 %v2719_v32, %v2171_v29  ;;  %v2984_v45 = vpop.f32.mrb[22].mxu1 }
 0x806   : > { %2224 = vst [vmem:[%s4729_s20 + $0x30] sm:$0xff] %v3013_v52  ;;  %v3015_v57 = vadd.f32 %v2984_v45, %v2728_v23  ;;  %v2174_v35 = vpop.f32.mrb[23].mxu1 }
 0x807   : > { %2222 = vst [vmem:[%s4729_s20 + $0x20] sm:$0xff] %v3014_v17  ;;  %v3016_v33 = vadd.f32 %v2722_v53, %v2174_v35 }
 0x808   : > { %2225 = vst [vmem:[%s4729_s20 + $0x38] sm:$0xff] %v3015_v57 }
 0x809   : > { %2223 = vst [vmem:[%s4729_s20 + $0x28] sm:$0xff] %v3016_v33 }
 0x80b   : > { %v2987_v36 = vpop.f32.mrb[24].mxu1 }
 0x80c   : > { %v3017_v18 = vadd.f32 %v2987_v36, %v2737_v38  ;;  %v2187_v46 = vpop.f32.mrb[25].mxu1 }
 0x80d   : > { %v3018_v27 = vadd.f32 %v2731_v25, %v2187_v46  ;;  %v2988_v50 = vpop.f32.mrb[26].mxu1 }
 0x80e   : > { %2228 = vst [vmem:[%s4729_s20 + $0x50] sm:$0xff] %v3017_v18  ;;  %v3019_v8 = vadd.f32 %v2988_v50, %v2740_v39  ;;  %v2190_v44 = vpop.f32.mrb[27].mxu1 }
 0x80f   : > { %2226 = vst [vmem:[%s4729_s20 + $0x40] sm:$0xff] %v3018_v27  ;;  %v3020_v34 = vadd.f32 %v2734_v40, %v2190_v44 }
 0x810   : > { %2229 = vst [vmem:[%s4729_s20 + $0x58] sm:$0xff] %v3019_v8 }
 0x811   : > { %2227 = vst [vmem:[%s4729_s20 + $0x48] sm:$0xff] %v3020_v34 }
 0x813   : > { %v2991_v51 = vpop.f32.mrb[28].mxu1 }
 0x814   : > { %v3021_v4 = vadd.f32 %v2991_v51, %v2749_v11  ;;  %v2203_v9 = vpop.f32.mrb[29].mxu1 }
 0x815   : > { %v3022_v12 = vadd.f32 %v2743_v31, %v2203_v9  ;;  %v2992_v22 = vpop.f32.mrb[30].mxu1 }
 0x816   : > { %2232 = vst [vmem:[%s4729_s20 + $0x70] sm:$0xff] %v3021_v4  ;;  %v3023_v26 = vadd.f32 %v2992_v22, %v2752_v5  ;;  %v2206_v32 = vpop.f32.mrb[31].mxu1 }
 0x817   : > { %2230 = vst [vmem:[%s4729_s20 + $0x60] sm:$0xff] %v3022_v12  ;;  %v3024_v61 = vadd.f32 %v2746_v48, %v2206_v32 }
 0x818   : > { %2233 = vst [vmem:[%s4729_s20 + $0x78] sm:$0xff] %v3023_v26 }
 0x819   : > { %2231 = vst [vmem:[%s4729_s20 + $0x68] sm:$0xff] %v3024_v61 }
 0x81a   : > { %3846 = shalt.err (!%p3843_p13)
}
 0x81b   : > { %s3847_s10 = scalar_lea.hbm %s5824_s11, 2048  ;;  %s3851_s24 = scalar_lea.hbm %s5876_s4, 6144 }
 0x81c   : > { %p3848_p7 = scmp.ne.s32.totalorder %s5824_s11, %s3847_s10  ;;  %p3852_p10 = scmp.lt.u32.totalorder %s5824_s11, %s5876_s4 }
 0x81d   : > { %p3853_p1 = scmp.lt.u32.totalorder %s3851_s24, %s3847_s10  ;;  %p3855_p0 = scmp.lt.u32.totalorder %s3847_s10, %s5824_s11 }
 0x81e   : > { %p3849_p8 = pnand %p3848_p7, %p6373_p2 }
 0x81f   : > { %p3854_p4 = por %p3853_p1, %p3852_p10 }
 0x820   : > { %p3850_p9 = pneg %p3849_p8 }
 0x821   : > { %p3856_p5 = por %p3855_p0, %p3854_p4 }
 0x823   : > { %p3857_p11 = pnand %p3856_p5, %p3850_p9 }
 0x825   : > { %3860 = shalt.err (!%p3857_p11)
}
 0x826   : > { %s4314_s12 = smov 128   ;;  %s4315_s13 = smov 8  }
 0x827   : > { %3058 = dma.vmem_to_hbm [thread:$0]  (%p6373_p2), %s5826_s6, 2048, %s5824_s11, %s2235_s19, %s4314_s12, %s4314_s12, %s4315_s13  }
 0x828 PF: > { %p3085_p12 = scmp.ge.s32.totalorder %s4107_s18, 2  ;;  %s2263_s23 = sand.u32 1, %s4095_s15  }
 0x829   : > { %p6374_p3 = scmp.ne.s32.totalorder %s5958_s28, 0  ;;  %s2264_s9 = scalar_lea.sflag [#allocation4], %s2263_s23 }
 0x82b   : > { %p3075_p6 = pnand %p3085_p12, %p6374_p3 }
 0x82d   : > { %4090 = dma.done.wait (!%p3075_p6), %s2264_s9, 2048  }
 0x82e   : > { %4092 = vsyncadd (!%p3075_p6), %s2264_s9, 4294965248  ;;  %s6375_s30 = sld [smem:[#allocation16_spill]]  ;;  %p19_p13 = scmp.ge.s32.totalorder %s4366_s21, 5  }
 0x82f   : > { %s6376_s15 = smov %s4099_s16  ;;  %s6377_s16 = smov %s4103_s17 }
 0x830   : > { %s6379_s18 = smov %s4366_s21  ;;  %21 = sbr.rel (!%p19_p13) target bundleno = 9 (0x9), region = 115 }
 0x834   : > { %s6378_s17 = smov %s6375_s30 }
 0x837   :  { %2269 = vsyncpa [#allocation3], 1 }
 0x838   :  { %2271 = vsyncpa [#allocation3 + $0x1], 1 }
 0x839   :  { %2272 = vsyncpa [#allocation6], 1 }
 0x83a   :  { %2274 = vsyncpa [#allocation6 + $0x1], 1 }
 0x83b   :  { %2275 = vsyncpa [#allocation9], 1 }
 0x83c   :  { %2276 = vsyncpa [#allocation4], 1 }
 0x83d   :  { %2278 = vsyncpa [#allocation4 + $0x1], 1 }

</bundles_post_ra>
